<compile_context>
chip_gen: v6e
topology: v6e:2x2x1
jax: 0.10.0
libtpu: 0.0.40
codegen_flags: <defaults>
</compile_context>

<pallas_src>
import functools

import jax
import jax.numpy as jnp
from jax.experimental import pallas as pl
from jax.experimental.pallas import tpu as pltpu

C = 128      # padded channel / lane width for every layer
K1 = 16      # conv1 im2col lane width (9 taps padded to 16)


def _round_up(n, m):
    return ((n + m - 1) // m) * m


# ----------------------------- Pallas kernel ------------------------------ #

def _qnet_fused_kernel(cols1_ref, w1_ref, b1_ref,
                       w2_ref, b2_ref,
                       w3_ref, b3_ref,
                       wl1_ref, bl1_ref,
                       wl2_ref, bl2_ref,
                       wh_ref, bh_ref,
                       o_ref,
                       a1_ref, c2_ref, a2_ref, c3_ref, a3_ref, c4_ref):
    """Whole Q_Net forward for one batch chunk; everything VMEM-resident.

    Row layout of every conv activation / im2col scratch: (h*W + w)*bc + b
    (batch minor), lanes = channels padded to 128.  All tap gathers are
    sublane-aligned static slices; each layer is a single MXU matmul.
    """
    f32, bf16 = jnp.float32, jnp.bfloat16
    bc = o_ref.shape[0]

    def dense(x, w_ref, b_ref, relu=True):
        y = jnp.dot(x, w_ref[...], preferred_element_type=f32) + b_ref[...]
        return jnp.maximum(y, 0.0) if relu else y

    def gather_taps(src_ref, dst_ref, W, OH, OW):
        # dst[(oh*OW+ow)*bc + b, t*128 + c] = src[((oh+i)*W + (ow+j))*bc + b, c]
        # Each (tap, oh) pair is one contiguous, 8-aligned row-slice copy.
        for t in range(9):
            i, j = t // 3, t % 3
            for oh in range(OH):
                src0 = ((oh + i) * W + j) * bc
                dst0 = oh * OW * bc
                dst_ref[dst0:dst0 + OW * bc, t * C:(t + 1) * C] = \
                    src_ref[src0:src0 + OW * bc, :]

    # conv1: single matmul over the (wrapper-built, 16-lane) im2col.
    a1_ref[...] = dense(cols1_ref[...], w1_ref, b1_ref).astype(bf16)   # [36*bc,128]

    # conv2: aligned-slice im2col -> one deep-K (1152) matmul.
    gather_taps(a1_ref, c2_ref, W=6, OH=4, OW=4)
    a2_ref[...] = dense(c2_ref[...], w2_ref, b2_ref).astype(bf16)      # [16*bc,128]

    # conv3: same.
    gather_taps(a2_ref, c3_ref, W=4, OH=2, OW=2)
    a3_ref[...] = dense(c3_ref[...], w3_ref, b3_ref).astype(bf16)      # [4*bc,128]

    # NCHW flatten folded into l1: lane-concat the 4 spatial positions.
    for p in range(4):
        c4_ref[:, p * C:(p + 1) * C] = a3_ref[p * bc:(p + 1) * bc, :]

    h4 = dense(c4_ref[...], wl1_ref, bl1_ref).astype(bf16)             # [bc,128]
    h5 = dense(h4, wl2_ref, bl2_ref).astype(bf16)                      # [bc,128]
    o_ref[...] = dense(h5, wh_ref, bh_ref, relu=False).astype(o_ref.dtype)


# --------------------------- parameter packing ----------------------------- #

def _pad2(a, rows, cols):
    return jnp.pad(a, ((0, rows - a.shape[0]), (0, cols - a.shape[1])))


def prepare_params(params):
    """One-time packing: pad channels to 128 lanes, stack conv taps along K so
    each conv is one [*, 9*128] @ [9*128, 128] matmul, fold the NCHW flatten
    into l1, cast all matmul operands to bf16 (biases stay f32)."""
    f32, bf16 = jnp.float32, jnp.bfloat16

    def stack_conv(w_oihw):                       # -> [9*128, 128], row = t*128 + cin
        cout, cin, kh, kw = w_oihw.shape
        taps = jnp.transpose(w_oihw, (2, 3, 1, 0)).reshape(kh * kw, cin, cout)
        taps = jnp.pad(taps, ((0, 0), (0, C - cin), (0, C - cout)))
        return taps.reshape(kh * kw * C, C).astype(bf16)

    def bias(b):
        return _pad2(b.reshape(1, -1), 1, C).astype(f32)

    # conv1 (Cin = 1): weight rows = tap t = i*3 + j, padded 9 -> 16.
    w1 = jnp.transpose(params["conv1_w"], (2, 3, 1, 0)).reshape(9, -1)   # [9, 50]
    w1s = _pad2(w1, K1, C).astype(bf16)

    # l1 with NCHW flatten folded: PyTorch in-feature f = c*4 + (h*2 + w) = c*4 + p.
    wl1 = params["l1_w"].reshape(-1, 18, 4)          # [out, c, p]
    wl1 = jnp.transpose(wl1, (2, 1, 0))              # [p, c, out]
    wl1 = jnp.pad(wl1, ((0, 0), (0, C - 18), (0, C - 50)))
    wl1s = wl1.reshape(4 * C, C).astype(bf16)        # row = p*128 + c

    return {
        "w1": w1s, "b1": bias(params["conv1_b"]),
        "w2": stack_conv(params["conv2_w"]), "b2": bias(params["conv2_b"]),
        "w3": stack_conv(params["conv3_w"]), "b3": bias(params["conv3_b"]),
        "wl1": wl1s, "bl1": bias(params["l1_b"]),
        "wl2": _pad2(params["l2_w"].T, C, C).astype(bf16), "bl2": bias(params["l2_b"]),
        "wh": _pad2(params["head_w"].T, C, C).astype(bf16), "bh": bias(params["head_b"]),
    }


# ------------------------------- forward ----------------------------------- #

@functools.partial(jax.jit, static_argnames=("outputs", "core_batch"))
def q_net_forward(prep, x_nchw, *, outputs, core_batch=64):
    """Equivalent of Q_Net.forward.  x_nchw: [B, 1, 8, 8] float32."""
    assert core_batch % 8 == 0, "core_batch must be a multiple of 8 sublanes"
    B = x_nchw.shape[0]
    # Small batches shrink to a single chunk instead of padding up to core_batch.
    bc = min(core_batch, _round_up(B, 8))
    Bp = _round_up(B, bc)
    nchunks = Bp // bc
    if Bp != B:
        x_nchw = jnp.pad(x_nchw, ((0, Bp - B), (0, 0), (0, 0), (0, 0)))

    # conv1 im2col (Cin = 1): rows ordered (chunk, oh, ow, b_in_chunk), 9 tap
    # lanes padded to 16 (NOT 128 -- keeps input DMA small).
    x = x_nchw[:, 0, :, :]                                             # [Bp, 8, 8]
    patches = [x[:, i:i + 6, j:j + 6] for i in range(3) for j in range(3)]
    cols = jnp.stack(patches, axis=-1)                                 # [Bp, 6, 6, 9]
    cols = jnp.pad(cols, ((0, 0), (0, 0), (0, 0), (0, K1 - 9)))        # [Bp, 6, 6, 16]
    cols = cols.reshape(nchunks, bc, 36, K1)
    cols1 = jnp.transpose(cols, (0, 2, 1, 3)).reshape(Bp * 36, K1).astype(jnp.bfloat16)

    full = lambda i: (0, 0)
    out = pl.pallas_call(
        _qnet_fused_kernel,
        out_shape=jax.ShapeDtypeStruct((Bp, C), jnp.bfloat16),
        grid=(nchunks,),
        in_specs=[
            pl.BlockSpec((36 * bc, K1), lambda i: (i, 0)),   # cols1 (batch chunk)
            pl.BlockSpec((K1, C), full),                     # w1
            pl.BlockSpec((1, C), full),                      # b1
            pl.BlockSpec((9 * C, C), full),                  # w2 (taps stacked on K)
            pl.BlockSpec((1, C), full),                      # b2
            pl.BlockSpec((9 * C, C), full),                  # w3
            pl.BlockSpec((1, C), full),                      # b3
            pl.BlockSpec((4 * C, C), full),                  # wl1 (flatten folded)
            pl.BlockSpec((1, C), full),                      # bl1
            pl.BlockSpec((C, C), full),                      # wl2
            pl.BlockSpec((1, C), full),                      # bl2
            pl.BlockSpec((C, C), full),                      # wh
            pl.BlockSpec((1, C), full),                      # bh
        ],
        out_specs=pl.BlockSpec((bc, C), lambda i: (i, 0)),
        scratch_shapes=[
            pltpu.VMEM((36 * bc, C), jnp.bfloat16),          # a1 (conv1 act)
            pltpu.VMEM((16 * bc, 9 * C), jnp.bfloat16),      # c2 (conv2 im2col)
            pltpu.VMEM((16 * bc, C), jnp.bfloat16),          # a2
            pltpu.VMEM((4 * bc, 9 * C), jnp.bfloat16),       # c3 (conv3 im2col)
            pltpu.VMEM((4 * bc, C), jnp.bfloat16),           # a3
            pltpu.VMEM((bc, 4 * C), jnp.bfloat16),           # c4 (l1 input)
        ],
        compiler_params=pltpu.CompilerParams(
            dimension_semantics=("parallel",)),   # v7x: 2 TCs split the batch chunks
    )(cols1, prep["w1"], prep["b1"], prep["w2"], prep["b2"],
      prep["w3"], prep["b3"], prep["wl1"], prep["bl1"],
      prep["wl2"], prep["bl2"], prep["wh"], prep["bh"])

    return out[:B, :outputs].astype(jnp.float32)


# -------------------------- reference & params ----------------------------- #

def init_params(key, outputs):
    """Deterministic synthetic parameters matching Q_Net's shapes (PyTorch layouts)."""
    ks = jax.random.split(key, 12)
    s = 0.1
    return {
        "conv1_w": jax.random.normal(ks[0], (50, 1, 3, 3), jnp.float32) * s,
        "conv1_b": jax.random.normal(ks[1], (50,), jnp.float32) * s,
        "conv2_w": jax.random.normal(ks[2], (47, 50, 3, 3), jnp.float32) * s,
        "conv2_b": jax.random.normal(ks[3], (47,), jnp.float32) * s,
        "conv3_w": jax.random.normal(ks[4], (18, 47, 3, 3), jnp.float32) * s,
        "conv3_b": jax.random.normal(ks[5], (18,), jnp.float32) * s,
        "l1_w": jax.random.normal(ks[6], (50, 72), jnp.float32) * s,   # [out, in]
        "l1_b": jax.random.normal(ks[7], (50,), jnp.float32) * s,
        "l2_w": jax.random.normal(ks[8], (20, 50), jnp.float32) * s,
        "l2_b": jax.random.normal(ks[9], (20,), jnp.float32) * s,
        "head_w": jax.random.normal(ks[10], (outputs, 20), jnp.float32) * s,
        "head_b": jax.random.normal(ks[11], (outputs,), jnp.float32) * s,
    }


def q_net_reference(params, x_nchw):
    """Pure-JAX f32 reference that mirrors the PyTorch forward exactly."""
    def conv_relu(x, w, b):                        # x: NHWC, w: OIHW
        k = w.shape[-1]
        Bn, H, W, _ = x.shape
        OH, OW = H - k + 1, W - k + 1
        patches = [x[:, i:i + OH, j:j + OW, :] for i in range(k) for j in range(k)]
        cols = jnp.stack(patches, axis=3).reshape(Bn * OH * OW, -1)
        wm = jnp.transpose(w, (2, 3, 1, 0)).reshape(-1, w.shape[0])
        y = jnp.maximum(cols @ wm + b, 0.0)
        return y.reshape(Bn, OH, OW, -1)

    x = jnp.transpose(x_nchw, (0, 2, 3, 1))
    x = conv_relu(x, params["conv1_w"], params["conv1_b"])
    x = conv_relu(x, params["conv2_w"], params["conv2_b"])
    x = conv_relu(x, params["conv3_w"], params["conv3_b"])
    Bn = x.shape[0]
    v = jnp.transpose(x, (0, 3, 1, 2)).reshape(Bn, -1)      # NCHW-order flatten
    h = jnp.maximum(v @ params["l1_w"].T + params["l1_b"], 0.0)
    h = jnp.maximum(h @ params["l2_w"].T + params["l2_b"], 0.0)
    return h @ params["head_w"].T + params["head_b"]


if __name__ == "__main__":
    key = jax.random.PRNGKey(0)
    k_param, k_x = jax.random.split(key)

    outputs = 4
    params = init_params(k_param, outputs)
    prep = prepare_params(params)

    # Multi-chunk path: batch 48 with core_batch 16 -> grid of 3 chunks.
    batch = 48
    x = jax.random.normal(k_x, (batch, 1, 8, 8), jnp.float32)   # NCHW like PyTorch
    y = q_net_forward(prep, x, outputs=outputs, core_batch=16)
    y = jax.block_until_ready(y)
    assert y.shape == (batch, outputs), y.shape
    assert bool(jnp.all(jnp.isfinite(y)))

    y_ref = q_net_reference(params, x)
    max_err = float(jnp.max(jnp.abs(y - y_ref)))
    assert max_err < 5e-2, f"mismatch vs f32 reference: max abs err {max_err}"

    # Ragged small batch: padded up to one 8-row chunk internally.
    x2 = x[:5]
    y2 = q_net_forward(prep, x2, outputs=outputs, core_batch=64)
    y2 = jax.block_until_ready(y2)
    assert y2.shape == (5, outputs), y2.shape
    max_err2 = float(jnp.max(jnp.abs(y2 - y_ref[:5])))
    assert max_err2 < 5e-2, f"ragged-batch mismatch: max abs err {max_err2}"

    print("KERNEL_OK")
</pallas_src>

<mosaic_0001>
module attributes {stable_mosaic.version = 11 : i64} {
  func.func @_qnet_fused_kernel(%arg0: i32, %arg1: memref<576x16xbf16, #tpu.memory_space<vmem>>, %arg2: memref<16x128xbf16, #tpu.memory_space<vmem>>, %arg3: memref<1x128xf32, #tpu.memory_space<vmem>>, %arg4: memref<1152x128xbf16, #tpu.memory_space<vmem>>, %arg5: memref<1x128xf32, #tpu.memory_space<vmem>>, %arg6: memref<1152x128xbf16, #tpu.memory_space<vmem>>, %arg7: memref<1x128xf32, #tpu.memory_space<vmem>>, %arg8: memref<512x128xbf16, #tpu.memory_space<vmem>>, %arg9: memref<1x128xf32, #tpu.memory_space<vmem>>, %arg10: memref<128x128xbf16, #tpu.memory_space<vmem>>, %arg11: memref<1x128xf32, #tpu.memory_space<vmem>>, %arg12: memref<128x128xbf16, #tpu.memory_space<vmem>>, %arg13: memref<1x128xf32, #tpu.memory_space<vmem>>, %arg14: memref<16x128xbf16, #tpu.memory_space<vmem>>, %arg15: memref<576x128xbf16, #tpu.memory_space<vmem>>, %arg16: memref<256x1152xbf16, #tpu.memory_space<vmem>>, %arg17: memref<256x128xbf16, #tpu.memory_space<vmem>>, %arg18: memref<64x1152xbf16, #tpu.memory_space<vmem>>, %arg19: memref<64x128xbf16, #tpu.memory_space<vmem>>, %arg20: memref<16x512xbf16, #tpu.memory_space<vmem>>) attributes {dimension_semantics = [#tpu.dimension_semantics<parallel>], iteration_bounds = array<i64: 3>, scalar_prefetch = 0 : i64, scratch_operands = 6 : i64, tpu.core_type = #tpu.core_type<tc>, window_params = [{transform_indices = @transform_0, window_bounds = array<i64: 576, 16>}, {pipeline_mode = #tpu.pipeline_mode<synchronous>, transform_indices = @transform_1, window_bounds = array<i64: 16, 128>}, {pipeline_mode = #tpu.pipeline_mode<synchronous>, transform_indices = @transform_2, window_bounds = array<i64: 1, 128>}, {pipeline_mode = #tpu.pipeline_mode<synchronous>, transform_indices = @transform_3, window_bounds = array<i64: 1152, 128>}, {pipeline_mode = #tpu.pipeline_mode<synchronous>, transform_indices = @transform_4, window_bounds = array<i64: 1, 128>}, {pipeline_mode = #tpu.pipeline_mode<synchronous>, transform_indices = @transform_5, window_bounds = array<i64: 1152, 128>}, {pipeline_mode = #tpu.pipeline_mode<synchronous>, transform_indices = @transform_6, window_bounds = array<i64: 1, 128>}, {pipeline_mode = #tpu.pipeline_mode<synchronous>, transform_indices = @transform_7, window_bounds = array<i64: 512, 128>}, {pipeline_mode = #tpu.pipeline_mode<synchronous>, transform_indices = @transform_8, window_bounds = array<i64: 1, 128>}, {pipeline_mode = #tpu.pipeline_mode<synchronous>, transform_indices = @transform_9, window_bounds = array<i64: 128, 128>}, {pipeline_mode = #tpu.pipeline_mode<synchronous>, transform_indices = @transform_10, window_bounds = array<i64: 1, 128>}, {pipeline_mode = #tpu.pipeline_mode<synchronous>, transform_indices = @transform_11, window_bounds = array<i64: 128, 128>}, {pipeline_mode = #tpu.pipeline_mode<synchronous>, transform_indices = @transform_12, window_bounds = array<i64: 1, 128>}, {transform_indices = @transform_13, window_bounds = array<i64: 16, 128>}]} {
    %c0 = arith.constant 0 : index
    %c0_0 = arith.constant 0 : index
    %0 = vector.load %arg1[%c0, %c0_0] : memref<576x16xbf16, #tpu.memory_space<vmem>>, vector<576x16xbf16>
    %c0_1 = arith.constant 0 : index
    %c0_2 = arith.constant 0 : index
    %1 = vector.load %arg2[%c0_1, %c0_2] : memref<16x128xbf16, #tpu.memory_space<vmem>>, vector<16x128xbf16>
    %cst = arith.constant dense<0.000000e+00> : vector<576x128xf32>
    %2 = tpu.matmul %0, %1, %cst {dimension_numbers = #tpu.dot_dimension_numbers<[1], [0], [0], [1], [0, 0, 1, 1], [], []>} : vector<576x16xbf16>, vector<16x128xbf16>, vector<576x128xf32> -> vector<576x128xf32>
    %c0_3 = arith.constant 0 : index
    %c0_4 = arith.constant 0 : index
    %3 = vector.load %arg3[%c0_3, %c0_4] : memref<1x128xf32, #tpu.memory_space<vmem>>, vector<1x128xf32>
    %4 = vector.broadcast %3 : vector<1x128xf32> to vector<576x128xf32>
    %5 = arith.addf %2, %4 : vector<576x128xf32>
    %cst_5 = arith.constant 0.000000e+00 : f32
    %6 = vector.broadcast %cst_5 : f32 to vector<576x128xf32>
    %7 = arith.maximumf %5, %6 : vector<576x128xf32>
    %8 = arith.truncf %7 : vector<576x128xf32> to vector<576x128xbf16>
    %c0_6 = arith.constant 0 : index
    %c0_7 = arith.constant 0 : index
    %9 = vector.load %arg15[%c0_6, %c0_7] : memref<576x128xbf16, #tpu.memory_space<vmem>>, vector<576x128xbf16>
    tpu.vector_store %arg15[%c0_6, %c0_7], %8 {strides = array<i32>} : memref<576x128xbf16, #tpu.memory_space<vmem>>, vector<576x128xbf16>,
    %c0_8 = arith.constant 0 : index
    %c0_9 = arith.constant 0 : index
    %10 = vector.load %arg15[%c0_8, %c0_9] : memref<576x128xbf16, #tpu.memory_space<vmem>>, vector<64x128xbf16>
    %c0_10 = arith.constant 0 : index
    %c0_11 = arith.constant 0 : index
    %11 = vector.load %arg16[%c0_10, %c0_11] : memref<256x1152xbf16, #tpu.memory_space<vmem>>, vector<64x128xbf16>
    tpu.vector_store %arg16[%c0_10, %c0_11], %10 {strides = array<i32>} : memref<256x1152xbf16, #tpu.memory_space<vmem>>, vector<64x128xbf16>,
    %c96 = arith.constant 96 : index
    %c0_12 = arith.constant 0 : index
    %12 = vector.load %arg15[%c96, %c0_12] : memref<576x128xbf16, #tpu.memory_space<vmem>>, vector<64x128xbf16>
    %c64 = arith.constant 64 : index
    %c0_13 = arith.constant 0 : index
    %13 = vector.load %arg16[%c64, %c0_13] : memref<256x1152xbf16, #tpu.memory_space<vmem>>, vector<64x128xbf16>
    tpu.vector_store %arg16[%c64, %c0_13], %12 {strides = array<i32>} : memref<256x1152xbf16, #tpu.memory_space<vmem>>, vector<64x128xbf16>,
    %c192 = arith.constant 192 : index
    %c0_14 = arith.constant 0 : index
    %14 = vector.load %arg15[%c192, %c0_14] : memref<576x128xbf16, #tpu.memory_space<vmem>>, vector<64x128xbf16>
    %c128 = arith.constant 128 : index
    %c0_15 = arith.constant 0 : index
    %15 = vector.load %arg16[%c128, %c0_15] : memref<256x1152xbf16, #tpu.memory_space<vmem>>, vector<64x128xbf16>
    tpu.vector_store %arg16[%c128, %c0_15], %14 {strides = array<i32>} : memref<256x1152xbf16, #tpu.memory_space<vmem>>, vector<64x128xbf16>,
    %c288 = arith.constant 288 : index
    %c0_16 = arith.constant 0 : index
    %16 = vector.load %arg15[%c288, %c0_16] : memref<576x128xbf16, #tpu.memory_space<vmem>>, vector<64x128xbf16>
    %c192_17 = arith.constant 192 : index
    %c0_18 = arith.constant 0 : index
    %17 = vector.load %arg16[%c192_17, %c0_18] : memref<256x1152xbf16, #tpu.memory_space<vmem>>, vector<64x128xbf16>
    tpu.vector_store %arg16[%c192_17, %c0_18], %16 {strides = array<i32>} : memref<256x1152xbf16, #tpu.memory_space<vmem>>, vector<64x128xbf16>,
    %c16 = arith.constant 16 : index
    %c0_19 = arith.constant 0 : index
    %18 = vector.load %arg15[%c16, %c0_19] : memref<576x128xbf16, #tpu.memory_space<vmem>>, vector<64x128xbf16>
    %c0_20 = arith.constant 0 : index
    %c128_21 = arith.constant 128 : index
    %19 = vector.load %arg16[%c0_20, %c128_21] : memref<256x1152xbf16, #tpu.memory_space<vmem>>, vector<64x128xbf16>
    tpu.vector_store %arg16[%c0_20, %c128_21], %18 {strides = array<i32>} : memref<256x1152xbf16, #tpu.memory_space<vmem>>, vector<64x128xbf16>,
    %c112 = arith.constant 112 : index
    %c0_22 = arith.constant 0 : index
    %20 = vector.load %arg15[%c112, %c0_22] : memref<576x128xbf16, #tpu.memory_space<vmem>>, vector<64x128xbf16>
    %c64_23 = arith.constant 64 : index
    %c128_24 = arith.constant 128 : index
    %21 = vector.load %arg16[%c64_23, %c128_24] : memref<256x1152xbf16, #tpu.memory_space<vmem>>, vector<64x128xbf16>
    tpu.vector_store %arg16[%c64_23, %c128_24], %20 {strides = array<i32>} : memref<256x1152xbf16, #tpu.memory_space<vmem>>, vector<64x128xbf16>,
    %c208 = arith.constant 208 : index
    %c0_25 = arith.constant 0 : index
    %22 = vector.load %arg15[%c208, %c0_25] : memref<576x128xbf16, #tpu.memory_space<vmem>>, vector<64x128xbf16>
    %c128_26 = arith.constant 128 : index
    %c128_27 = arith.constant 128 : index
    %23 = vector.load %arg16[%c128_26, %c128_27] : memref<256x1152xbf16, #tpu.memory_space<vmem>>, vector<64x128xbf16>
    tpu.vector_store %arg16[%c128_26, %c128_27], %22 {strides = array<i32>} : memref<256x1152xbf16, #tpu.memory_space<vmem>>, vector<64x128xbf16>,
    %c304 = arith.constant 304 : index
    %c0_28 = arith.constant 0 : index
    %24 = vector.load %arg15[%c304, %c0_28] : memref<576x128xbf16, #tpu.memory_space<vmem>>, vector<64x128xbf16>
    %c192_29 = arith.constant 192 : index
    %c128_30 = arith.constant 128 : index
    %25 = vector.load %arg16[%c192_29, %c128_30] : memref<256x1152xbf16, #tpu.memory_space<vmem>>, vector<64x128xbf16>
    tpu.vector_store %arg16[%c192_29, %c128_30], %24 {strides = array<i32>} : memref<256x1152xbf16, #tpu.memory_space<vmem>>, vector<64x128xbf16>,
    %c32 = arith.constant 32 : index
    %c0_31 = arith.constant 0 : index
    %26 = vector.load %arg15[%c32, %c0_31] : memref<576x128xbf16, #tpu.memory_space<vmem>>, vector<64x128xbf16>
    %c0_32 = arith.constant 0 : index
    %c256 = arith.constant 256 : index
    %27 = vector.load %arg16[%c0_32, %c256] : memref<256x1152xbf16, #tpu.memory_space<vmem>>, vector<64x128xbf16>
    tpu.vector_store %arg16[%c0_32, %c256], %26 {strides = array<i32>} : memref<256x1152xbf16, #tpu.memory_space<vmem>>, vector<64x128xbf16>,
    %c128_33 = arith.constant 128 : index
    %c0_34 = arith.constant 0 : index
    %28 = vector.load %arg15[%c128_33, %c0_34] : memref<576x128xbf16, #tpu.memory_space<vmem>>, vector<64x128xbf16>
    %c64_35 = arith.constant 64 : index
    %c256_36 = arith.constant 256 : index
    %29 = vector.load %arg16[%c64_35, %c256_36] : memref<256x1152xbf16, #tpu.memory_space<vmem>>, vector<64x128xbf16>
    tpu.vector_store %arg16[%c64_35, %c256_36], %28 {strides = array<i32>} : memref<256x1152xbf16, #tpu.memory_space<vmem>>, vector<64x128xbf16>,
    %c224 = arith.constant 224 : index
    %c0_37 = arith.constant 0 : index
    %30 = vector.load %arg15[%c224, %c0_37] : memref<576x128xbf16, #tpu.memory_space<vmem>>, vector<64x128xbf16>
    %c128_38 = arith.constant 128 : index
    %c256_39 = arith.constant 256 : index
    %31 = vector.load %arg16[%c128_38, %c256_39] : memref<256x1152xbf16, #tpu.memory_space<vmem>>, vector<64x128xbf16>
    tpu.vector_store %arg16[%c128_38, %c256_39], %30 {strides = array<i32>} : memref<256x1152xbf16, #tpu.memory_space<vmem>>, vector<64x128xbf16>,
    %c320 = arith.constant 320 : index
    %c0_40 = arith.constant 0 : index
    %32 = vector.load %arg15[%c320, %c0_40] : memref<576x128xbf16, #tpu.memory_space<vmem>>, vector<64x128xbf16>
    %c192_41 = arith.constant 192 : index
    %c256_42 = arith.constant 256 : index
    %33 = vector.load %arg16[%c192_41, %c256_42] : memref<256x1152xbf16, #tpu.memory_space<vmem>>, vector<64x128xbf16>
    tpu.vector_store %arg16[%c192_41, %c256_42], %32 {strides = array<i32>} : memref<256x1152xbf16, #tpu.memory_space<vmem>>, vector<64x128xbf16>,
    %c96_43 = arith.constant 96 : index
    %c0_44 = arith.constant 0 : index
    %34 = vector.load %arg15[%c96_43, %c0_44] : memref<576x128xbf16, #tpu.memory_space<vmem>>, vector<64x128xbf16>
    %c0_45 = arith.constant 0 : index
    %c384 = arith.constant 384 : index
    %35 = vector.load %arg16[%c0_45, %c384] : memref<256x1152xbf16, #tpu.memory_space<vmem>>, vector<64x128xbf16>
    tpu.vector_store %arg16[%c0_45, %c384], %34 {strides = array<i32>} : memref<256x1152xbf16, #tpu.memory_space<vmem>>, vector<64x128xbf16>,
    %c192_46 = arith.constant 192 : index
    %c0_47 = arith.constant 0 : index
    %36 = vector.load %arg15[%c192_46, %c0_47] : memref<576x128xbf16, #tpu.memory_space<vmem>>, vector<64x128xbf16>
    %c64_48 = arith.constant 64 : index
    %c384_49 = arith.constant 384 : index
    %37 = vector.load %arg16[%c64_48, %c384_49] : memref<256x1152xbf16, #tpu.memory_space<vmem>>, vector<64x128xbf16>
    tpu.vector_store %arg16[%c64_48, %c384_49], %36 {strides = array<i32>} : memref<256x1152xbf16, #tpu.memory_space<vmem>>, vector<64x128xbf16>,
    %c288_50 = arith.constant 288 : index
    %c0_51 = arith.constant 0 : index
    %38 = vector.load %arg15[%c288_50, %c0_51] : memref<576x128xbf16, #tpu.memory_space<vmem>>, vector<64x128xbf16>
    %c128_52 = arith.constant 128 : index
    %c384_53 = arith.constant 384 : index
    %39 = vector.load %arg16[%c128_52, %c384_53] : memref<256x1152xbf16, #tpu.memory_space<vmem>>, vector<64x128xbf16>
    tpu.vector_store %arg16[%c128_52, %c384_53], %38 {strides = array<i32>} : memref<256x1152xbf16, #tpu.memory_space<vmem>>, vector<64x128xbf16>,
    %c384_54 = arith.constant 384 : index
    %c0_55 = arith.constant 0 : index
    %40 = vector.load %arg15[%c384_54, %c0_55] : memref<576x128xbf16, #tpu.memory_space<vmem>>, vector<64x128xbf16>
    %c192_56 = arith.constant 192 : index
    %c384_57 = arith.constant 384 : index
    %41 = vector.load %arg16[%c192_56, %c384_57] : memref<256x1152xbf16, #tpu.memory_space<vmem>>, vector<64x128xbf16>
    tpu.vector_store %arg16[%c192_56, %c384_57], %40 {strides = array<i32>} : memref<256x1152xbf16, #tpu.memory_space<vmem>>, vector<64x128xbf16>,
    %c112_58 = arith.constant 112 : index
    %c0_59 = arith.constant 0 : index
    %42 = vector.load %arg15[%c112_58, %c0_59] : memref<576x128xbf16, #tpu.memory_space<vmem>>, vector<64x128xbf16>
    %c0_60 = arith.constant 0 : index
    %c512 = arith.constant 512 : index
    %43 = vector.load %arg16[%c0_60, %c512] : memref<256x1152xbf16, #tpu.memory_space<vmem>>, vector<64x128xbf16>
    tpu.vector_store %arg16[%c0_60, %c512], %42 {strides = array<i32>} : memref<256x1152xbf16, #tpu.memory_space<vmem>>, vector<64x128xbf16>,
    %c208_61 = arith.constant 208 : index
    %c0_62 = arith.constant 0 : index
    %44 = vector.load %arg15[%c208_61, %c0_62] : memref<576x128xbf16, #tpu.memory_space<vmem>>, vector<64x128xbf16>
    %c64_63 = arith.constant 64 : index
    %c512_64 = arith.constant 512 : index
    %45 = vector.load %arg16[%c64_63, %c512_64] : memref<256x1152xbf16, #tpu.memory_space<vmem>>, vector<64x128xbf16>
    tpu.vector_store %arg16[%c64_63, %c512_64], %44 {strides = array<i32>} : memref<256x1152xbf16, #tpu.memory_space<vmem>>, vector<64x128xbf16>,
    %c304_65 = arith.constant 304 : index
    %c0_66 = arith.constant 0 : index
    %46 = vector.load %arg15[%c304_65, %c0_66] : memref<576x128xbf16, #tpu.memory_space<vmem>>, vector<64x128xbf16>
    %c128_67 = arith.constant 128 : index
    %c512_68 = arith.constant 512 : index
    %47 = vector.load %arg16[%c128_67, %c512_68] : memref<256x1152xbf16, #tpu.memory_space<vmem>>, vector<64x128xbf16>
    tpu.vector_store %arg16[%c128_67, %c512_68], %46 {strides = array<i32>} : memref<256x1152xbf16, #tpu.memory_space<vmem>>, vector<64x128xbf16>,
    %c400 = arith.constant 400 : index
    %c0_69 = arith.constant 0 : index
    %48 = vector.load %arg15[%c400, %c0_69] : memref<576x128xbf16, #tpu.memory_space<vmem>>, vector<64x128xbf16>
    %c192_70 = arith.constant 192 : index
    %c512_71 = arith.constant 512 : index
    %49 = vector.load %arg16[%c192_70, %c512_71] : memref<256x1152xbf16, #tpu.memory_space<vmem>>, vector<64x128xbf16>
    tpu.vector_store %arg16[%c192_70, %c512_71], %48 {strides = array<i32>} : memref<256x1152xbf16, #tpu.memory_space<vmem>>, vector<64x128xbf16>,
    %c128_72 = arith.constant 128 : index
    %c0_73 = arith.constant 0 : index
    %50 = vector.load %arg15[%c128_72, %c0_73] : memref<576x128xbf16, #tpu.memory_space<vmem>>, vector<64x128xbf16>
    %c0_74 = arith.constant 0 : index
    %c640 = arith.constant 640 : index
    %51 = vector.load %arg16[%c0_74, %c640] : memref<256x1152xbf16, #tpu.memory_space<vmem>>, vector<64x128xbf16>
    tpu.vector_store %arg16[%c0_74, %c640], %50 {strides = array<i32>} : memref<256x1152xbf16, #tpu.memory_space<vmem>>, vector<64x128xbf16>,
    %c224_75 = arith.constant 224 : index
    %c0_76 = arith.constant 0 : index
    %52 = vector.load %arg15[%c224_75, %c0_76] : memref<576x128xbf16, #tpu.memory_space<vmem>>, vector<64x128xbf16>
    %c64_77 = arith.constant 64 : index
    %c640_78 = arith.constant 640 : index
    %53 = vector.load %arg16[%c64_77, %c640_78] : memref<256x1152xbf16, #tpu.memory_space<vmem>>, vector<64x128xbf16>
    tpu.vector_store %arg16[%c64_77, %c640_78], %52 {strides = array<i32>} : memref<256x1152xbf16, #tpu.memory_space<vmem>>, vector<64x128xbf16>,
    %c320_79 = arith.constant 320 : index
    %c0_80 = arith.constant 0 : index
    %54 = vector.load %arg15[%c320_79, %c0_80] : memref<576x128xbf16, #tpu.memory_space<vmem>>, vector<64x128xbf16>
    %c128_81 = arith.constant 128 : index
    %c640_82 = arith.constant 640 : index
    %55 = vector.load %arg16[%c128_81, %c640_82] : memref<256x1152xbf16, #tpu.memory_space<vmem>>, vector<64x128xbf16>
    tpu.vector_store %arg16[%c128_81, %c640_82], %54 {strides = array<i32>} : memref<256x1152xbf16, #tpu.memory_space<vmem>>, vector<64x128xbf16>,
    %c416 = arith.constant 416 : index
    %c0_83 = arith.constant 0 : index
    %56 = vector.load %arg15[%c416, %c0_83] : memref<576x128xbf16, #tpu.memory_space<vmem>>, vector<64x128xbf16>
    %c192_84 = arith.constant 192 : index
    %c640_85 = arith.constant 640 : index
    %57 = vector.load %arg16[%c192_84, %c640_85] : memref<256x1152xbf16, #tpu.memory_space<vmem>>, vector<64x128xbf16>
    tpu.vector_store %arg16[%c192_84, %c640_85], %56 {strides = array<i32>} : memref<256x1152xbf16, #tpu.memory_space<vmem>>, vector<64x128xbf16>,
    %c192_86 = arith.constant 192 : index
    %c0_87 = arith.constant 0 : index
    %58 = vector.load %arg15[%c192_86, %c0_87] : memref<576x128xbf16, #tpu.memory_space<vmem>>, vector<64x128xbf16>
    %c0_88 = arith.constant 0 : index
    %c768 = arith.constant 768 : index
    %59 = vector.load %arg16[%c0_88, %c768] : memref<256x1152xbf16, #tpu.memory_space<vmem>>, vector<64x128xbf16>
    tpu.vector_store %arg16[%c0_88, %c768], %58 {strides = array<i32>} : memref<256x1152xbf16, #tpu.memory_space<vmem>>, vector<64x128xbf16>,
    %c288_89 = arith.constant 288 : index
    %c0_90 = arith.constant 0 : index
    %60 = vector.load %arg15[%c288_89, %c0_90] : memref<576x128xbf16, #tpu.memory_space<vmem>>, vector<64x128xbf16>
    %c64_91 = arith.constant 64 : index
    %c768_92 = arith.constant 768 : index
    %61 = vector.load %arg16[%c64_91, %c768_92] : memref<256x1152xbf16, #tpu.memory_space<vmem>>, vector<64x128xbf16>
    tpu.vector_store %arg16[%c64_91, %c768_92], %60 {strides = array<i32>} : memref<256x1152xbf16, #tpu.memory_space<vmem>>, vector<64x128xbf16>,
    %c384_93 = arith.constant 384 : index
    %c0_94 = arith.constant 0 : index
    %62 = vector.load %arg15[%c384_93, %c0_94] : memref<576x128xbf16, #tpu.memory_space<vmem>>, vector<64x128xbf16>
    %c128_95 = arith.constant 128 : index
    %c768_96 = arith.constant 768 : index
    %63 = vector.load %arg16[%c128_95, %c768_96] : memref<256x1152xbf16, #tpu.memory_space<vmem>>, vector<64x128xbf16>
    tpu.vector_store %arg16[%c128_95, %c768_96], %62 {strides = array<i32>} : memref<256x1152xbf16, #tpu.memory_space<vmem>>, vector<64x128xbf16>,
    %c480 = arith.constant 480 : index
    %c0_97 = arith.constant 0 : index
    %64 = vector.load %arg15[%c480, %c0_97] : memref<576x128xbf16, #tpu.memory_space<vmem>>, vector<64x128xbf16>
    %c192_98 = arith.constant 192 : index
    %c768_99 = arith.constant 768 : index
    %65 = vector.load %arg16[%c192_98, %c768_99] : memref<256x1152xbf16, #tpu.memory_space<vmem>>, vector<64x128xbf16>
    tpu.vector_store %arg16[%c192_98, %c768_99], %64 {strides = array<i32>} : memref<256x1152xbf16, #tpu.memory_space<vmem>>, vector<64x128xbf16>,
    %c208_100 = arith.constant 208 : index
    %c0_101 = arith.constant 0 : index
    %66 = vector.load %arg15[%c208_100, %c0_101] : memref<576x128xbf16, #tpu.memory_space<vmem>>, vector<64x128xbf16>
    %c0_102 = arith.constant 0 : index
    %c896 = arith.constant 896 : index
    %67 = vector.load %arg16[%c0_102, %c896] : memref<256x1152xbf16, #tpu.memory_space<vmem>>, vector<64x128xbf16>
    tpu.vector_store %arg16[%c0_102, %c896], %66 {strides = array<i32>} : memref<256x1152xbf16, #tpu.memory_space<vmem>>, vector<64x128xbf16>,
    %c304_103 = arith.constant 304 : index
    %c0_104 = arith.constant 0 : index
    %68 = vector.load %arg15[%c304_103, %c0_104] : memref<576x128xbf16, #tpu.memory_space<vmem>>, vector<64x128xbf16>
    %c64_105 = arith.constant 64 : index
    %c896_106 = arith.constant 896 : index
    %69 = vector.load %arg16[%c64_105, %c896_106] : memref<256x1152xbf16, #tpu.memory_space<vmem>>, vector<64x128xbf16>
    tpu.vector_store %arg16[%c64_105, %c896_106], %68 {strides = array<i32>} : memref<256x1152xbf16, #tpu.memory_space<vmem>>, vector<64x128xbf16>,
    %c400_107 = arith.constant 400 : index
    %c0_108 = arith.constant 0 : index
    %70 = vector.load %arg15[%c400_107, %c0_108] : memref<576x128xbf16, #tpu.memory_space<vmem>>, vector<64x128xbf16>
    %c128_109 = arith.constant 128 : index
    %c896_110 = arith.constant 896 : index
    %71 = vector.load %arg16[%c128_109, %c896_110] : memref<256x1152xbf16, #tpu.memory_space<vmem>>, vector<64x128xbf16>
    tpu.vector_store %arg16[%c128_109, %c896_110], %70 {strides = array<i32>} : memref<256x1152xbf16, #tpu.memory_space<vmem>>, vector<64x128xbf16>,
    %c496 = arith.constant 496 : index
    %c0_111 = arith.constant 0 : index
    %72 = vector.load %arg15[%c496, %c0_111] : memref<576x128xbf16, #tpu.memory_space<vmem>>, vector<64x128xbf16>
    %c192_112 = arith.constant 192 : index
    %c896_113 = arith.constant 896 : index
    %73 = vector.load %arg16[%c192_112, %c896_113] : memref<256x1152xbf16, #tpu.memory_space<vmem>>, vector<64x128xbf16>
    tpu.vector_store %arg16[%c192_112, %c896_113], %72 {strides = array<i32>} : memref<256x1152xbf16, #tpu.memory_space<vmem>>, vector<64x128xbf16>,
    %c224_114 = arith.constant 224 : index
    %c0_115 = arith.constant 0 : index
    %74 = vector.load %arg15[%c224_114, %c0_115] : memref<576x128xbf16, #tpu.memory_space<vmem>>, vector<64x128xbf16>
    %c0_116 = arith.constant 0 : index
    %c1024 = arith.constant 1024 : index
    %75 = vector.load %arg16[%c0_116, %c1024] : memref<256x1152xbf16, #tpu.memory_space<vmem>>, vector<64x128xbf16>
    tpu.vector_store %arg16[%c0_116, %c1024], %74 {strides = array<i32>} : memref<256x1152xbf16, #tpu.memory_space<vmem>>, vector<64x128xbf16>,
    %c320_117 = arith.constant 320 : index
    %c0_118 = arith.constant 0 : index
    %76 = vector.load %arg15[%c320_117, %c0_118] : memref<576x128xbf16, #tpu.memory_space<vmem>>, vector<64x128xbf16>
    %c64_119 = arith.constant 64 : index
    %c1024_120 = arith.constant 1024 : index
    %77 = vector.load %arg16[%c64_119, %c1024_120] : memref<256x1152xbf16, #tpu.memory_space<vmem>>, vector<64x128xbf16>
    tpu.vector_store %arg16[%c64_119, %c1024_120], %76 {strides = array<i32>} : memref<256x1152xbf16, #tpu.memory_space<vmem>>, vector<64x128xbf16>,
    %c416_121 = arith.constant 416 : index
    %c0_122 = arith.constant 0 : index
    %78 = vector.load %arg15[%c416_121, %c0_122] : memref<576x128xbf16, #tpu.memory_space<vmem>>, vector<64x128xbf16>
    %c128_123 = arith.constant 128 : index
    %c1024_124 = arith.constant 1024 : index
    %79 = vector.load %arg16[%c128_123, %c1024_124] : memref<256x1152xbf16, #tpu.memory_space<vmem>>, vector<64x128xbf16>
    tpu.vector_store %arg16[%c128_123, %c1024_124], %78 {strides = array<i32>} : memref<256x1152xbf16, #tpu.memory_space<vmem>>, vector<64x128xbf16>,
    %c512_125 = arith.constant 512 : index
    %c0_126 = arith.constant 0 : index
    %80 = vector.load %arg15[%c512_125, %c0_126] : memref<576x128xbf16, #tpu.memory_space<vmem>>, vector<64x128xbf16>
    %c192_127 = arith.constant 192 : index
    %c1024_128 = arith.constant 1024 : index
    %81 = vector.load %arg16[%c192_127, %c1024_128] : memref<256x1152xbf16, #tpu.memory_space<vmem>>, vector<64x128xbf16>
    tpu.vector_store %arg16[%c192_127, %c1024_128], %80 {strides = array<i32>} : memref<256x1152xbf16, #tpu.memory_space<vmem>>, vector<64x128xbf16>,
    %c0_129 = arith.constant 0 : index
    %c0_130 = arith.constant 0 : index
    %82 = vector.load %arg16[%c0_129, %c0_130] : memref<256x1152xbf16, #tpu.memory_space<vmem>>, vector<256x1152xbf16>
    %c0_131 = arith.constant 0 : index
    %c0_132 = arith.constant 0 : index
    %83 = vector.load %arg4[%c0_131, %c0_132] : memref<1152x128xbf16, #tpu.memory_space<vmem>>, vector<1152x128xbf16>
    %cst_133 = arith.constant dense<0.000000e+00> : vector<256x128xf32>
    %84 = tpu.matmul %82, %83, %cst_133 {dimension_numbers = #tpu.dot_dimension_numbers<[1], [0], [0], [1], [0, 0, 1, 1], [], []>} : vector<256x1152xbf16>, vector<1152x128xbf16>, vector<256x128xf32> -> vector<256x128xf32>
    %c0_134 = arith.constant 0 : index
    %c0_135 = arith.constant 0 : index
    %85 = vector.load %arg5[%c0_134, %c0_135] : memref<1x128xf32, #tpu.memory_space<vmem>>, vector<1x128xf32>
    %86 = vector.broadcast %85 : vector<1x128xf32> to vector<256x128xf32>
    %87 = arith.addf %84, %86 : vector<256x128xf32>
    %cst_136 = arith.constant 0.000000e+00 : f32
    %88 = vector.broadcast %cst_136 : f32 to vector<256x128xf32>
    %89 = arith.maximumf %87, %88 : vector<256x128xf32>
    %90 = arith.truncf %89 : vector<256x128xf32> to vector<256x128xbf16>
    %c0_137 = arith.constant 0 : index
    %c0_138 = arith.constant 0 : index
    %91 = vector.load %arg17[%c0_137, %c0_138] : memref<256x128xbf16, #tpu.memory_space<vmem>>, vector<256x128xbf16>
    tpu.vector_store %arg17[%c0_137, %c0_138], %90 {strides = array<i32>} : memref<256x128xbf16, #tpu.memory_space<vmem>>, vector<256x128xbf16>,
    %c0_139 = arith.constant 0 : index
    %c0_140 = arith.constant 0 : index
    %92 = vector.load %arg17[%c0_139, %c0_140] : memref<256x128xbf16, #tpu.memory_space<vmem>>, vector<32x128xbf16>
    %c0_141 = arith.constant 0 : index
    %c0_142 = arith.constant 0 : index
    %93 = vector.load %arg18[%c0_141, %c0_142] : memref<64x1152xbf16, #tpu.memory_space<vmem>>, vector<32x128xbf16>
    tpu.vector_store %arg18[%c0_141, %c0_142], %92 {strides = array<i32>} : memref<64x1152xbf16, #tpu.memory_space<vmem>>, vector<32x128xbf16>,
    %c64_143 = arith.constant 64 : index
    %c0_144 = arith.constant 0 : index
    %94 = vector.load %arg17[%c64_143, %c0_144] : memref<256x128xbf16, #tpu.memory_space<vmem>>, vector<32x128xbf16>
    %c32_145 = arith.constant 32 : index
    %c0_146 = arith.constant 0 : index
    %95 = vector.load %arg18[%c32_145, %c0_146] : memref<64x1152xbf16, #tpu.memory_space<vmem>>, vector<32x128xbf16>
    tpu.vector_store %arg18[%c32_145, %c0_146], %94 {strides = array<i32>} : memref<64x1152xbf16, #tpu.memory_space<vmem>>, vector<32x128xbf16>,
    %c16_147 = arith.constant 16 : index
    %c0_148 = arith.constant 0 : index
    %96 = vector.load %arg17[%c16_147, %c0_148] : memref<256x128xbf16, #tpu.memory_space<vmem>>, vector<32x128xbf16>
    %c0_149 = arith.constant 0 : index
    %c128_150 = arith.constant 128 : index
    %97 = vector.load %arg18[%c0_149, %c128_150] : memref<64x1152xbf16, #tpu.memory_space<vmem>>, vector<32x128xbf16>
    tpu.vector_store %arg18[%c0_149, %c128_150], %96 {strides = array<i32>} : memref<64x1152xbf16, #tpu.memory_space<vmem>>, vector<32x128xbf16>,
    %c80 = arith.constant 80 : index
    %c0_151 = arith.constant 0 : index
    %98 = vector.load %arg17[%c80, %c0_151] : memref<256x128xbf16, #tpu.memory_space<vmem>>, vector<32x128xbf16>
    %c32_152 = arith.constant 32 : index
    %c128_153 = arith.constant 128 : index
    %99 = vector.load %arg18[%c32_152, %c128_153] : memref<64x1152xbf16, #tpu.memory_space<vmem>>, vector<32x128xbf16>
    tpu.vector_store %arg18[%c32_152, %c128_153], %98 {strides = array<i32>} : memref<64x1152xbf16, #tpu.memory_space<vmem>>, vector<32x128xbf16>,
    %c32_154 = arith.constant 32 : index
    %c0_155 = arith.constant 0 : index
    %100 = vector.load %arg17[%c32_154, %c0_155] : memref<256x128xbf16, #tpu.memory_space<vmem>>, vector<32x128xbf16>
    %c0_156 = arith.constant 0 : index
    %c256_157 = arith.constant 256 : index
    %101 = vector.load %arg18[%c0_156, %c256_157] : memref<64x1152xbf16, #tpu.memory_space<vmem>>, vector<32x128xbf16>
    tpu.vector_store %arg18[%c0_156, %c256_157], %100 {strides = array<i32>} : memref<64x1152xbf16, #tpu.memory_space<vmem>>, vector<32x128xbf16>,
    %c96_158 = arith.constant 96 : index
    %c0_159 = arith.constant 0 : index
    %102 = vector.load %arg17[%c96_158, %c0_159] : memref<256x128xbf16, #tpu.memory_space<vmem>>, vector<32x128xbf16>
    %c32_160 = arith.constant 32 : index
    %c256_161 = arith.constant 256 : index
    %103 = vector.load %arg18[%c32_160, %c256_161] : memref<64x1152xbf16, #tpu.memory_space<vmem>>, vector<32x128xbf16>
    tpu.vector_store %arg18[%c32_160, %c256_161], %102 {strides = array<i32>} : memref<64x1152xbf16, #tpu.memory_space<vmem>>, vector<32x128xbf16>,
    %c64_162 = arith.constant 64 : index
    %c0_163 = arith.constant 0 : index
    %104 = vector.load %arg17[%c64_162, %c0_163] : memref<256x128xbf16, #tpu.memory_space<vmem>>, vector<32x128xbf16>
    %c0_164 = arith.constant 0 : index
    %c384_165 = arith.constant 384 : index
    %105 = vector.load %arg18[%c0_164, %c384_165] : memref<64x1152xbf16, #tpu.memory_space<vmem>>, vector<32x128xbf16>
    tpu.vector_store %arg18[%c0_164, %c384_165], %104 {strides = array<i32>} : memref<64x1152xbf16, #tpu.memory_space<vmem>>, vector<32x128xbf16>,
    %c128_166 = arith.constant 128 : index
    %c0_167 = arith.constant 0 : index
    %106 = vector.load %arg17[%c128_166, %c0_167] : memref<256x128xbf16, #tpu.memory_space<vmem>>, vector<32x128xbf16>
    %c32_168 = arith.constant 32 : index
    %c384_169 = arith.constant 384 : index
    %107 = vector.load %arg18[%c32_168, %c384_169] : memref<64x1152xbf16, #tpu.memory_space<vmem>>, vector<32x128xbf16>
    tpu.vector_store %arg18[%c32_168, %c384_169], %106 {strides = array<i32>} : memref<64x1152xbf16, #tpu.memory_space<vmem>>, vector<32x128xbf16>,
    %c80_170 = arith.constant 80 : index
    %c0_171 = arith.constant 0 : index
    %108 = vector.load %arg17[%c80_170, %c0_171] : memref<256x128xbf16, #tpu.memory_space<vmem>>, vector<32x128xbf16>
    %c0_172 = arith.constant 0 : index
    %c512_173 = arith.constant 512 : index
    %109 = vector.load %arg18[%c0_172, %c512_173] : memref<64x1152xbf16, #tpu.memory_space<vmem>>, vector<32x128xbf16>
    tpu.vector_store %arg18[%c0_172, %c512_173], %108 {strides = array<i32>} : memref<64x1152xbf16, #tpu.memory_space<vmem>>, vector<32x128xbf16>,
    %c144 = arith.constant 144 : index
    %c0_174 = arith.constant 0 : index
    %110 = vector.load %arg17[%c144, %c0_174] : memref<256x128xbf16, #tpu.memory_space<vmem>>, vector<32x128xbf16>
    %c32_175 = arith.constant 32 : index
    %c512_176 = arith.constant 512 : index
    %111 = vector.load %arg18[%c32_175, %c512_176] : memref<64x1152xbf16, #tpu.memory_space<vmem>>, vector<32x128xbf16>
    tpu.vector_store %arg18[%c32_175, %c512_176], %110 {strides = array<i32>} : memref<64x1152xbf16, #tpu.memory_space<vmem>>, vector<32x128xbf16>,
    %c96_177 = arith.constant 96 : index
    %c0_178 = arith.constant 0 : index
    %112 = vector.load %arg17[%c96_177, %c0_178] : memref<256x128xbf16, #tpu.memory_space<vmem>>, vector<32x128xbf16>
    %c0_179 = arith.constant 0 : index
    %c640_180 = arith.constant 640 : index
    %113 = vector.load %arg18[%c0_179, %c640_180] : memref<64x1152xbf16, #tpu.memory_space<vmem>>, vector<32x128xbf16>
    tpu.vector_store %arg18[%c0_179, %c640_180], %112 {strides = array<i32>} : memref<64x1152xbf16, #tpu.memory_space<vmem>>, vector<32x128xbf16>,
    %c160 = arith.constant 160 : index
    %c0_181 = arith.constant 0 : index
    %114 = vector.load %arg17[%c160, %c0_181] : memref<256x128xbf16, #tpu.memory_space<vmem>>, vector<32x128xbf16>
    %c32_182 = arith.constant 32 : index
    %c640_183 = arith.constant 640 : index
    %115 = vector.load %arg18[%c32_182, %c640_183] : memref<64x1152xbf16, #tpu.memory_space<vmem>>, vector<32x128xbf16>
    tpu.vector_store %arg18[%c32_182, %c640_183], %114 {strides = array<i32>} : memref<64x1152xbf16, #tpu.memory_space<vmem>>, vector<32x128xbf16>,
    %c128_184 = arith.constant 128 : index
    %c0_185 = arith.constant 0 : index
    %116 = vector.load %arg17[%c128_184, %c0_185] : memref<256x128xbf16, #tpu.memory_space<vmem>>, vector<32x128xbf16>
    %c0_186 = arith.constant 0 : index
    %c768_187 = arith.constant 768 : index
    %117 = vector.load %arg18[%c0_186, %c768_187] : memref<64x1152xbf16, #tpu.memory_space<vmem>>, vector<32x128xbf16>
    tpu.vector_store %arg18[%c0_186, %c768_187], %116 {strides = array<i32>} : memref<64x1152xbf16, #tpu.memory_space<vmem>>, vector<32x128xbf16>,
    %c192_188 = arith.constant 192 : index
    %c0_189 = arith.constant 0 : index
    %118 = vector.load %arg17[%c192_188, %c0_189] : memref<256x128xbf16, #tpu.memory_space<vmem>>, vector<32x128xbf16>
    %c32_190 = arith.constant 32 : index
    %c768_191 = arith.constant 768 : index
    %119 = vector.load %arg18[%c32_190, %c768_191] : memref<64x1152xbf16, #tpu.memory_space<vmem>>, vector<32x128xbf16>
    tpu.vector_store %arg18[%c32_190, %c768_191], %118 {strides = array<i32>} : memref<64x1152xbf16, #tpu.memory_space<vmem>>, vector<32x128xbf16>,
    %c144_192 = arith.constant 144 : index
    %c0_193 = arith.constant 0 : index
    %120 = vector.load %arg17[%c144_192, %c0_193] : memref<256x128xbf16, #tpu.memory_space<vmem>>, vector<32x128xbf16>
    %c0_194 = arith.constant 0 : index
    %c896_195 = arith.constant 896 : index
    %121 = vector.load %arg18[%c0_194, %c896_195] : memref<64x1152xbf16, #tpu.memory_space<vmem>>, vector<32x128xbf16>
    tpu.vector_store %arg18[%c0_194, %c896_195], %120 {strides = array<i32>} : memref<64x1152xbf16, #tpu.memory_space<vmem>>, vector<32x128xbf16>,
    %c208_196 = arith.constant 208 : index
    %c0_197 = arith.constant 0 : index
    %122 = vector.load %arg17[%c208_196, %c0_197] : memref<256x128xbf16, #tpu.memory_space<vmem>>, vector<32x128xbf16>
    %c32_198 = arith.constant 32 : index
    %c896_199 = arith.constant 896 : index
    %123 = vector.load %arg18[%c32_198, %c896_199] : memref<64x1152xbf16, #tpu.memory_space<vmem>>, vector<32x128xbf16>
    tpu.vector_store %arg18[%c32_198, %c896_199], %122 {strides = array<i32>} : memref<64x1152xbf16, #tpu.memory_space<vmem>>, vector<32x128xbf16>,
    %c160_200 = arith.constant 160 : index
    %c0_201 = arith.constant 0 : index
    %124 = vector.load %arg17[%c160_200, %c0_201] : memref<256x128xbf16, #tpu.memory_space<vmem>>, vector<32x128xbf16>
    %c0_202 = arith.constant 0 : index
    %c1024_203 = arith.constant 1024 : index
    %125 = vector.load %arg18[%c0_202, %c1024_203] : memref<64x1152xbf16, #tpu.memory_space<vmem>>, vector<32x128xbf16>
    tpu.vector_store %arg18[%c0_202, %c1024_203], %124 {strides = array<i32>} : memref<64x1152xbf16, #tpu.memory_space<vmem>>, vector<32x128xbf16>,
    %c224_204 = arith.constant 224 : index
    %c0_205 = arith.constant 0 : index
    %126 = vector.load %arg17[%c224_204, %c0_205] : memref<256x128xbf16, #tpu.memory_space<vmem>>, vector<32x128xbf16>
    %c32_206 = arith.constant 32 : index
    %c1024_207 = arith.constant 1024 : index
    %127 = vector.load %arg18[%c32_206, %c1024_207] : memref<64x1152xbf16, #tpu.memory_space<vmem>>, vector<32x128xbf16>
    tpu.vector_store %arg18[%c32_206, %c1024_207], %126 {strides = array<i32>} : memref<64x1152xbf16, #tpu.memory_space<vmem>>, vector<32x128xbf16>,
    %c0_208 = arith.constant 0 : index
    %c0_209 = arith.constant 0 : index
    %128 = vector.load %arg18[%c0_208, %c0_209] : memref<64x1152xbf16, #tpu.memory_space<vmem>>, vector<64x1152xbf16>
    %c0_210 = arith.constant 0 : index
    %c0_211 = arith.constant 0 : index
    %129 = vector.load %arg6[%c0_210, %c0_211] : memref<1152x128xbf16, #tpu.memory_space<vmem>>, vector<1152x128xbf16>
    %cst_212 = arith.constant dense<0.000000e+00> : vector<64x128xf32>
    %130 = tpu.matmul %128, %129, %cst_212 {dimension_numbers = #tpu.dot_dimension_numbers<[1], [0], [0], [1], [0, 0, 1, 1], [], []>} : vector<64x1152xbf16>, vector<1152x128xbf16>, vector<64x128xf32> -> vector<64x128xf32>
    %c0_213 = arith.constant 0 : index
    %c0_214 = arith.constant 0 : index
    %131 = vector.load %arg7[%c0_213, %c0_214] : memref<1x128xf32, #tpu.memory_space<vmem>>, vector<1x128xf32>
    %132 = vector.broadcast %131 : vector<1x128xf32> to vector<64x128xf32>
    %133 = arith.addf %130, %132 : vector<64x128xf32>
    %cst_215 = arith.constant 0.000000e+00 : f32
    %134 = vector.broadcast %cst_215 : f32 to vector<64x128xf32>
    %135 = arith.maximumf %133, %134 : vector<64x128xf32>
    %136 = arith.truncf %135 : vector<64x128xf32> to vector<64x128xbf16>
    %c0_216 = arith.constant 0 : index
    %c0_217 = arith.constant 0 : index
    %137 = vector.load %arg19[%c0_216, %c0_217] : memref<64x128xbf16, #tpu.memory_space<vmem>>, vector<64x128xbf16>
    tpu.vector_store %arg19[%c0_216, %c0_217], %136 {strides = array<i32>} : memref<64x128xbf16, #tpu.memory_space<vmem>>, vector<64x128xbf16>,
    %c0_218 = arith.constant 0 : index
    %c0_219 = arith.constant 0 : index
    %138 = vector.load %arg19[%c0_218, %c0_219] : memref<64x128xbf16, #tpu.memory_space<vmem>>, vector<16x128xbf16>
    %c0_220 = arith.constant 0 : index
    %c0_221 = arith.constant 0 : index
    %139 = vector.load %arg20[%c0_220, %c0_221] : memref<16x512xbf16, #tpu.memory_space<vmem>>, vector<16x128xbf16>
    tpu.vector_store %arg20[%c0_220, %c0_221], %138 {strides = array<i32>} : memref<16x512xbf16, #tpu.memory_space<vmem>>, vector<16x128xbf16>,
    %c16_222 = arith.constant 16 : index
    %c0_223 = arith.constant 0 : index
    %140 = vector.load %arg19[%c16_222, %c0_223] : memref<64x128xbf16, #tpu.memory_space<vmem>>, vector<16x128xbf16>
    %c0_224 = arith.constant 0 : index
    %c128_225 = arith.constant 128 : index
    %141 = vector.load %arg20[%c0_224, %c128_225] : memref<16x512xbf16, #tpu.memory_space<vmem>>, vector<16x128xbf16>
    tpu.vector_store %arg20[%c0_224, %c128_225], %140 {strides = array<i32>} : memref<16x512xbf16, #tpu.memory_space<vmem>>, vector<16x128xbf16>,
    %c32_226 = arith.constant 32 : index
    %c0_227 = arith.constant 0 : index
    %142 = vector.load %arg19[%c32_226, %c0_227] : memref<64x128xbf16, #tpu.memory_space<vmem>>, vector<16x128xbf16>
    %c0_228 = arith.constant 0 : index
    %c256_229 = arith.constant 256 : index
    %143 = vector.load %arg20[%c0_228, %c256_229] : memref<16x512xbf16, #tpu.memory_space<vmem>>, vector<16x128xbf16>
    tpu.vector_store %arg20[%c0_228, %c256_229], %142 {strides = array<i32>} : memref<16x512xbf16, #tpu.memory_space<vmem>>, vector<16x128xbf16>,
    %c48 = arith.constant 48 : index
    %c0_230 = arith.constant 0 : index
    %144 = vector.load %arg19[%c48, %c0_230] : memref<64x128xbf16, #tpu.memory_space<vmem>>, vector<16x128xbf16>
    %c0_231 = arith.constant 0 : index
    %c384_232 = arith.constant 384 : index
    %145 = vector.load %arg20[%c0_231, %c384_232] : memref<16x512xbf16, #tpu.memory_space<vmem>>, vector<16x128xbf16>
    tpu.vector_store %arg20[%c0_231, %c384_232], %144 {strides = array<i32>} : memref<16x512xbf16, #tpu.memory_space<vmem>>, vector<16x128xbf16>,
    %c0_233 = arith.constant 0 : index
    %c0_234 = arith.constant 0 : index
    %146 = vector.load %arg20[%c0_233, %c0_234] : memref<16x512xbf16, #tpu.memory_space<vmem>>, vector<16x512xbf16>
    %c0_235 = arith.constant 0 : index
    %c0_236 = arith.constant 0 : index
    %147 = vector.load %arg8[%c0_235, %c0_236] : memref<512x128xbf16, #tpu.memory_space<vmem>>, vector<512x128xbf16>
    %cst_237 = arith.constant dense<0.000000e+00> : vector<16x128xf32>
    %148 = tpu.matmul %146, %147, %cst_237 {dimension_numbers = #tpu.dot_dimension_numbers<[1], [0], [0], [1], [0, 0, 1, 1], [], []>} : vector<16x512xbf16>, vector<512x128xbf16>, vector<16x128xf32> -> vector<16x128xf32>
    %c0_238 = arith.constant 0 : index
    %c0_239 = arith.constant 0 : index
    %149 = vector.load %arg9[%c0_238, %c0_239] : memref<1x128xf32, #tpu.memory_space<vmem>>, vector<1x128xf32>
    %150 = vector.broadcast %149 : vector<1x128xf32> to vector<16x128xf32>
    %151 = arith.addf %148, %150 : vector<16x128xf32>
    %cst_240 = arith.constant 0.000000e+00 : f32
    %152 = vector.broadcast %cst_240 : f32 to vector<16x128xf32>
    %153 = arith.maximumf %151, %152 : vector<16x128xf32>
    %154 = arith.truncf %153 : vector<16x128xf32> to vector<16x128xbf16>
    %c0_241 = arith.constant 0 : index
    %c0_242 = arith.constant 0 : index
    %155 = vector.load %arg10[%c0_241, %c0_242] : memref<128x128xbf16, #tpu.memory_space<vmem>>, vector<128x128xbf16>
    %cst_243 = arith.constant dense<0.000000e+00> : vector<16x128xf32>
    %156 = tpu.matmul %154, %155, %cst_243 {dimension_numbers = #tpu.dot_dimension_numbers<[1], [0], [0], [1], [0, 0, 1, 1], [], []>} : vector<16x128xbf16>, vector<128x128xbf16>, vector<16x128xf32> -> vector<16x128xf32>
    %c0_244 = arith.constant 0 : index
    %c0_245 = arith.constant 0 : index
    %157 = vector.load %arg11[%c0_244, %c0_245] : memref<1x128xf32, #tpu.memory_space<vmem>>, vector<1x128xf32>
    %158 = vector.broadcast %157 : vector<1x128xf32> to vector<16x128xf32>
    %159 = arith.addf %156, %158 : vector<16x128xf32>
    %cst_246 = arith.constant 0.000000e+00 : f32
    %160 = vector.broadcast %cst_246 : f32 to vector<16x128xf32>
    %161 = arith.maximumf %159, %160 : vector<16x128xf32>
    %162 = arith.truncf %161 : vector<16x128xf32> to vector<16x128xbf16>
    %c0_247 = arith.constant 0 : index
    %c0_248 = arith.constant 0 : index
    %163 = vector.load %arg12[%c0_247, %c0_248] : memref<128x128xbf16, #tpu.memory_space<vmem>>, vector<128x128xbf16>
    %cst_249 = arith.constant dense<0.000000e+00> : vector<16x128xf32>
    %164 = tpu.matmul %162, %163, %cst_249 {dimension_numbers = #tpu.dot_dimension_numbers<[1], [0], [0], [1], [0, 0, 1, 1], [], []>} : vector<16x128xbf16>, vector<128x128xbf16>, vector<16x128xf32> -> vector<16x128xf32>
    %c0_250 = arith.constant 0 : index
    %c0_251 = arith.constant 0 : index
    %165 = vector.load %arg13[%c0_250, %c0_251] : memref<1x128xf32, #tpu.memory_space<vmem>>, vector<1x128xf32>
    %166 = vector.broadcast %165 : vector<1x128xf32> to vector<16x128xf32>
    %167 = arith.addf %164, %166 : vector<16x128xf32>
    %168 = arith.truncf %167 : vector<16x128xf32> to vector<16x128xbf16>
    %c0_252 = arith.constant 0 : index
    %c0_253 = arith.constant 0 : index
    %169 = vector.load %arg14[%c0_252, %c0_253] : memref<16x128xbf16, #tpu.memory_space<vmem>>, vector<16x128xbf16>
    tpu.vector_store %arg14[%c0_252, %c0_253], %168 {strides = array<i32>} : memref<16x128xbf16, #tpu.memory_space<vmem>>, vector<16x128xbf16>,
    return
  }
  func.func @transform_0(%arg0: i32) -> (i32, i32) {
    %c0_i32 = arith.constant 0 : i32
    %c0_i32_0 = arith.constant 0 : i32
    return %arg0, %c0_i32 : i32, i32
  }
  func.func @transform_1(%arg0: i32) -> (i32, i32) {
    %c0_i32 = arith.constant 0 : i32
    %c0_i32_0 = arith.constant 0 : i32
    %c0_i32_1 = arith.constant 0 : i32
    return %c0_i32, %c0_i32_0 : i32, i32
  }
  func.func @transform_2(%arg0: i32) -> (i32, i32) {
    %c0_i32 = arith.constant 0 : i32
    %c0_i32_0 = arith.constant 0 : i32
    %c0_i32_1 = arith.constant 0 : i32
    return %c0_i32, %c0_i32_0 : i32, i32
  }
  func.func @transform_3(%arg0: i32) -> (i32, i32) {
    %c0_i32 = arith.constant 0 : i32
    %c0_i32_0 = arith.constant 0 : i32
    %c0_i32_1 = arith.constant 0 : i32
    return %c0_i32, %c0_i32_0 : i32, i32
  }
  func.func @transform_4(%arg0: i32) -> (i32, i32) {
    %c0_i32 = arith.constant 0 : i32
    %c0_i32_0 = arith.constant 0 : i32
    %c0_i32_1 = arith.constant 0 : i32
    return %c0_i32, %c0_i32_0 : i32, i32
  }
  func.func @transform_5(%arg0: i32) -> (i32, i32) {
    %c0_i32 = arith.constant 0 : i32
    %c0_i32_0 = arith.constant 0 : i32
    %c0_i32_1 = arith.constant 0 : i32
    return %c0_i32, %c0_i32_0 : i32, i32
  }
  func.func @transform_6(%arg0: i32) -> (i32, i32) {
    %c0_i32 = arith.constant 0 : i32
    %c0_i32_0 = arith.constant 0 : i32
    %c0_i32_1 = arith.constant 0 : i32
    return %c0_i32, %c0_i32_0 : i32, i32
  }
  func.func @transform_7(%arg0: i32) -> (i32, i32) {
    %c0_i32 = arith.constant 0 : i32
    %c0_i32_0 = arith.constant 0 : i32
    %c0_i32_1 = arith.constant 0 : i32
    return %c0_i32, %c0_i32_0 : i32, i32
  }
  func.func @transform_8(%arg0: i32) -> (i32, i32) {
    %c0_i32 = arith.constant 0 : i32
    %c0_i32_0 = arith.constant 0 : i32
    %c0_i32_1 = arith.constant 0 : i32
    return %c0_i32, %c0_i32_0 : i32, i32
  }
  func.func @transform_9(%arg0: i32) -> (i32, i32) {
    %c0_i32 = arith.constant 0 : i32
    %c0_i32_0 = arith.constant 0 : i32
    %c0_i32_1 = arith.constant 0 : i32
    return %c0_i32, %c0_i32_0 : i32, i32
  }
  func.func @transform_10(%arg0: i32) -> (i32, i32) {
    %c0_i32 = arith.constant 0 : i32
    %c0_i32_0 = arith.constant 0 : i32
    %c0_i32_1 = arith.constant 0 : i32
    return %c0_i32, %c0_i32_0 : i32, i32
  }
  func.func @transform_11(%arg0: i32) -> (i32, i32) {
    %c0_i32 = arith.constant 0 : i32
    %c0_i32_0 = arith.constant 0 : i32
    %c0_i32_1 = arith.constant 0 : i32
    return %c0_i32, %c0_i32_0 : i32, i32
  }
  func.func @transform_12(%arg0: i32) -> (i32, i32) {
    %c0_i32 = arith.constant 0 : i32
    %c0_i32_0 = arith.constant 0 : i32
    %c0_i32_1 = arith.constant 0 : i32
    return %c0_i32, %c0_i32_0 : i32, i32
  }
  func.func @transform_13(%arg0: i32) -> (i32, i32) {
    %c0_i32 = arith.constant 0 : i32
    %c0_i32_0 = arith.constant 0 : i32
    return %arg0, %c0_i32 : i32, i32
  }
}

</mosaic_0001>

<bundles_post_ra>
// kernel: q_net_forward.1
= control target key start
LH: loop header
LB: loop body
LE: loop exit
PB: predicated region body
PF: predicated region fallthrough
CT: control target
= control target key end

     0   :  { %s9178_s25 = smov 0   ;;  %s10632_s0 = inlined_call_operand.vmem [shape: bf16[1728,16], index: 0, kind: input, shape index: {}]   ;;  %s10633_s1 = inlined_call_operand.vmem [shape: bf16[16,128], index: 1, kind: input, shape index: {}]   ;;  %s10634_s2 = inlined_call_operand.vmem [shape: f32[1,128], index: 2, kind: input, shape index: {}]   ;;  %s10635_s3 = inlined_call_operand.vmem [shape: bf16[1152,128], index: 3, kind: input, shape index: {}]   ;;  %s10636_s4 = inlined_call_operand.vmem [shape: f32[1,128], index: 4, kind: input, shape index: {}]   ;;  %s10637_s5 = inlined_call_operand.vmem [shape: bf16[1152,128], index: 5, kind: input, shape index: {}]   ;;  %s10638_s6 = inlined_call_operand.vmem [shape: f32[1,128], index: 6, kind: input, shape index: {}]   ;;  %s10639_s7 = inlined_call_operand.vmem [shape: bf16[512,128], index: 7, kind: input, shape index: {}]   ;;  %s10640_s8 = inlined_call_operand.vmem [shape: f32[1,128], index: 8, kind: input, shape index: {}]   ;;  %s10641_s9 = inlined_call_operand.vmem [shape: bf16[128,128], index: 9, kind: input, shape index: {}]   ;;  %s10642_s10 = inlined_call_operand.vmem [shape: f32[1,128], index: 10, kind: input, shape index: {}]   ;;  %s10643_s11 = inlined_call_operand.vmem [shape: bf16[128,128], index: 11, kind: input, shape index: {}]   ;;  %s10644_s12 = inlined_call_operand.vmem [shape: f32[1,128], index: 12, kind: input, shape index: {}]   ;;  %s10645_s13 = inlined_call_operand.vmem [shape: bf16[48,128], index: 13, kind: output, shape index: {}]  }
   0x1 LB: > { %s6631_s26 = sadd.s32 4294967295, %s9104_s25   ;;  %p6635_p0 = scmp.ge.s32.totalorder %s9104_s25, 1  ;;  %s9104_s25 = sphi %s9178_s25, %s23_s25  }
   0x2   : > { %p388_p1 = scmp.lt.s32.totalorder %s9104_s25, 4 }
   0x4   : > { %p389_p2 = pnand %p6635_p0, %p388_p1 }
   0x6   : > { %392 = sbr.rel (%p389_p2) target bundleno = 1753 (0x6d9), region = 72 }
   0xb   : > { %v8601_v0 = vld [vmem:[%s10633_s1] sm:$0xff]   ;;  %s432_s29 = smul.u32 72, %s6631_s26  ;;  %v8630_v1 = vld [vmem:[%s10635_s3 + $0xf8] sm:$0xff]   ;;  %vm712_vm0 = vcmask 130048   ;;  %v8635_v24 = vld [vmem:[%s10635_s3 + $0x70] sm:$0xff]   ;;  %vm9107_vm1 = vmmov 0  }
   0xc   : > { %8405 = vmatprep.subr.bf16.mxu0 %v8601_v0  ;;  %v8632_v2 = vld [vmem:[%s10635_s3 + $0x78] sm:$0xff]   ;;  %v8637_v26 = vld [vmem:[%s10635_s3 + $0x30] sm:$0xff]   ;;  %v8638_v30 = vld [vmem:[%s10635_s3 + $0x68] sm:$0xff]  }
   0xd   : > { %p433_p3 = scmp.lt.s32.totalorder %s432_s29, 215  ;;  %8406 = vmatpush3.bf16.msra.mxu0 %v8601_v0  ;;  %7699 = vmatprep.subr.bf16.mxu1 %v8632_v2  ;;  %v8631_v3 = vld [vmem:[%s10635_s3 + $0xb8] sm:$0xff]   ;;  %v8634_v28 = vld [vmem:[%s10635_s3 + $0xf0] sm:$0xff]   ;;  %v8639_v31 = vld [vmem:[%s10635_s3 + $0x28] sm:$0xff]  }
   0xe   : > { %7811 = vmatprep.subr.bf16.mxu0 %v8630_v1  ;;  %v8633_v23 = vld [vmem:[%s10635_s3 + $0x38] sm:$0xff]   ;;  %v8636_v29 = vld [vmem:[%s10635_s3 + $0xb0] sm:$0xff]   ;;  %v8642_v32 = vld [vmem:[%s10635_s3 + $0x60] sm:$0xff]  }
   0xf   : > { %s10713_s29 = smov (!%p433_p3, %s432_s29), 215  ;;  %7700 = vmatpush3.bf16.msra.mxu1 %v8633_v23  ;;  %v8643_v35 = vld [vmem:[%s10635_s3 + $0x20] sm:$0xff]   ;;  %v8644_v36 = vld [vmem:[%s10635_s3 + $0x58] sm:$0xff]   ;;  %v8646_v39 = vld [vmem:[%s10635_s3 + $0x50] sm:$0xff]  }
  0x10   : > { %s6636_s17 = sshll.u32 %s10713_s29, 2  ;;  %7701 = vmatprep.subr.bf16.mxu1 %v8635_v24  ;;  %v8645_v37 = vld [vmem:[%s10635_s3 + $0x18] sm:$0xff]   ;;  %v8647_v41 = vld [vmem:[%s10635_s3 + $0x10] sm:$0xff]   ;;  %v8650_v42 = vld [vmem:[%s10635_s3 + $0x48] sm:$0xff]  }
  0x11   : > { %s9203_s22 = scalar_lea.vmem %s10632_s0, %s6636_s17  ;;  %v8651_v43 = vld [vmem:[%s10635_s3 + $0x8] sm:$0xff]   ;;  %v8652_v45 = vld [vmem:[%s10635_s3 + $0x40] sm:$0xff]   ;;  %v8668_v55 = vld [vmem:[%s10635_s3 + $0xd8] sm:$0xff]  }
  0x12   : > { %v8602_v4 = vld [vmem:[%s9203_s22] sm:$0xff]   ;;  %v8603_v5 = vld [vmem:[%s9203_s22 + $0x8] sm:$0xff]   ;;  %v8604_v6 = vld [vmem:[%s9203_s22 + $0x10] sm:$0xff]  }
  0x13   : > { %8407 = vmatprep.mubr.msk.bf16.mxu0 %vm712_vm0, %v8602_v4  ;;  %v8605_v7 = vld [vmem:[%s9203_s22 + $0x18] sm:$0xff]   ;;  %v8606_v8 = vld [vmem:[%s9203_s22 + $0x20] sm:$0xff]   ;;  %v8607_v9 = vld [vmem:[%s9203_s22 + $0x28] sm:$0xff]   ;;  %7702 = vmatpush3.bf16.msra.mxu1 %v8637_v26 }
  0x14   : > { %8408 = vmatmul.mubr.msk.bf16.vlgmr.msra.gmra.mxu0 %vm712_vm0, %v8603_v5  ;;  %v8608_v10 = vld [vmem:[%s9203_s22 + $0x30] sm:$0xff]   ;;  %v8609_v11 = vld [vmem:[%s9203_s22 + $0x38] sm:$0xff]   ;;  %v8610_v12 = vld [vmem:[%s9203_s22 + $0x40] sm:$0xff]   ;;  %7703 = vmatprep.subr.bf16.mxu1 %v8638_v30 }
  0x15   : > { %8411 = vmatprep.mubr.msk.bf16.mxu0 %vm712_vm0, %v8604_v6  ;;  %7812 = vmatpush3.bf16.msra.mxu0 %v8631_v3  ;;  %v8611_v13 = vld [vmem:[%s9203_s22 + $0x48] sm:$0xff]   ;;  %v8612_v14 = vld [vmem:[%s9203_s22 + $0x50] sm:$0xff]   ;;  %v8613_v15 = vld [vmem:[%s9203_s22 + $0x58] sm:$0xff]  }
  0x16   : > { %v8614_v16 = vld [vmem:[%s9203_s22 + $0x60] sm:$0xff]   ;;  %v8615_v17 = vld [vmem:[%s9203_s22 + $0x68] sm:$0xff]   ;;  %v8616_v18 = vld [vmem:[%s9203_s22 + $0x70] sm:$0xff]   ;;  %7813 = vmatprep.subr.bf16.mxu0 %v8634_v28 }
  0x17   : > { %v8617_v19 = vld [vmem:[%s9203_s22 + $0x78] sm:$0xff]   ;;  %v8618_v20 = vld [vmem:[%s9203_s22 + $0x80] sm:$0xff]   ;;  %v8619_v21 = vld [vmem:[%s9203_s22 + $0x88] sm:$0xff]   ;;  %7704 = vmatpush3.bf16.msra.mxu1 %v8639_v31 }
  0x18   : > { %v8620_v22 = vld [vmem:[%s9203_s22 + $0x90] sm:$0xff]   ;;  %v8621_v25 = vld [vmem:[%s9203_s22 + $0x98] sm:$0xff]   ;;  %v8622_v27 = vld [vmem:[%s9203_s22 + $0xa0] sm:$0xff]   ;;  %7705 = vmatprep.subr.bf16.mxu1 %v8642_v32 }
  0x19   : > { %7814 = vmatpush3.bf16.msra.mxu0 %v8636_v29  ;;  %v8623_v33 = vld [vmem:[%s9203_s22 + $0xa8] sm:$0xff]   ;;  %v8624_v34 = vld [vmem:[%s9203_s22 + $0xb0] sm:$0xff]   ;;  %v8625_v38 = vld [vmem:[%s9203_s22 + $0xb8] sm:$0xff]  }
  0x1a   : > { %v8626_v40 = vld [vmem:[%s9203_s22 + $0xc0] sm:$0xff]   ;;  %v8627_v44 = vld [vmem:[%s9203_s22 + $0xc8] sm:$0xff]   ;;  %v8628_v47 = vld [vmem:[%s9203_s22 + $0xd0] sm:$0xff]  }
  0x1b   : > { %7706 = vmatpush3.bf16.msra.mxu1 %v8643_v35  ;;  %v8653_v46 = vld [vmem:[%s10635_s3] sm:$0xff]   ;;  %v8648_v48 = vld [vmem:[%s10635_s3 + $0xe8] sm:$0xff]   ;;  %v8629_v50 = vld [vmem:[%s9203_s22 + $0xd8] sm:$0xff]  }
  0x1c   : > { %8412 = vmatmul.mubr.msk.bf16.gmra.mxu0 %vm712_vm0, %v8605_v7  ;;  %7707 = vmatprep.subr.bf16.mxu1 %v8644_v36  ;;  %v8649_v49 = vld [vmem:[%s10635_s3 + $0xa8] sm:$0xff]   ;;  %v8640_v51 = vld [vmem:[%s9203_s22 + $0xe0] sm:$0xff]   ;;  %v8654_v56 = vld [vmem:[%s9203_s22 + $0xf0] sm:$0xff]  }
  0x1d   : > { %8415 = vmatprep.mubr.msk.bf16.mxu0 %vm712_vm0, %v8606_v8  ;;  %7815 = vmatprep.subr.bf16.mxu0 %v8648_v48  ;;  %v8661_v52 = vld [vmem:[%s10635_s3 + $0xe0] sm:$0xff]   ;;  %v8641_v54 = vld [vmem:[%s9203_s22 + $0xe8] sm:$0xff]   ;;  %v8671_v57 = vld [vmem:[%s10635_s3 + $0x98] sm:$0xff]  }
  0x1e   : > { %7816 = vmatpush3.bf16.msra.mxu0 %v8649_v49  ;;  %v8662_v53 = vld [vmem:[%s10635_s3 + $0xa0] sm:$0xff]   ;;  %v8658_v58 = vld [vmem:[%s10635_s3 + $0x178] sm:$0xff]   ;;  %v8672_v59 = vld [vmem:[%s10635_s3 + $0xd0] sm:$0xff]  }
  0x1f   : > { %7708 = vmatpush3.bf16.msra.mxu1 %v8645_v37  ;;  %7817 = vmatprep.subr.bf16.mxu0 %v8661_v52  ;;  %v8673_v60 = vld [vmem:[%s10635_s3 + $0x90] sm:$0xff]   ;;  %v8659_v61 = vld [vmem:[%s9203_s22 + $0xf8] sm:$0xff]   ;;  %v8678_v62 = vld [vmem:[%s10635_s3 + $0xc8] sm:$0xff]  }
  0x20   : > { %7709 = vmatprep.subr.bf16.mxu1 %v8646_v39  ;;  %v8663_v63 = vld [vmem:[%s9203_s22 + $0x100] sm:$0xff]   ;;  %v8682_v0 = vld [vmem:[%s10635_s3 + $0x88] sm:$0xff]   ;;  %v8674_v4 = vld [vmem:[%s9203_s22 + $0x110] sm:$0xff]  }
  0x21   : > { %v8683_v1 = vld [vmem:[%s10635_s3 + $0xc0] sm:$0xff]   ;;  %v8666_v3 = vld [vmem:[%s9203_s22 + $0x108] sm:$0xff]   ;;  %v8676_v5 = vld [vmem:[%s9203_s22 + $0x118] sm:$0xff]   ;;  %s6637_s22 = sshll.u32 %s6631_s26, 1 }
  0x22   : > { %7818 = vmatpush3.bf16.msra.mxu0 %v8662_v53  ;;  %v8684_v2 = vld [vmem:[%s10635_s3 + $0x80] sm:$0xff]   ;;  %v8753_v53 = vld [vmem:[%s10635_s3 + $0x1f8] sm:$0xff]   ;;  %p439_p4 = scmp.lt.s32.totalorder %s6637_s22, 5 }
  0x23   : > { %7710 = vmatpush3.bf16.msra.mxu1 %v8647_v41  ;;  %7819 = vmatprep.subr.bf16.mxu0 %v8668_v55  ;;  %v9370_v7 = vld [vmem:[%s10634_s2] ss:$0 sm:$0xff] }
  0x24   : > { %8416 = vmatmul.mubr.msk.bf16.gmra.mxu0 %vm712_vm0, %v8607_v9  ;;  %7711 = vmatprep.subr.bf16.mxu1 %v8650_v42  ;;  %s10715_s22 = smov (!%p439_p4, %s6637_s22), 5 }
  0x25   : > { %8419 = vmatprep.mubr.msk.bf16.mxu0 %vm712_vm0, %v8608_v10  ;;  %s6638_s16 = sshll.u32 %s10715_s22, 2 }
  0x26   : > { %7820 = vmatpush3.bf16.msra.mxu0 %v8671_v57  ;;  %s442_s19 = scalar_lea.vmem %s10645_s13, %s6638_s16 }
  0x27   : > { %7712 = vmatpush3.bf16.msra.mxu1 %v8651_v43  ;;  %7821 = vmatprep.subr.bf16.mxu0 %v8672_v59 }
  0x28   : > { %7713 = vmatprep.subr.bf16.mxu1 %v8652_v45 }
  0x2a   : > { %7822 = vmatpush3.bf16.msra.mxu0 %v8673_v60 }
  0x2b   : > { %7714 = vmatpush3.bf16.msra.mxu1 %v8653_v46  ;;  %7823 = vmatprep.subr.bf16.mxu0 %v8678_v62 }
  0x2c   : > { %8420 = vmatmul.mubr.msk.bf16.gmra.mxu0 %vm712_vm0, %v8609_v11  ;;  %7923 = vmatprep.subr.bf16.mxu1 %v8658_v58 }
  0x2d   : > { %8423 = vmatprep.mubr.msk.bf16.mxu0 %vm712_vm0, %v8610_v12 }
  0x2e   : > { %7824 = vmatpush3.bf16.msra.mxu0 %v8682_v0 }
  0x2f   : > { %7825 = vmatprep.subr.bf16.mxu0 %v8683_v1 }
  0x32   : > { %7826 = vmatpush3.bf16.msra.mxu0 %v8684_v2 }
  0x33   : > { %8035 = vmatprep.subr.bf16.mxu0 %v8753_v53 }
  0x34   : > { %8424 = vmatmul.mubr.msk.bf16.gmra.mxu0 %vm712_vm0, %v8611_v13 }
  0x35   : > { %8427 = vmatprep.mubr.msk.bf16.mxu0 %vm712_vm0, %v8612_v14 }
  0x3c   : > { %8428 = vmatmul.mubr.msk.bf16.gmra.mxu0 %vm712_vm0, %v8613_v15 }
  0x3d   : > { %8431 = vmatprep.mubr.msk.bf16.mxu0 %vm712_vm0, %v8614_v16 }
  0x44   : > { %8432 = vmatmul.mubr.msk.bf16.gmra.mxu0 %vm712_vm0, %v8615_v17 }
  0x45   : > { %8435 = vmatprep.mubr.msk.bf16.mxu0 %vm712_vm0, %v8616_v18 }
  0x4c   : > { %8436 = vmatmul.mubr.msk.bf16.gmra.mxu0 %vm712_vm0, %v8617_v19 }
  0x4d   : > { %8439 = vmatprep.mubr.msk.bf16.mxu0 %vm712_vm0, %v8618_v20 }
  0x54   : > { %8440 = vmatmul.mubr.msk.bf16.gmra.mxu0 %vm712_vm0, %v8619_v21 }
  0x55   : > { %8443 = vmatprep.mubr.msk.bf16.mxu0 %vm712_vm0, %v8620_v22 }
  0x5c   : > { %8444 = vmatmul.mubr.msk.bf16.gmra.mxu0 %vm712_vm0, %v8621_v25 }
  0x5d   : > { %8447 = vmatprep.mubr.msk.bf16.mxu0 %vm712_vm0, %v8622_v27 }
  0x64   : > { %8448 = vmatmul.mubr.msk.bf16.gmra.mxu0 %vm712_vm0, %v8623_v33 }
  0x65   : > { %8451 = vmatprep.mubr.msk.bf16.mxu0 %vm712_vm0, %v8624_v34 }
  0x6c   : > { %8452 = vmatmul.mubr.msk.bf16.gmra.mxu0 %vm712_vm0, %v8625_v38 }
  0x6d   : > { %8455 = vmatprep.mubr.msk.bf16.mxu0 %vm712_vm0, %v8626_v40 }
  0x74   : > { %8456 = vmatmul.mubr.msk.bf16.gmra.mxu0 %vm712_vm0, %v8627_v44 }
  0x75   : > { %8459 = vmatprep.mubr.msk.bf16.mxu0 %vm712_vm0, %v8628_v47 }
  0x7c   : > { %8460 = vmatmul.mubr.msk.bf16.gmra.mxu0 %vm712_vm0, %v8629_v50 }
  0x7d   : > { %8463 = vmatprep.mubr.msk.bf16.mxu0 %vm712_vm0, %v8640_v51 }
  0x84   : > { %8464 = vmatmul.mubr.msk.bf16.gmra.mxu0 %vm712_vm0, %v8641_v54 }
  0x85   : > { %8467 = vmatprep.mubr.msk.bf16.mxu0 %vm712_vm0, %v8654_v56 }
  0x8c   : > { %8468 = vmatmul.mubr.msk.bf16.gmra.mxu0 %vm712_vm0, %v8659_v61 }
  0x8d   : > { %8471 = vmatprep.mubr.msk.bf16.mxu0 %vm712_vm0, %v8663_v63 }
  0x94   : > { %8472 = vmatmul.mubr.msk.bf16.gmra.mxu0 %vm712_vm0, %v8666_v3 }
  0x95   : > { %8475 = vmatprep.mubr.msk.bf16.mxu0 %vm712_vm0, %v8674_v4 }
  0x9c   : > { %8476 = vmatmul.mubr.msk.bf16.gmra.mxu0 %vm712_vm0, %v8676_v5 }
  0xd4   : > { %v8409_v6 = vpop.f32.mrf.mxu0 }
  0xd5   : > { %v864_v9 = vadd.f32 %v8409_v6, %v9370_v7 }
  0xd6   : > { %v855_v8 = vpop.f32.mrf.mxu0 }
  0xd7   : > { %v856_v11 = vadd.f32 %v9370_v7, %v855_v8  ;;  %v1144_v14 = vmax.f32 %v864_v9, 0.0 }
  0xd8   : > { %v8410_v10 = vpop.f32.mrf.mxu0 }
  0xd9   : > { %v867_v12 = vadd.f32 %v8410_v10, %v9370_v7  ;;  %v1142_v18 = vmax.f32 %v856_v11, 0.0 }
  0xda   : > { %v858_v13 = vpop.f32.mrf.mxu0 }
  0xdb   : > { %v1145_v15 = vmax.f32 %v867_v12, 0.0  ;;  %v859_v16 = vadd.f32 %v9370_v7, %v858_v13 }
  0xdc   : > { %v8413_v17 = vpop.f32.mrf.mxu0 }
  0xdd   : > { %v7332_v19 = vpack.c.bf16 %v1145_v15, %v1144_v14  ;;  %v1143_v20 = vmax.f32 %v859_v16, 0.0  ;;  %v880_v23 = vadd.f32 %v8413_v17, %v9370_v7 }
  0xde   : > { %v871_v21 = vpop.f32.mrf.mxu0 }
  0xdf   : > { %7609 = vst [vmem:[#allocation2 + $0x8] sm:$0xff] %v7332_v19   ;;  %v7327_v22 = vpack.c.bf16 %v1143_v20, %v1142_v18  ;;  %v872_v25 = vadd.f32 %v9370_v7, %v871_v21  ;;  %v1148_v28 = vmax.f32 %v880_v23, 0.0  ;;  %v8660_v18 = vld [vmem:[%s10635_s3 + $0x138] sm:$0xff]   ;;  %v8675_v20 = vld [vmem:[%s10635_s3 + $0x170] sm:$0xff]  }
  0xe0   : > { %v8414_v24 = vpop.f32.mrf.mxu0 }
  0xe1   : > { %7328 = vst [vmem:[#allocation2] sm:$0xff] %v7327_v22   ;;  %v883_v26 = vadd.f32 %v8414_v24, %v9370_v7  ;;  %v1146_v32 = vmax.f32 %v872_v25, 0.0 }
  0xe2   : > { %v874_v27 = vpop.f32.mrf.mxu0 }
  0xe3   : > { %v1149_v29 = vmax.f32 %v883_v26, 0.0  ;;  %v875_v30 = vadd.f32 %v9370_v7, %v874_v27 }
  0xe4   : > { %v8417_v31 = vpop.f32.mrf.mxu0 }
  0xe5   : > { %v7342_v33 = vpack.c.bf16 %v1149_v29, %v1148_v28  ;;  %v1147_v34 = vmax.f32 %v875_v30, 0.0  ;;  %v896_v35 = vadd.f32 %v8417_v31, %v9370_v7  ;;  %v8679_v29 = vld [vmem:[%s10635_s3 + $0x130] sm:$0xff]   ;;  %v8693_v30 = vld [vmem:[%s10635_s3 + $0x168] sm:$0xff]  }
  0xe6   : > { %v1576_v36 = vld [vmem:[#allocation2 + $0x8] sm:$0xf]  ;;  %v1577_v37 = vld [vmem:[#allocation2 + $0xc] sm:$0xf]  ;;  %v887_v38 = vpop.f32.mrf.mxu0 }
  0xe7   : > { %v1638_v39 = vld [vmem:[#allocation2 + $0x8] sm:$0xf]  ;;  %1584 = vst [vmem:[#allocation3 + $0x48] sm:$0xf] %v1576_v36  ;;  %1585 = vst [vmem:[#allocation3 + $0x6c] sm:$0xf] %v1577_v37  ;;  %v7337_v40 = vpack.c.bf16 %v1147_v34, %v1146_v32  ;;  %v888_v41 = vadd.f32 %v9370_v7, %v887_v38 }
  0xe8   : > { %7611 = vst [vmem:[#allocation2 + $0x18] sm:$0xff] %v7342_v33   ;;  %v1639_v42 = vld [vmem:[#allocation2 + $0xc] sm:$0xf]  ;;  %1646 = vst [vmem:[#allocation3 + $0x4] sm:$0xf] %v1638_v39  ;;  %v8418_v43 = vpop.f32.mrf.mxu0  ;;  %v1152_v46 = vmax.f32 %v896_v35, 0.0 }
  0xe9   : > { %v1574_v44 = vld [vmem:[#allocation2] sm:$0xf]  ;;  %v1575_v45 = vld [vmem:[#allocation2 + $0x4] sm:$0xf]  ;;  %1647 = vst [vmem:[#allocation3 + $0x28] sm:$0xf] %v1639_v42  ;;  %v899_v47 = vadd.f32 %v8418_v43, %v9370_v7 }
  0xea   : > { %7610 = vst [vmem:[#allocation2 + $0x10] sm:$0xff] %v7337_v40   ;;  %1582 = vst [vmem:[#allocation3] sm:$0xf] %v1574_v44  ;;  %v890_v48 = vpop.f32.mrf.mxu0  ;;  %v1150_v49 = vmax.f32 %v888_v41, 0.0  ;;  %v8696_v44 = vld [vmem:[%s10635_s3 + $0x128] sm:$0xff]  }
  0xeb   : > { %1583 = vst [vmem:[#allocation3 + $0x24] sm:$0xf] %v1575_v45  ;;  %v1153_v50 = vmax.f32 %v899_v47, 0.0  ;;  %v891_v51 = vadd.f32 %v9370_v7, %v890_v48 }
  0xec   : > { %v8421_v52 = vpop.f32.mrf.mxu0 }
  0xed   : > { %v7352_v54 = vpack.c.bf16 %v1153_v50, %v1152_v46  ;;  %v1151_v55 = vmax.f32 %v891_v51, 0.0  ;;  %v912_v59 = vadd.f32 %v8421_v52, %v9370_v7  ;;  %v8707_v46 = vld [vmem:[%s10635_s3 + $0x160] sm:$0xff]  }
  0xee   : > { %v903_v60 = vpop.f32.mrf.mxu0  ;;  %v8667_v40 = vld [vmem:[#allocation3 + $0x48] ss:$36 sps:$4 sm:$0xff]   ;;  %v8710_v50 = vld [vmem:[%s10635_s3 + $0x120] sm:$0xff]  }
  0xef   : > { %v1580_v56 = vld [vmem:[#allocation2 + $0x18] sm:$0xf]  ;;  %v1581_v57 = vld [vmem:[#allocation2 + $0x1c] sm:$0xf]  ;;  %7613 = vst [vmem:[#allocation2 + $0x28] sm:$0xff] %v7352_v54   ;;  %v7347_v0 = vpack.c.bf16 %v1151_v55, %v1150_v49  ;;  %v904_v1 = vadd.f32 %v9370_v7, %v903_v60  ;;  %v1156_v11 = vmax.f32 %v912_v59, 0.0 }
  0xf0   : > { %v1642_v58 = vld [vmem:[#allocation2 + $0x18] sm:$0xf]  ;;  %1588 = vst [vmem:[#allocation3 + $0xd8] sm:$0xf] %v1580_v56  ;;  %1589 = vst [vmem:[#allocation3 + $0xfc] sm:$0xf] %v1581_v57  ;;  %v8422_v5 = vpop.f32.mrf.mxu0 }
  0xf1   : > { %v1643_v61 = vld [vmem:[#allocation2 + $0x1c] sm:$0xf]  ;;  %1650 = vst [vmem:[#allocation3 + $0x94] sm:$0xf] %v1642_v58  ;;  %v1704_v62 = vld [vmem:[#allocation2 + $0x18] sm:$0xf]  ;;  %v915_v10 = vadd.f32 %v8422_v5, %v9370_v7 }
  0xf2   : > { %v1705_v63 = vld [vmem:[#allocation2 + $0x1c] sm:$0xf]  ;;  %1651 = vst [vmem:[#allocation3 + $0xb8] sm:$0xf] %v1643_v61  ;;  %1712 = vst [vmem:[#allocation3 + $0x50] sm:$0xf] %v1704_v62  ;;  %v906_v12 = vpop.f32.mrf.mxu0 }
  0xf3   : > { %1713 = vst [vmem:[#allocation3 + $0x74] sm:$0xf] %v1705_v63  ;;  %v1578_v2 = vld [vmem:[#allocation2 + $0x10] sm:$0xf]  ;;  %v1579_v3 = vld [vmem:[#allocation2 + $0x14] sm:$0xf]  ;;  %v907_v16 = vadd.f32 %v9370_v7, %v906_v12 }
  0xf4   : > { %v1640_v4 = vld [vmem:[#allocation2 + $0x10] sm:$0xf]  ;;  %v1641_v6 = vld [vmem:[#allocation2 + $0x14] sm:$0xf]  ;;  %1586 = vst [vmem:[#allocation3 + $0x90] sm:$0xf] %v1578_v2  ;;  %v8425_v19 = vpop.f32.mrf.mxu0 }
  0xf5   : > { %v1702_v8 = vld [vmem:[#allocation2 + $0x10] sm:$0xf]  ;;  %v1703_v9 = vld [vmem:[#allocation2 + $0x14] sm:$0xf]  ;;  %1587 = vst [vmem:[#allocation3 + $0xb4] sm:$0xf] %v1579_v3  ;;  %v928_v23 = vadd.f32 %v8425_v19, %v9370_v7 }
  0xf6   : > { %1648 = vst [vmem:[#allocation3 + $0x4c] sm:$0xf] %v1640_v4  ;;  %7612 = vst [vmem:[#allocation2 + $0x20] sm:$0xff] %v7347_v0   ;;  %v8655_v13 = vld [vmem:[#allocation3] ss:$36 sps:$4 sm:$0xff]   ;;  %v1154_v14 = vmax.f32 %v904_v1, 0.0  ;;  %v919_v26 = vpop.f32.mrf.mxu0 }
  0xf7   : > { %1649 = vst [vmem:[#allocation3 + $0x70] sm:$0xf] %v1641_v6  ;;  %1710 = vst [vmem:[#allocation3 + $0x8] sm:$0xf] %v1702_v8  ;;  %v1157_v15 = vmax.f32 %v915_v10, 0.0  ;;  %v1155_v22 = vmax.f32 %v907_v16, 0.0  ;;  %v920_v28 = vadd.f32 %v9370_v7, %v919_v26 }
  0xf8   : > { %1711 = vst [vmem:[#allocation3 + $0x2c] sm:$0xf] %v1703_v9  ;;  %v8657_v17 = vld [vmem:[#allocation3 + $0x4] ss:$36 sps:$4 sm:$0xff]   ;;  %v1709_v25 = vld [vmem:[#allocation2 + $0x2c] sm:$0xf]  ;;  %v8426_v34 = vpop.f32.mrf.mxu0 }
  0xf9   : > { %v7362_v21 = vpack.c.bf16 %v1157_v15, %v1156_v11  ;;  %3661 = vmatprep.mubr.bf16.mxu1 %v8657_v17  ;;  %v1708_v24 = vld [vmem:[#allocation2 + $0x28] sm:$0xf]  ;;  %1717 = vst [vmem:[#allocation3 + $0x104] sm:$0xf] %v1709_v25  ;;  %v7357_v27 = vpack.c.bf16 %v1155_v22, %v1154_v14  ;;  %v1160_v36 = vmax.f32 %v928_v23, 0.0  ;;  %v931_v37 = vadd.f32 %v8426_v34, %v9370_v7  ;;  %v8721_v56 = vld [vmem:[%s10635_s3 + $0x158] sm:$0xff]  }
  0xfa   : > { %3662 = vmatmul.mubr.bf16.vlgmr.msra.gmra.mxu1 %v8655_v13  ;;  %1716 = vst [vmem:[#allocation3 + $0xe0] sm:$0xf] %v1708_v24  ;;  %v922_v38 = vpop.f32.mrf.mxu0  ;;  %v1158_v41 = vmax.f32 %v920_v28, 0.0  ;;  %v8669_v49 = vld [vmem:[#allocation3 + $0x94] ss:$36 sps:$4 sm:$0xff]   ;;  %v8749_v24 = vld [vmem:[%s10635_s3 + $0x148] sm:$0xff]  }
  0xfb   : > { %7615 = vst [vmem:[#allocation2 + $0x38] sm:$0xff] %v7362_v21   ;;  %7924 = vmatpush3.bf16.msra.mxu1 %v8660_v18  ;;  %7614 = vst [vmem:[#allocation2 + $0x30] sm:$0xff] %v7357_v27   ;;  %v1161_v42 = vmax.f32 %v931_v37, 0.0  ;;  %v923_v43 = vadd.f32 %v9370_v7, %v922_v38  ;;  %v8724_v12 = vld [vmem:[%s10635_s3 + $0x118] sm:$0xff]   ;;  %v8735_v15 = vld [vmem:[%s10635_s3 + $0x150] sm:$0xff]  }
  0xfc   : > { %7925 = vmatprep.subr.bf16.mxu1 %v8675_v20  ;;  %v8429_v45 = vpop.f32.mrf.mxu0  ;;  %v8677_v14 = vld [vmem:[#allocation3 + $0x90] ss:$36 sps:$4 sm:$0xff]  }
  0xfd   : > { %v1644_v31 = vld [vmem:[#allocation2 + $0x20] sm:$0xf]  ;;  %v1645_v32 = vld [vmem:[#allocation2 + $0x24] sm:$0xf]  ;;  %v7372_v47 = vpack.c.bf16 %v1161_v42, %v1160_v36  ;;  %v1159_v48 = vmax.f32 %v923_v43, 0.0  ;;  %v944_v54 = vadd.f32 %v8429_v45, %v9370_v7  ;;  %v8738_v19 = vld [vmem:[%s10635_s3 + $0x110] sm:$0xff]  }
  0xfe   : > { %v1706_v33 = vld [vmem:[#allocation2 + $0x20] sm:$0xf]  ;;  %v1707_v35 = vld [vmem:[#allocation2 + $0x24] sm:$0xf]  ;;  %1652 = vst [vmem:[#allocation3 + $0xdc] sm:$0xf] %v1644_v31  ;;  %v935_v55 = vpop.f32.mrf.mxu0 }
  0xff   : > { %1653 = vst [vmem:[#allocation3 + $0x100] sm:$0xf] %v1645_v32  ;;  %1714 = vst [vmem:[#allocation3 + $0x98] sm:$0xf] %v1706_v33  ;;  %v8664_v39 = vld [vmem:[#allocation3 + $0x4c] ss:$36 sps:$4 sm:$0xff]   ;;  %7926 = vmatpush3.bf16.msra.mxu1 %v8679_v29  ;;  %v7367_v60 = vpack.c.bf16 %v1159_v48, %v1158_v41  ;;  %v936_v61 = vadd.f32 %v9370_v7, %v935_v55 }
 0x100   : > { %1715 = vst [vmem:[#allocation3 + $0xbc] sm:$0xf] %v1707_v35  ;;  %3669 = vmatprep.mubr.bf16.mxu1 %v8664_v39  ;;  %7927 = vmatprep.subr.bf16.mxu1 %v8693_v30  ;;  %7617 = vst [vmem:[#allocation2 + $0x48] sm:$0xff] %v7372_v47   ;;  %v8430_v1 = vpop.f32.mrf.mxu0  ;;  %v1164_v6 = vmax.f32 %v944_v54, 0.0  ;;  %v8752_v36 = vld [vmem:[%s10635_s3 + $0x108] sm:$0xff]   ;;  %v8766_v42 = vld [vmem:[%s10635_s3 + $0x140] sm:$0xff]  }
 0x101   : > { %7616 = vst [vmem:[#allocation2 + $0x40] sm:$0xff] %v7367_v60   ;;  %v947_v5 = vadd.f32 %v8430_v1, %v9370_v7  ;;  %v1162_v9 = vmax.f32 %v936_v61, 0.0  ;;  %v8688_v41 = vld [vmem:[#allocation3 + $0xd8] ss:$36 sps:$4 sm:$0xff]  }
 0x102   : > { %v1592_v51 = vld [vmem:[#allocation2 + $0x38] sm:$0xf]  ;;  %v1593_v52 = vld [vmem:[#allocation2 + $0x3c] sm:$0xf]  ;;  %3670 = vmatmul.mubr.bf16.gmra.mxu1 %v8667_v40  ;;  %v1590_v0 = vld [vmem:[#allocation2 + $0x30] sm:$0xf]  ;;  %v938_v8 = vpop.f32.mrf.mxu0 }
 0x103   : > { %v1654_v53 = vld [vmem:[#allocation2 + $0x38] sm:$0xf]  ;;  %1600 = vst [vmem:[#allocation3 + $0x168] sm:$0xf] %v1592_v51  ;;  %1601 = vst [vmem:[#allocation3 + $0x18c] sm:$0xf] %v1593_v52  ;;  %3677 = vmatprep.mubr.bf16.mxu1 %v8669_v49  ;;  %7928 = vmatpush3.bf16.msra.mxu1 %v8696_v44  ;;  %v939_v11 = vadd.f32 %v9370_v7, %v938_v8 }
 0x104   : > { %v1655_v57 = vld [vmem:[#allocation2 + $0x3c] sm:$0xf]  ;;  %1662 = vst [vmem:[#allocation3 + $0x124] sm:$0xf] %v1654_v53  ;;  %v1768_v58 = vld [vmem:[#allocation2 + $0x38] sm:$0xf]  ;;  %7929 = vmatprep.subr.bf16.mxu1 %v8707_v46  ;;  %v8433_v13 = vpop.f32.mrf.mxu0 }
 0x105   : > { %v1769_v59 = vld [vmem:[#allocation2 + $0x3c] sm:$0xf]  ;;  %1663 = vst [vmem:[#allocation3 + $0x148] sm:$0xf] %v1655_v57  ;;  %1776 = vst [vmem:[#allocation3 + $0x54] sm:$0xf] %v1768_v58  ;;  %v960_v46 = vadd.f32 %v8433_v13, %v9370_v7 }
 0x106   : > { %1777 = vst [vmem:[#allocation3 + $0x78] sm:$0xf] %v1769_v59  ;;  %v1830_v62 = vld [vmem:[#allocation2 + $0x38] sm:$0xf]  ;;  %v1831_v63 = vld [vmem:[#allocation2 + $0x3c] sm:$0xf]  ;;  %v951_v23 = vpop.f32.mrf.mxu0 }
 0x107   : > { %1838 = vst [vmem:[#allocation3 + $0x10] sm:$0xf] %v1830_v62  ;;  %1839 = vst [vmem:[#allocation3 + $0x34] sm:$0xf] %v1831_v63  ;;  %v1591_v2 = vld [vmem:[#allocation2 + $0x34] sm:$0xf]  ;;  %7930 = vmatpush3.bf16.msra.mxu1 %v8710_v50  ;;  %v952_v47 = vadd.f32 %v9370_v7, %v951_v23 }
 0x108   : > { %v1766_v3 = vld [vmem:[#allocation2 + $0x30] sm:$0xf]  ;;  %v1767_v4 = vld [vmem:[#allocation2 + $0x34] sm:$0xf]  ;;  %1598 = vst [vmem:[#allocation3 + $0x120] sm:$0xf] %v1590_v0  ;;  %7931 = vmatprep.subr.bf16.mxu1 %v8721_v56  ;;  %v8434_v32 = vpop.f32.mrf.mxu0 }
 0x109   : > { %1599 = vst [vmem:[#allocation3 + $0x144] sm:$0xf] %v1591_v2  ;;  %1774 = vst [vmem:[#allocation3 + $0xc] sm:$0xf] %v1766_v3  ;;  %v1165_v10 = vmax.f32 %v947_v5, 0.0  ;;  %v1163_v17 = vmax.f32 %v939_v11, 0.0  ;;  %v963_v48 = vadd.f32 %v8434_v32, %v9370_v7 }
 0x10a   : > { %1775 = vst [vmem:[#allocation3 + $0x30] sm:$0xf] %v1767_v4  ;;  %v8680_v18 = vld [vmem:[#allocation3 + $0xdc] ss:$36 sps:$4 sm:$0xff]   ;;  %v1596_v20 = vld [vmem:[#allocation2 + $0x48] sm:$0xf]  ;;  %3678 = vmatmul.mubr.bf16.gmra.mxu1 %v8677_v14  ;;  %v954_v40 = vpop.f32.mrf.mxu0 }
 0x10b   : > { %v7382_v16 = vpack.c.bf16 %v1165_v10, %v1164_v6  ;;  %v1597_v21 = vld [vmem:[#allocation2 + $0x4c] sm:$0xf]  ;;  %v1658_v22 = vld [vmem:[#allocation2 + $0x48] sm:$0xf]  ;;  %1604 = vst [vmem:[#allocation3 + $0x1f8] sm:$0xf] %v1596_v20  ;;  %v7377_v28 = vpack.c.bf16 %v1163_v17, %v1162_v9  ;;  %3685 = vmatprep.mubr.bf16.mxu1 %v8680_v18  ;;  %7932 = vmatpush3.bf16.msra.mxu1 %v8724_v12 }
 0x10c   : > { %1605 = vst [vmem:[#allocation3 + $0x21c] sm:$0xf] %v1597_v21  ;;  %v1659_v25 = vld [vmem:[#allocation2 + $0x4c] sm:$0xf]  ;;  %1666 = vst [vmem:[#allocation3 + $0x1b4] sm:$0xf] %v1658_v22  ;;  %7933 = vmatprep.subr.bf16.mxu1 %v8735_v15  ;;  %v955_v49 = vadd.f32 %v9370_v7, %v954_v40  ;;  %v8437_v53 = vpop.f32.mrf.mxu0 }
 0x10d   : > { %v1720_v26 = vld [vmem:[#allocation2 + $0x48] sm:$0xf]  ;;  %v1721_v27 = vld [vmem:[#allocation2 + $0x4c] sm:$0xf]  ;;  %7619 = vst [vmem:[#allocation2 + $0x58] sm:$0xff] %v7382_v16   ;;  %7618 = vst [vmem:[#allocation2 + $0x50] sm:$0xff] %v7377_v28   ;;  %v976_v61 = vadd.f32 %v8437_v53, %v9370_v7 }
 0x10e   : > { %1667 = vst [vmem:[#allocation3 + $0x1d8] sm:$0xf] %v1659_v25  ;;  %1728 = vst [vmem:[#allocation3 + $0x170] sm:$0xf] %v1720_v26  ;;  %v1772_v29 = vld [vmem:[#allocation2 + $0x48] sm:$0xf]  ;;  %v967_v62 = vpop.f32.mrf.mxu0 }
 0x10f   : > { %1729 = vst [vmem:[#allocation3 + $0x194] sm:$0xf] %v1721_v27  ;;  %v1773_v30 = vld [vmem:[#allocation2 + $0x4c] sm:$0xf]  ;;  %v1834_v31 = vld [vmem:[#allocation2 + $0x48] sm:$0xf]  ;;  %7934 = vmatpush3.bf16.msra.mxu1 %v8738_v19  ;;  %v968_v9 = vadd.f32 %v9370_v7, %v967_v62 }
 0x110   : > { %1780 = vst [vmem:[#allocation3 + $0xe4] sm:$0xf] %v1772_v29  ;;  %1781 = vst [vmem:[#allocation3 + $0x108] sm:$0xf] %v1773_v30  ;;  %v1835_v33 = vld [vmem:[#allocation2 + $0x4c] sm:$0xf]  ;;  %7935 = vmatprep.subr.bf16.mxu1 %v8749_v24  ;;  %v8438_v10 = vpop.f32.mrf.mxu0 }
 0x111   : > { %1842 = vst [vmem:[#allocation3 + $0xa0] sm:$0xf] %v1834_v31  ;;  %v1896_v34 = vld [vmem:[#allocation2 + $0x48] sm:$0xf]  ;;  %v1897_v35 = vld [vmem:[#allocation2 + $0x4c] sm:$0xf]  ;;  %v979_v16 = vadd.f32 %v8438_v10, %v9370_v7 }
 0x112   : > { %1843 = vst [vmem:[#allocation3 + $0xc4] sm:$0xf] %v1835_v33  ;;  %1904 = vst [vmem:[#allocation3 + $0x5c] sm:$0xf] %v1896_v34  ;;  %v1594_v37 = vld [vmem:[#allocation2 + $0x40] sm:$0xf]  ;;  %3686 = vmatmul.mubr.bf16.gmra.mxu1 %v8688_v41  ;;  %v970_v21 = vpop.f32.mrf.mxu0 }
 0x113   : > { %1905 = vst [vmem:[#allocation3 + $0x80] sm:$0xf] %v1897_v35  ;;  %v1595_v38 = vld [vmem:[#allocation2 + $0x44] sm:$0xf]  ;;  %v1656_v39 = vld [vmem:[#allocation2 + $0x40] sm:$0xf]  ;;  %7936 = vmatpush3.bf16.msra.mxu1 %v8752_v36  ;;  %v971_v26 = vadd.f32 %v9370_v7, %v970_v21 }
 0x114   : > { %v1657_v43 = vld [vmem:[#allocation2 + $0x44] sm:$0xf]  ;;  %v1718_v44 = vld [vmem:[#allocation2 + $0x40] sm:$0xf]  ;;  %1602 = vst [vmem:[#allocation3 + $0x1b0] sm:$0xf] %v1594_v37  ;;  %7937 = vmatprep.subr.bf16.mxu1 %v8766_v42  ;;  %v8441_v29 = vpop.f32.mrf.mxu0 }
 0x115   : > { %v1719_v45 = vld [vmem:[#allocation2 + $0x44] sm:$0xf]  ;;  %1603 = vst [vmem:[#allocation3 + $0x1d4] sm:$0xf] %v1595_v38  ;;  %1664 = vst [vmem:[#allocation3 + $0x16c] sm:$0xf] %v1656_v39  ;;  %v9462_v32 = vadd.f32 %v8441_v29, %v9370_v7 }
 0x116   : > { %v1770_v50 = vld [vmem:[#allocation2 + $0x40] sm:$0xf]  ;;  %v1771_v51 = vld [vmem:[#allocation2 + $0x44] sm:$0xf]  ;;  %1665 = vst [vmem:[#allocation3 + $0x190] sm:$0xf] %v1657_v43  ;;  %v983_v35 = vpop.f32.mrf.mxu0 }
 0x117   : > { %v1832_v52 = vld [vmem:[#allocation2 + $0x40] sm:$0xf]  ;;  %1726 = vst [vmem:[#allocation3 + $0x128] sm:$0xf] %v1718_v44  ;;  %1727 = vst [vmem:[#allocation3 + $0x14c] sm:$0xf] %v1719_v45  ;;  %v9468_v39 = vadd.f32 %v9370_v7, %v983_v35 }
 0x118   : > { %v1833_v54 = vld [vmem:[#allocation2 + $0x44] sm:$0xf]  ;;  %v1894_v55 = vld [vmem:[#allocation2 + $0x40] sm:$0xf]  ;;  %1778 = vst [vmem:[#allocation3 + $0x9c] sm:$0xf] %v1770_v50  ;;  %v9470_v40 = vpop.f32.mrf.mxu0 }
 0x119   : > { %v1895_v56 = vld [vmem:[#allocation2 + $0x44] sm:$0xf]  ;;  %1779 = vst [vmem:[#allocation3 + $0xc0] sm:$0xf] %v1771_v51  ;;  %1840 = vst [vmem:[#allocation3 + $0x58] sm:$0xf] %v1832_v52 }
 0x11a   : > { %v8768_v57 = vld [vmem:[%s10635_s3 + $0x100] sm:$0xff]   ;;  %1841 = vst [vmem:[#allocation3 + $0x7c] sm:$0xf] %v1833_v54  ;;  %1902 = vst [vmem:[#allocation3 + $0x14] sm:$0xf] %v1894_v55  ;;  %v8783_v63 = vld [vmem:[%s10635_s3 + $0x238] sm:$0xff]  }
 0x11b   : > { %1903 = vst [vmem:[#allocation3 + $0x38] sm:$0xf] %v1895_v56  ;;  %v1724_v58 = vld [vmem:[#allocation2 + $0x58] sm:$0xf]  ;;  %v1725_v59 = vld [vmem:[#allocation2 + $0x5c] sm:$0xf]  ;;  %7938 = vmatpush3.bf16.msra.mxu1 %v8768_v57 }
 0x11c   : > { %v1900_v60 = vld [vmem:[#allocation2 + $0x58] sm:$0xf]  ;;  %1732 = vst [vmem:[#allocation3 + $0x200] sm:$0xf] %v1724_v58  ;;  %1733 = vst [vmem:[#allocation3 + $0x224] sm:$0xf] %v1725_v59  ;;  %8479 = vmatprep.subr.bf16.mxu1 %v8783_v63 }
 0x11d   : > { %v1901_v0 = vld [vmem:[#allocation2 + $0x5c] sm:$0xf]  ;;  %1908 = vst [vmem:[#allocation3 + $0xec] sm:$0xf] %v1900_v60  ;;  %v1168_v1 = vmax.f32 %v960_v46, 0.0  ;;  %v1166_v2 = vmax.f32 %v952_v47, 0.0  ;;  %v9474_v47 = vpop.f32.mrf.mxu0 }
 0x11e   : > { %v1169_v3 = vmax.f32 %v963_v48, 0.0  ;;  %v1167_v4 = vmax.f32 %v955_v49, 0.0  ;;  %1909 = vst [vmem:[#allocation3 + $0x110] sm:$0xf] %v1901_v0  ;;  %v1660_v5 = vld [vmem:[#allocation2 + $0x50] sm:$0xf] }
 0x11f   : > { %v1661_v6 = vld [vmem:[#allocation2 + $0x54] sm:$0xf]  ;;  %v1722_v8 = vld [vmem:[#allocation2 + $0x50] sm:$0xf]  ;;  %1668 = vst [vmem:[#allocation3 + $0x1fc] sm:$0xf] %v1660_v5  ;;  %v9476_v55 = vpop.f32.mrf.mxu0 }
 0x120   : > { %v1723_v11 = vld [vmem:[#allocation2 + $0x54] sm:$0xf]  ;;  %v1836_v12 = vld [vmem:[#allocation2 + $0x50] sm:$0xf]  ;;  %1669 = vst [vmem:[#allocation3 + $0x220] sm:$0xf] %v1661_v6  ;;  %v7392_v14 = vpack.c.bf16 %v1169_v3, %v1168_v1  ;;  %v7387_v15 = vpack.c.bf16 %v1167_v4, %v1166_v2 }
 0x121   : > { %v1837_v13 = vld [vmem:[#allocation2 + $0x54] sm:$0xf]  ;;  %1730 = vst [vmem:[#allocation3 + $0x1b8] sm:$0xf] %v1722_v8  ;;  %v8759_v17 = vld [vmem:[%s10635_s3 + $0x1b8] sm:$0xff]   ;;  %v1172_v20 = vmax.f32 %v976_v61, 0.0  ;;  %v9478_v63 = vpop.f32.mrf.mxu0 }
 0x122   : > { %v1898_v18 = vld [vmem:[#allocation2 + $0x50] sm:$0xf]  ;;  %v1899_v19 = vld [vmem:[#allocation2 + $0x54] sm:$0xf]  ;;  %1731 = vst [vmem:[#allocation3 + $0x1dc] sm:$0xf] %v1723_v11 }
 0x123   : > { %1844 = vst [vmem:[#allocation3 + $0xe8] sm:$0xf] %v1836_v12  ;;  %1845 = vst [vmem:[#allocation3 + $0x10c] sm:$0xf] %v1837_v13  ;;  %v8769_v22 = vld [vmem:[%s10635_s3 + $0x1f0] sm:$0xff]   ;;  %v1170_v25 = vmax.f32 %v968_v9, 0.0  ;;  %v9480_v6 = vpop.f32.mrf.mxu0 }
 0x124   : > { %1906 = vst [vmem:[#allocation3 + $0xa4] sm:$0xf] %v1898_v18  ;;  %1907 = vst [vmem:[#allocation3 + $0xc8] sm:$0xf] %v1899_v19  ;;  %v8685_v23 = vld [vmem:[#allocation3 + $0x8] ss:$36 sps:$4 sm:$0xff]  }
 0x125   : > { %7621 = vst [vmem:[#allocation2 + $0x68] sm:$0xff] %v7392_v14   ;;  %7620 = vst [vmem:[#allocation2 + $0x60] sm:$0xff] %v7387_v15   ;;  %v8687_v24 = vld [vmem:[#allocation3 + $0xc] ss:$36 sps:$4 sm:$0xff]   ;;  %v8689_v27 = vld [vmem:[#allocation3 + $0x124] ss:$36 sps:$4 sm:$0xff]   ;;  %v1002_v15 = vpop.f32.mrf.mxu0 }
 0x126   : > { %v1173_v28 = vmax.f32 %v979_v16, 0.0  ;;  %3822 = vmatprep.mubr.bf16.mxu0 %v8687_v24  ;;  %v8691_v30 = vld [vmem:[#allocation3 + $0x54] ss:$36 sps:$4 sm:$0xff]   ;;  %v1171_v31 = vmax.f32 %v971_v26, 0.0  ;;  %3693 = vmatprep.mubr.bf16.mxu1 %v8689_v27  ;;  %v8694_v34 = vld [vmem:[#allocation3 + $0x120] ss:$36 sps:$4 sm:$0xff]  }
 0x127   : > { %3823 = vmatmul.mubr.bf16.vlgmr.msra.gmra.mxu0 %v8685_v23  ;;  %v8775_v36 = vld [vmem:[%s10635_s3 + $0x1b0] sm:$0xff]   ;;  %3694 = vmatmul.mubr.bf16.gmra.mxu1 %v8694_v34  ;;  %v1176_v41 = vmax.f32 %v9462_v32, 0.0  ;;  %v1174_v42 = vmax.f32 %v9468_v39, 0.0  ;;  %v8699_v51 = vld [vmem:[#allocation3 + $0x9c] ss:$36 sps:$4 sm:$0xff]  }
 0x128   : > { %v7402_v33 = vpack.c.bf16 %v1173_v28, %v1172_v20  ;;  %3830 = vmatprep.mubr.bf16.mxu0 %v8691_v30  ;;  %v7397_v37 = vpack.c.bf16 %v1171_v31, %v1170_v25  ;;  %v8697_v38 = vld [vmem:[#allocation3 + $0x16c] ss:$36 sps:$4 sm:$0xff]   ;;  %8036 = vmatpush3.bf16.msra.mxu0 %v8759_v17  ;;  %v8702_v14 = vld [vmem:[#allocation3 + $0x98] ss:$36 sps:$4 sm:$0xff]  }
 0x129   : > { %8037 = vmatprep.subr.bf16.mxu0 %v8769_v22  ;;  %3701 = vmatprep.mubr.bf16.mxu1 %v8697_v38  ;;  %v8695_v46 = vld [vmem:[#allocation3 + $0x50] ss:$36 sps:$4 sm:$0xff]   ;;  %v8701_v56 = vld [vmem:[#allocation3 + $0x168] ss:$36 sps:$4 sm:$0xff]   ;;  %v8449_v22 = vpop.f32.mrf.mxu0  ;;  %v987_v38 = vadd.f32 %v9370_v7, %v9474_v47 }
 0x12a   : > { %7623 = vst [vmem:[#allocation2 + $0x78] sm:$0xff] %v7402_v33   ;;  %7622 = vst [vmem:[#allocation2 + $0x70] sm:$0xff] %v7397_v37   ;;  %v995_v37 = vadd.f32 %v9470_v40, %v9370_v7  ;;  %v1003_v40 = vadd.f32 %v9370_v7, %v1002_v15 }
 0x12b   : > { %v1015_v29 = vpop.f32.mrf.mxu0 }
 0x12c   : > { %v1608_v43 = vld [vmem:[#allocation2 + $0x68] sm:$0xf]  ;;  %v1609_v44 = vld [vmem:[#allocation2 + $0x6c] sm:$0xf]  ;;  %8038 = vmatpush3.bf16.msra.mxu0 %v8775_v36  ;;  %v1606_v60 = vld [vmem:[#allocation2 + $0x60] sm:$0xf] }
 0x12d   : > { %v1670_v45 = vld [vmem:[#allocation2 + $0x68] sm:$0xf]  ;;  %1616 = vst [vmem:[#allocation3 + $0x288] sm:$0xf] %v1608_v43  ;;  %1617 = vst [vmem:[#allocation3 + $0x2ac] sm:$0xf] %v1609_v44  ;;  %v1008_v43 = vadd.f32 %v9476_v55, %v9370_v7  ;;  %v8450_v44 = vpop.f32.mrf.mxu0 }
 0x12e   : > { %v1671_v48 = vld [vmem:[#allocation2 + $0x6c] sm:$0xf]  ;;  %1678 = vst [vmem:[#allocation3 + $0x244] sm:$0xf] %v1670_v45  ;;  %v1784_v49 = vld [vmem:[#allocation2 + $0x68] sm:$0xf] }
 0x12f   : > { %v1785_v50 = vld [vmem:[#allocation2 + $0x6c] sm:$0xf]  ;;  %1679 = vst [vmem:[#allocation3 + $0x268] sm:$0xf] %v1671_v48  ;;  %1792 = vst [vmem:[#allocation3 + $0x174] sm:$0xf] %v1784_v49  ;;  %3831 = vmatmul.mubr.bf16.gmra.mxu0 %v8695_v46  ;;  %3702 = vmatmul.mubr.bf16.gmra.mxu1 %v8701_v56  ;;  %v1000_v49 = vadd.f32 %v9370_v7, %v9478_v63 }
 0x130   : > { %1793 = vst [vmem:[#allocation3 + $0x198] sm:$0xf] %v1785_v50  ;;  %v1846_v52 = vld [vmem:[#allocation2 + $0x68] sm:$0xf]  ;;  %v1847_v53 = vld [vmem:[#allocation2 + $0x6c] sm:$0xf]  ;;  %3838 = vmatprep.mubr.bf16.mxu0 %v8699_v51  ;;  %v1011_v50 = vadd.f32 %v9480_v6, %v9370_v7 }
 0x131   : > { %v1960_v54 = vld [vmem:[#allocation2 + $0x68] sm:$0xf]  ;;  %1854 = vst [vmem:[#allocation3 + $0x130] sm:$0xf] %v1846_v52  ;;  %1855 = vst [vmem:[#allocation3 + $0x154] sm:$0xf] %v1847_v53  ;;  %v1024_v53 = vadd.f32 %v8449_v22, %v9370_v7 }
 0x132   : > { %v1961_v57 = vld [vmem:[#allocation2 + $0x6c] sm:$0xf]  ;;  %1968 = vst [vmem:[#allocation3 + $0x60] sm:$0xf] %v1960_v54  ;;  %v2022_v58 = vld [vmem:[#allocation2 + $0x68] sm:$0xf]  ;;  %v1018_v54 = vpop.f32.mrf.mxu0 }
 0x133   : > { %v2023_v59 = vld [vmem:[#allocation2 + $0x6c] sm:$0xf]  ;;  %1969 = vst [vmem:[#allocation3 + $0x84] sm:$0xf] %v1961_v57  ;;  %2030 = vst [vmem:[#allocation3 + $0x1c] sm:$0xf] %v2022_v58  ;;  %v1016_v58 = vadd.f32 %v9370_v7, %v1015_v29 }
 0x134   : > { %2031 = vst [vmem:[#allocation3 + $0x40] sm:$0xf] %v2023_v59  ;;  %v1607_v61 = vld [vmem:[#allocation2 + $0x64] sm:$0xf]  ;;  %v1782_v62 = vld [vmem:[#allocation2 + $0x60] sm:$0xf]  ;;  %v1027_v59 = vadd.f32 %v8450_v44, %v9370_v7 }
 0x135   : > { %v1783_v0 = vld [vmem:[#allocation2 + $0x64] sm:$0xf]  ;;  %v1958_v1 = vld [vmem:[#allocation2 + $0x60] sm:$0xf]  ;;  %1614 = vst [vmem:[#allocation3 + $0x240] sm:$0xf] %v1606_v60 }
 0x136   : > { %v1959_v2 = vld [vmem:[#allocation2 + $0x64] sm:$0xf]  ;;  %1615 = vst [vmem:[#allocation3 + $0x264] sm:$0xf] %v1607_v61  ;;  %1790 = vst [vmem:[#allocation3 + $0x12c] sm:$0xf] %v1782_v62 }
 0x137   : > { %1791 = vst [vmem:[#allocation3 + $0x150] sm:$0xf] %v1783_v0  ;;  %1966 = vst [vmem:[#allocation3 + $0x18] sm:$0xf] %v1958_v1  ;;  %v1612_v3 = vld [vmem:[#allocation2 + $0x78] sm:$0xf]  ;;  %3839 = vmatmul.mubr.bf16.gmra.mxu0 %v8702_v14  ;;  %v1019_v0 = vadd.f32 %v9370_v7, %v1018_v54  ;;  %v8453_v1 = vpop.f32.mrf.mxu0 }
 0x138   : > { %1967 = vst [vmem:[#allocation3 + $0x3c] sm:$0xf] %v1959_v2  ;;  %v1613_v4 = vld [vmem:[#allocation2 + $0x7c] sm:$0xf]  ;;  %v1674_v5 = vld [vmem:[#allocation2 + $0x78] sm:$0xf] }
 0x139   : > { %1620 = vst [vmem:[#allocation3 + $0x318] sm:$0xf] %v1612_v3  ;;  %1621 = vst [vmem:[#allocation3 + $0x33c] sm:$0xf] %v1613_v4  ;;  %v1675_v8 = vld [vmem:[#allocation2 + $0x7c] sm:$0xf] }
 0x13a   : > { %1682 = vst [vmem:[#allocation3 + $0x2d4] sm:$0xf] %v1674_v5  ;;  %v1736_v9 = vld [vmem:[#allocation2 + $0x78] sm:$0xf]  ;;  %v1737_v10 = vld [vmem:[#allocation2 + $0x7c] sm:$0xf] }
 0x13b   : > { %1683 = vst [vmem:[#allocation3 + $0x2f8] sm:$0xf] %v1675_v8  ;;  %1744 = vst [vmem:[#allocation3 + $0x290] sm:$0xf] %v1736_v9  ;;  %v1788_v11 = vld [vmem:[#allocation2 + $0x78] sm:$0xf] }
 0x13c   : > { %1745 = vst [vmem:[#allocation3 + $0x2b4] sm:$0xf] %v1737_v10  ;;  %v1789_v12 = vld [vmem:[#allocation2 + $0x7c] sm:$0xf]  ;;  %v1850_v13 = vld [vmem:[#allocation2 + $0x78] sm:$0xf] }
 0x13d   : > { %1796 = vst [vmem:[#allocation3 + $0x204] sm:$0xf] %v1788_v11  ;;  %1797 = vst [vmem:[#allocation3 + $0x228] sm:$0xf] %v1789_v12  ;;  %v1851_v16 = vld [vmem:[#allocation2 + $0x7c] sm:$0xf] }
 0x13e   : > { %1858 = vst [vmem:[#allocation3 + $0x1c0] sm:$0xf] %v1850_v13  ;;  %v1912_v17 = vld [vmem:[#allocation2 + $0x78] sm:$0xf]  ;;  %v1913_v18 = vld [vmem:[#allocation2 + $0x7c] sm:$0xf]  ;;  %v1031_v13 = vpop.f32.mrf.mxu0 }
 0x13f   : > { %1859 = vst [vmem:[#allocation3 + $0x1e4] sm:$0xf] %v1851_v16  ;;  %1920 = vst [vmem:[#allocation3 + $0x17c] sm:$0xf] %v1912_v17  ;;  %v1964_v19 = vld [vmem:[#allocation2 + $0x78] sm:$0xf] }
 0x140   : > { %1921 = vst [vmem:[#allocation3 + $0x1a0] sm:$0xf] %v1913_v18  ;;  %v1965_v20 = vld [vmem:[#allocation2 + $0x7c] sm:$0xf]  ;;  %v2026_v21 = vld [vmem:[#allocation2 + $0x78] sm:$0xf] }
 0x141   : > { %1972 = vst [vmem:[#allocation3 + $0xf0] sm:$0xf] %v1964_v19  ;;  %1973 = vst [vmem:[#allocation3 + $0x114] sm:$0xf] %v1965_v20  ;;  %v2027_v23 = vld [vmem:[#allocation2 + $0x7c] sm:$0xf] }
 0x142   : > { %2034 = vst [vmem:[#allocation3 + $0xac] sm:$0xf] %v2026_v21  ;;  %v2088_v24 = vld [vmem:[#allocation2 + $0x78] sm:$0xf]  ;;  %v2089_v25 = vld [vmem:[#allocation2 + $0x7c] sm:$0xf] }
 0x143   : > { %2035 = vst [vmem:[#allocation3 + $0xd0] sm:$0xf] %v2027_v23  ;;  %2096 = vst [vmem:[#allocation3 + $0x68] sm:$0xf] %v2088_v24  ;;  %v1610_v26 = vld [vmem:[#allocation2 + $0x70] sm:$0xf] }
 0x144   : > { %2097 = vst [vmem:[#allocation3 + $0x8c] sm:$0xf] %v2089_v25  ;;  %v1611_v27 = vld [vmem:[#allocation2 + $0x74] sm:$0xf]  ;;  %v1672_v28 = vld [vmem:[#allocation2 + $0x70] sm:$0xf] }
 0x145   : > { %v1673_v30 = vld [vmem:[#allocation2 + $0x74] sm:$0xf]  ;;  %v1734_v31 = vld [vmem:[#allocation2 + $0x70] sm:$0xf]  ;;  %1618 = vst [vmem:[#allocation3 + $0x2d0] sm:$0xf] %v1610_v26 }
 0x146   : > { %v1735_v33 = vld [vmem:[#allocation2 + $0x74] sm:$0xf]  ;;  %1619 = vst [vmem:[#allocation3 + $0x2f4] sm:$0xf] %v1611_v27  ;;  %1680 = vst [vmem:[#allocation3 + $0x28c] sm:$0xf] %v1672_v28 }
 0x147   : > { %v1786_v34 = vld [vmem:[#allocation2 + $0x70] sm:$0xf]  ;;  %v1787_v35 = vld [vmem:[#allocation2 + $0x74] sm:$0xf]  ;;  %1681 = vst [vmem:[#allocation3 + $0x2b0] sm:$0xf] %v1673_v30 }
 0x148   : > { %v1848_v36 = vld [vmem:[#allocation2 + $0x70] sm:$0xf]  ;;  %1742 = vst [vmem:[#allocation3 + $0x248] sm:$0xf] %v1734_v31  ;;  %1743 = vst [vmem:[#allocation3 + $0x26c] sm:$0xf] %v1735_v33 }
 0x149   : > { %v1849_v45 = vld [vmem:[#allocation2 + $0x74] sm:$0xf]  ;;  %v1910_v46 = vld [vmem:[#allocation2 + $0x70] sm:$0xf]  ;;  %1794 = vst [vmem:[#allocation3 + $0x1bc] sm:$0xf] %v1786_v34 }
 0x14a   : > { %v1911_v48 = vld [vmem:[#allocation2 + $0x74] sm:$0xf]  ;;  %1795 = vst [vmem:[#allocation3 + $0x1e0] sm:$0xf] %v1787_v35  ;;  %1856 = vst [vmem:[#allocation3 + $0x178] sm:$0xf] %v1848_v36 }
 0x14b   : > { %v1962_v51 = vld [vmem:[#allocation2 + $0x70] sm:$0xf]  ;;  %v1963_v47 = vld [vmem:[#allocation2 + $0x74] sm:$0xf]  ;;  %1857 = vst [vmem:[#allocation3 + $0x19c] sm:$0xf] %v1849_v45 }
 0x14c   : > { %v2024_v52 = vld [vmem:[#allocation2 + $0x70] sm:$0xf]  ;;  %1918 = vst [vmem:[#allocation3 + $0x134] sm:$0xf] %v1910_v46  ;;  %1919 = vst [vmem:[#allocation3 + $0x158] sm:$0xf] %v1911_v48 }
 0x14d   : > { %v2025_v55 = vld [vmem:[#allocation2 + $0x74] sm:$0xf]  ;;  %v2086_v56 = vld [vmem:[#allocation2 + $0x70] sm:$0xf]  ;;  %1970 = vst [vmem:[#allocation3 + $0xa8] sm:$0xf] %v1962_v51 }
 0x14e   : > { %v2087_v57 = vld [vmem:[#allocation2 + $0x74] sm:$0xf]  ;;  %1971 = vst [vmem:[#allocation3 + $0xcc] sm:$0xf] %v1963_v47  ;;  %2032 = vst [vmem:[#allocation3 + $0x64] sm:$0xf] %v2024_v52 }
 0x14f   : > { %2033 = vst [vmem:[#allocation3 + $0x88] sm:$0xf] %v2025_v55  ;;  %2094 = vst [vmem:[#allocation3 + $0x20] sm:$0xf] %v2086_v56  ;;  %v1177_v60 = vmax.f32 %v995_v37, 0.0  ;;  %v1175_v61 = vmax.f32 %v987_v38, 0.0 }
 0x150   : > { %2095 = vst [vmem:[#allocation3 + $0x44] sm:$0xf] %v2087_v57  ;;  %v1180_v62 = vmax.f32 %v1008_v43, 0.0  ;;  %v8703_v63 = vld [vmem:[#allocation3 + $0x1b4] ss:$36 sps:$4 sm:$0xff]   ;;  %v1178_v3 = vmax.f32 %v1000_v49, 0.0 }
 0x151   : > { %v8705_v2 = vld [vmem:[#allocation3 + $0xe4] ss:$36 sps:$4 sm:$0xff]   ;;  %v1181_v4 = vmax.f32 %v1011_v50, 0.0  ;;  %v1179_v5 = vmax.f32 %v1003_v40, 0.0  ;;  %v9500_v6 = vld [vmem:[%s10634_s2] ss:$0 sm:$0xff]  ;;  %v7412_v9 = vpack.c.bf16 %v1177_v60, %v1176_v41  ;;  %v7407_v10 = vpack.c.bf16 %v1175_v61, %v1174_v42  ;;  %3709 = vmatprep.mubr.bf16.mxu1 %v8703_v63  ;;  %v8454_v42 = vpop.f32.mrf.mxu0 }
 0x152   : > { %v1040_v8 = vadd.f32 %v9500_v6, %v8453_v1  ;;  %v8708_v7 = vld [vmem:[#allocation3 + $0x1b0] ss:$36 sps:$4 sm:$0xff]   ;;  %v8709_v11 = vld [vmem:[#allocation3 + $0xe0] ss:$36 sps:$4 sm:$0xff]   ;;  %v1184_v12 = vmax.f32 %v1024_v53, 0.0  ;;  %3846 = vmatprep.mubr.bf16.mxu0 %v8705_v2  ;;  %v1182_v17 = vmax.f32 %v1016_v58, 0.0  ;;  %v1032_v39 = vadd.f32 %v9500_v6, %v1031_v13 }
 0x153   : > { %v7422_v14 = vpack.c.bf16 %v1181_v4, %v1180_v62  ;;  %v7417_v15 = vpack.c.bf16 %v1179_v5, %v1178_v3  ;;  %v8711_v16 = vld [vmem:[#allocation3 + $0x1fc] ss:$36 sps:$4 sm:$0xff]   ;;  %v1185_v18 = vmax.f32 %v1027_v59, 0.0  ;;  %7625 = vst [vmem:[#allocation2 + $0x88] sm:$0xff] %v7412_v9   ;;  %7624 = vst [vmem:[#allocation2 + $0x80] sm:$0xff] %v7407_v10   ;;  %3710 = vmatmul.mubr.bf16.gmra.mxu1 %v8708_v7  ;;  %3847 = vmatmul.mubr.bf16.gmra.mxu0 %v8709_v11  ;;  %v1034_v23 = vpop.f32.mrf.mxu0 }
 0x154   : > { %v8713_v32 = vld [vmem:[#allocation3 + $0x12c] ss:$36 sps:$4 sm:$0xff]   ;;  %v1183_v41 = vmax.f32 %v1019_v0, 0.0  ;;  %3717 = vmatprep.mubr.bf16.mxu1 %v8711_v16  ;;  %v1188_v20 = vmax.f32 %v1040_v8, 0.0  ;;  %v1043_v21 = vadd.f32 %v9500_v6, %v8454_v42  ;;  %v1186_v24 = vmax.f32 %v1032_v39, 0.0 }
 0x155   : > { %7627 = vst [vmem:[#allocation2 + $0x98] sm:$0xff] %v7422_v14   ;;  %7626 = vst [vmem:[#allocation2 + $0x90] sm:$0xff] %v7417_v15   ;;  %v7432_v19 = vpack.c.bf16 %v1185_v18, %v1184_v12  ;;  %3854 = vmatprep.mubr.bf16.mxu0 %v8713_v32  ;;  %v1035_v26 = vadd.f32 %v9500_v6, %v1034_v23  ;;  %v8715_v27 = vld [vmem:[#allocation3 + $0x1f8] ss:$36 sps:$4 sm:$0xff]   ;;  %v9510_v28 = vpop.f32.mrf.mxu0  ;;  %v8717_v29 = vld [vmem:[#allocation3 + $0x244] ss:$36 sps:$4 sm:$0xff]  }
 0x156   : > { %v7427_v22 = vpack.c.bf16 %v1183_v41, %v1182_v17  ;;  %v1189_v25 = vmax.f32 %v1043_v21, 0.0  ;;  %v8716_v33 = vld [vmem:[#allocation3 + $0x128] ss:$36 sps:$4 sm:$0xff]   ;;  %v8719_v34 = vld [vmem:[#allocation3 + $0x174] ss:$36 sps:$4 sm:$0xff]  }
 0x157   : > { %7629 = vst [vmem:[#allocation2 + $0xa8] sm:$0xff] %v7432_v19   ;;  %v1187_v31 = vmax.f32 %v1035_v26, 0.0  ;;  %v9512_v35 = vpop.f32.mrf.mxu0  ;;  %v8722_v60 = vld [vmem:[#allocation3 + $0x240] ss:$36 sps:$4 sm:$0xff]   ;;  %v8723_v61 = vld [vmem:[#allocation3 + $0x170] ss:$36 sps:$4 sm:$0xff]  }
 0x158   : > { %7628 = vst [vmem:[#allocation2 + $0xa0] sm:$0xff] %v7427_v22   ;;  %v7442_v30 = vpack.c.bf16 %v1189_v25, %v1188_v20  ;;  %v8725_v2 = vld [vmem:[#allocation3 + $0x28c] ss:$36 sps:$4 sm:$0xff]   ;;  %v8727_v3 = vld [vmem:[#allocation3 + $0x1bc] ss:$36 sps:$4 sm:$0xff]  }
 0x159   : > { %v7437_v43 = vpack.c.bf16 %v1187_v31, %v1186_v24  ;;  %v9514_v48 = vpop.f32.mrf.mxu0  ;;  %v8729_v25 = vld [vmem:[#allocation3 + $0x288] ss:$36 sps:$4 sm:$0xff]   ;;  %v8730_v26 = vld [vmem:[#allocation3 + $0x1b8] ss:$36 sps:$4 sm:$0xff]  }
 0x15a   : > { %v1740_v36 = vld [vmem:[#allocation2 + $0x88] sm:$0xf]  ;;  %v1741_v37 = vld [vmem:[#allocation2 + $0x8c] sm:$0xf]  ;;  %7631 = vst [vmem:[#allocation2 + $0xb8] sm:$0xff] %v7442_v30  }
 0x15b   : > { %v1916_v38 = vld [vmem:[#allocation2 + $0x88] sm:$0xf]  ;;  %1748 = vst [vmem:[#allocation3 + $0x320] sm:$0xf] %v1740_v36  ;;  %1749 = vst [vmem:[#allocation3 + $0x344] sm:$0xf] %v1741_v37  ;;  %3718 = vmatmul.mubr.bf16.gmra.mxu1 %v8715_v27  ;;  %3855 = vmatmul.mubr.bf16.gmra.mxu0 %v8716_v33  ;;  %v9516_v53 = vpop.f32.mrf.mxu0 }
 0x15c   : > { %v1917_v44 = vld [vmem:[#allocation2 + $0x8c] sm:$0xf]  ;;  %1924 = vst [vmem:[#allocation3 + $0x20c] sm:$0xf] %v1916_v38  ;;  %v2092_v45 = vld [vmem:[#allocation2 + $0x88] sm:$0xf]  ;;  %3725 = vmatprep.mubr.bf16.mxu1 %v8717_v29  ;;  %3862 = vmatprep.mubr.bf16.mxu0 %v8719_v34 }
 0x15d   : > { %v2093_v46 = vld [vmem:[#allocation2 + $0x8c] sm:$0xf]  ;;  %1925 = vst [vmem:[#allocation3 + $0x230] sm:$0xf] %v1917_v44  ;;  %2100 = vst [vmem:[#allocation3 + $0xf8] sm:$0xf] %v2092_v45  ;;  %v9518_v62 = vpop.f32.mrf.mxu0 }
 0x15e   : > { %2101 = vst [vmem:[#allocation3 + $0x11c] sm:$0xf] %v2093_v46  ;;  %v1676_v49 = vld [vmem:[#allocation2 + $0x80] sm:$0xf]  ;;  %v1677_v50 = vld [vmem:[#allocation2 + $0x84] sm:$0xf] }
 0x15f   : > { %v1738_v40 = vld [vmem:[#allocation2 + $0x80] sm:$0xf]  ;;  %7630 = vst [vmem:[#allocation2 + $0xb0] sm:$0xff] %v7437_v43   ;;  %v1739_v51 = vld [vmem:[#allocation2 + $0x84] sm:$0xf]  ;;  %v9520_v9 = vpop.f32.mrf.mxu0 }
 0x160   : > { %v1852_v47 = vld [vmem:[#allocation2 + $0x80] sm:$0xf]  ;;  %v1853_v52 = vld [vmem:[#allocation2 + $0x84] sm:$0xf]  ;;  %1684 = vst [vmem:[#allocation3 + $0x31c] sm:$0xf] %v1676_v49 }
 0x161   : > { %1685 = vst [vmem:[#allocation3 + $0x340] sm:$0xf] %v1677_v50  ;;  %1746 = vst [vmem:[#allocation3 + $0x2d8] sm:$0xf] %v1738_v40  ;;  %v1914_v54 = vld [vmem:[#allocation2 + $0x80] sm:$0xf]  ;;  %v9522_v15 = vpop.f32.mrf.mxu0 }
 0x162   : > { %v1915_v55 = vld [vmem:[#allocation2 + $0x84] sm:$0xf]  ;;  %v2028_v56 = vld [vmem:[#allocation2 + $0x80] sm:$0xf]  ;;  %1747 = vst [vmem:[#allocation3 + $0x2fc] sm:$0xf] %v1739_v51 }
 0x163   : > { %1860 = vst [vmem:[#allocation3 + $0x208] sm:$0xf] %v1852_v47  ;;  %1861 = vst [vmem:[#allocation3 + $0x22c] sm:$0xf] %v1853_v52  ;;  %v2029_v57 = vld [vmem:[#allocation2 + $0x84] sm:$0xf]  ;;  %3726 = vmatmul.mubr.bf16.gmra.mxu1 %v8722_v60  ;;  %3863 = vmatmul.mubr.bf16.gmra.mxu0 %v8723_v61  ;;  %v9524_v42 = vpop.f32.mrf.mxu0 }
 0x164   : > { %v2090_v58 = vld [vmem:[#allocation2 + $0x80] sm:$0xf]  ;;  %v2091_v59 = vld [vmem:[#allocation2 + $0x84] sm:$0xf]  ;;  %1922 = vst [vmem:[#allocation3 + $0x1c4] sm:$0xf] %v1914_v54  ;;  %3733 = vmatprep.mubr.bf16.mxu1 %v8725_v2  ;;  %3870 = vmatprep.mubr.bf16.mxu0 %v8727_v3 }
 0x165   : > { %1923 = vst [vmem:[#allocation3 + $0x1e8] sm:$0xf] %v1915_v55  ;;  %2036 = vst [vmem:[#allocation3 + $0xf4] sm:$0xf] %v2028_v56  ;;  %v1624_v63 = vld [vmem:[#allocation2 + $0x98] sm:$0xf]  ;;  %v9526_v27 = vpop.f32.mrf.mxu0 }
 0x166   : > { %2037 = vst [vmem:[#allocation3 + $0x118] sm:$0xf] %v2029_v57  ;;  %2098 = vst [vmem:[#allocation3 + $0xb0] sm:$0xf] %v2090_v58  ;;  %v1625_v0 = vld [vmem:[#allocation2 + $0x9c] sm:$0xf] }
 0x167   : > { %2099 = vst [vmem:[#allocation3 + $0xd4] sm:$0xf] %v2091_v59  ;;  %v1686_v1 = vld [vmem:[#allocation2 + $0x98] sm:$0xf]  ;;  %1632 = vst [vmem:[#allocation3 + $0x3a8] sm:$0xf] %v1624_v63  ;;  %v9528_v37 = vpop.f32.mrf.mxu0 }
 0x168   : > { %1633 = vst [vmem:[#allocation3 + $0x3cc] sm:$0xf] %v1625_v0  ;;  %v1687_v4 = vld [vmem:[#allocation2 + $0x9c] sm:$0xf]  ;;  %1694 = vst [vmem:[#allocation3 + $0x364] sm:$0xf] %v1686_v1 }
 0x169   : > { %v1800_v5 = vld [vmem:[#allocation2 + $0x98] sm:$0xf]  ;;  %v1801_v8 = vld [vmem:[#allocation2 + $0x9c] sm:$0xf]  ;;  %1695 = vst [vmem:[#allocation3 + $0x388] sm:$0xf] %v1687_v4  ;;  %v9530_v50 = vpop.f32.mrf.mxu0 }
 0x16a   : > { %1808 = vst [vmem:[#allocation3 + $0x294] sm:$0xf] %v1800_v5  ;;  %1809 = vst [vmem:[#allocation3 + $0x2b8] sm:$0xf] %v1801_v8  ;;  %v1862_v10 = vld [vmem:[#allocation2 + $0x98] sm:$0xf] }
 0x16b   : > { %v1863_v7 = vld [vmem:[#allocation2 + $0x9c] sm:$0xf]  ;;  %v1976_v11 = vld [vmem:[#allocation2 + $0x98] sm:$0xf]  ;;  %1870 = vst [vmem:[#allocation3 + $0x250] sm:$0xf] %v1862_v10  ;;  %3734 = vmatmul.mubr.bf16.gmra.mxu1 %v8729_v25  ;;  %3871 = vmatmul.mubr.bf16.gmra.mxu0 %v8730_v26  ;;  %v9532_v56 = vpop.f32.mrf.mxu0  ;;  %v1072_v25 = vadd.f32 %v9500_v6, %v9518_v62  ;;  %v1067_v62 = vadd.f32 %v9500_v6, %v9524_v42 }
 0x16c   : > { %1871 = vst [vmem:[#allocation3 + $0x274] sm:$0xf] %v1863_v7  ;;  %v1977_v12 = vld [vmem:[#allocation2 + $0x9c] sm:$0xf]  ;;  %1984 = vst [vmem:[#allocation3 + $0x180] sm:$0xf] %v1976_v11  ;;  %v1091_v42 = vadd.f32 %v9500_v6, %v9530_v50 }
 0x16d   : > { %v2038_v13 = vld [vmem:[#allocation2 + $0x98] sm:$0xf]  ;;  %v2039_v14 = vld [vmem:[#allocation2 + $0x9c] sm:$0xf]  ;;  %1985 = vst [vmem:[#allocation3 + $0x1a4] sm:$0xf] %v1977_v12  ;;  %v9534_v0 = vpop.f32.mrf.mxu0 }
 0x16e   : > { %2046 = vst [vmem:[#allocation3 + $0x13c] sm:$0xf] %v2038_v13  ;;  %2047 = vst [vmem:[#allocation3 + $0x160] sm:$0xf] %v2039_v14  ;;  %v1622_v16 = vld [vmem:[#allocation2 + $0x90] sm:$0xf] }
 0x16f   : > { %v1623_v17 = vld [vmem:[#allocation2 + $0x94] sm:$0xf]  ;;  %v1798_v18 = vld [vmem:[#allocation2 + $0x90] sm:$0xf]  ;;  %1630 = vst [vmem:[#allocation3 + $0x360] sm:$0xf] %v1622_v16  ;;  %v9536_v10 = vpop.f32.mrf.mxu0 }
 0x170   : > { %v1799_v32 = vld [vmem:[#allocation2 + $0x94] sm:$0xf]  ;;  %v1974_v41 = vld [vmem:[#allocation2 + $0x90] sm:$0xf]  ;;  %1631 = vst [vmem:[#allocation3 + $0x384] sm:$0xf] %v1623_v17 }
 0x171   : > { %v1975_v39 = vld [vmem:[#allocation2 + $0x94] sm:$0xf]  ;;  %1806 = vst [vmem:[#allocation3 + $0x24c] sm:$0xf] %v1798_v18  ;;  %1807 = vst [vmem:[#allocation3 + $0x270] sm:$0xf] %v1799_v32  ;;  %v9538_v17 = vpop.f32.mrf.mxu0 }
 0x172   : > { %1982 = vst [vmem:[#allocation3 + $0x138] sm:$0xf] %v1974_v41  ;;  %1983 = vst [vmem:[#allocation3 + $0x15c] sm:$0xf] %v1975_v39  ;;  %v1628_v19 = vld [vmem:[#allocation2 + $0xa8] sm:$0xf]  ;;  %v1056_v39 = vadd.f32 %v9500_v6, %v9510_v28 }
 0x173   : > { %v1629_v20 = vld [vmem:[#allocation2 + $0xac] sm:$0xf]  ;;  %v1690_v21 = vld [vmem:[#allocation2 + $0xa8] sm:$0xf]  ;;  %1636 = vst [vmem:[#allocation3 + $0x438] sm:$0xf] %v1628_v19  ;;  %v1048_v19 = vadd.f32 %v9500_v6, %v9512_v35  ;;  %v1098_v26 = vpop.f32.mrf.mxu0  ;;  %v1064_v35 = vadd.f32 %v9500_v6, %v9520_v9 }
 0x174   : > { %1637 = vst [vmem:[#allocation3 + $0x45c] sm:$0xf] %v1629_v20  ;;  %v1691_v22 = vld [vmem:[#allocation2 + $0xac] sm:$0xf]  ;;  %1698 = vst [vmem:[#allocation3 + $0x3f4] sm:$0xf] %v1690_v21  ;;  %v1059_v20 = vadd.f32 %v9500_v6, %v9514_v48  ;;  %v1051_v21 = vadd.f32 %v9500_v6, %v9516_v53 }
 0x175   : > { %v1752_v23 = vld [vmem:[#allocation2 + $0xa8] sm:$0xf]  ;;  %v1753_v24 = vld [vmem:[#allocation2 + $0xac] sm:$0xf]  ;;  %1699 = vst [vmem:[#allocation3 + $0x418] sm:$0xf] %v1691_v22 }
 0x176   : > { %1760 = vst [vmem:[#allocation3 + $0x3b0] sm:$0xf] %v1752_v23  ;;  %1761 = vst [vmem:[#allocation3 + $0x3d4] sm:$0xf] %v1753_v24  ;;  %v1804_v29 = vld [vmem:[#allocation2 + $0xa8] sm:$0xf] }
 0x177   : > { %v1805_v30 = vld [vmem:[#allocation2 + $0xac] sm:$0xf]  ;;  %v1866_v31 = vld [vmem:[#allocation2 + $0xa8] sm:$0xf]  ;;  %1812 = vst [vmem:[#allocation3 + $0x324] sm:$0xf] %v1804_v29 }
 0x178   : > { %1813 = vst [vmem:[#allocation3 + $0x348] sm:$0xf] %v1805_v30  ;;  %v1867_v33 = vld [vmem:[#allocation2 + $0xac] sm:$0xf]  ;;  %1874 = vst [vmem:[#allocation3 + $0x2e0] sm:$0xf] %v1866_v31 }
 0x179   : > { %v1928_v34 = vld [vmem:[#allocation2 + $0xa8] sm:$0xf]  ;;  %v1929_v36 = vld [vmem:[#allocation2 + $0xac] sm:$0xf]  ;;  %1875 = vst [vmem:[#allocation3 + $0x304] sm:$0xf] %v1867_v33  ;;  %v1075_v33 = vadd.f32 %v9500_v6, %v9522_v15  ;;  %v1080_v15 = vadd.f32 %v9500_v6, %v9528_v37 }
 0x17a   : > { %1936 = vst [vmem:[#allocation3 + $0x29c] sm:$0xf] %v1928_v34  ;;  %1937 = vst [vmem:[#allocation3 + $0x2c0] sm:$0xf] %v1929_v36  ;;  %v1980_v38 = vld [vmem:[#allocation2 + $0xa8] sm:$0xf]  ;;  %v1088_v34 = vadd.f32 %v9500_v6, %v9526_v27  ;;  %v8473_v36 = vpop.f32.mrf.mxu0  ;;  %v1083_v27 = vadd.f32 %v9500_v6, %v9532_v56 }
 0x17b   : > { %v1981_v43 = vld [vmem:[#allocation2 + $0xac] sm:$0xf]  ;;  %v2042_v44 = vld [vmem:[#allocation2 + $0xa8] sm:$0xf]  ;;  %1988 = vst [vmem:[#allocation3 + $0x210] sm:$0xf] %v1980_v38 }
 0x17c   : > { %1989 = vst [vmem:[#allocation3 + $0x234] sm:$0xf] %v1981_v43  ;;  %v2043_v45 = vld [vmem:[#allocation2 + $0xac] sm:$0xf]  ;;  %2050 = vst [vmem:[#allocation3 + $0x1cc] sm:$0xf] %v2042_v44 }
 0x17d   : > { %v2104_v46 = vld [vmem:[#allocation2 + $0xa8] sm:$0xf]  ;;  %v2105_v49 = vld [vmem:[#allocation2 + $0xac] sm:$0xf]  ;;  %2051 = vst [vmem:[#allocation3 + $0x1f0] sm:$0xf] %v2043_v45 }
 0x17e   : > { %2112 = vst [vmem:[#allocation3 + $0x188] sm:$0xf] %v2104_v46  ;;  %2113 = vst [vmem:[#allocation3 + $0x1ac] sm:$0xf] %v2105_v49  ;;  %v1626_v40 = vld [vmem:[#allocation2 + $0xa0] sm:$0xf] }
 0x17f   : > { %v1627_v51 = vld [vmem:[#allocation2 + $0xa4] sm:$0xf]  ;;  %v1688_v47 = vld [vmem:[#allocation2 + $0xa0] sm:$0xf]  ;;  %1634 = vst [vmem:[#allocation3 + $0x3f0] sm:$0xf] %v1626_v40  ;;  %v1111_v40 = vpop.f32.mrf.mxu0 }
 0x180   : > { %v1689_v52 = vld [vmem:[#allocation2 + $0xa4] sm:$0xf]  ;;  %v1750_v54 = vld [vmem:[#allocation2 + $0xa0] sm:$0xf]  ;;  %1635 = vst [vmem:[#allocation3 + $0x414] sm:$0xf] %v1627_v51 }
 0x181   : > { %v1751_v55 = vld [vmem:[#allocation2 + $0xa4] sm:$0xf]  ;;  %1696 = vst [vmem:[#allocation3 + $0x3ac] sm:$0xf] %v1688_v47  ;;  %v1802_v57 = vld [vmem:[#allocation2 + $0xa0] sm:$0xf] }
 0x182   : > { %v1803_v58 = vld [vmem:[#allocation2 + $0xa4] sm:$0xf]  ;;  %v1864_v59 = vld [vmem:[#allocation2 + $0xa0] sm:$0xf]  ;;  %1697 = vst [vmem:[#allocation3 + $0x3d0] sm:$0xf] %v1689_v52 }
 0x183   : > { %1758 = vst [vmem:[#allocation3 + $0x368] sm:$0xf] %v1750_v54  ;;  %1759 = vst [vmem:[#allocation3 + $0x38c] sm:$0xf] %v1751_v55  ;;  %v1865_v60 = vld [vmem:[#allocation2 + $0xa4] sm:$0xf] }
 0x184   : > { %v1926_v61 = vld [vmem:[#allocation2 + $0xa0] sm:$0xf]  ;;  %v1927_v63 = vld [vmem:[#allocation2 + $0xa4] sm:$0xf]  ;;  %1810 = vst [vmem:[#allocation3 + $0x2dc] sm:$0xf] %v1802_v57  ;;  %v1104_v57 = vadd.f32 %v9500_v6, %v9534_v0  ;;  %v1099_v0 = vadd.f32 %v9500_v6, %v1098_v26 }
 0x185   : > { %1811 = vst [vmem:[#allocation3 + $0x300] sm:$0xf] %v1803_v58  ;;  %1872 = vst [vmem:[#allocation3 + $0x298] sm:$0xf] %v1864_v59  ;;  %v1978_v1 = vld [vmem:[#allocation2 + $0xa0] sm:$0xf] }
 0x186   : > { %v1979_v2 = vld [vmem:[#allocation2 + $0xa4] sm:$0xf]  ;;  %v2040_v3 = vld [vmem:[#allocation2 + $0xa0] sm:$0xf]  ;;  %1873 = vst [vmem:[#allocation3 + $0x2bc] sm:$0xf] %v1865_v60  ;;  %v9566_v60 = vpop.f32.mrf.mxu0 }
 0x187   : > { %1934 = vst [vmem:[#allocation3 + $0x254] sm:$0xf] %v1926_v61  ;;  %1935 = vst [vmem:[#allocation3 + $0x278] sm:$0xf] %v1927_v63  ;;  %v2041_v4 = vld [vmem:[#allocation2 + $0xa4] sm:$0xf]  ;;  %v1096_v61 = vadd.f32 %v9500_v6, %v9536_v10  ;;  %v1107_v63 = vadd.f32 %v9500_v6, %v9538_v17  ;;  %v9579_v10 = vadd.f32 %v9500_v6, %v1111_v40 }
 0x188   : > { %v2102_v5 = vld [vmem:[#allocation2 + $0xa0] sm:$0xf]  ;;  %v2103_v8 = vld [vmem:[#allocation2 + $0xa4] sm:$0xf]  ;;  %1986 = vst [vmem:[#allocation3 + $0x1c8] sm:$0xf] %v1978_v1 }
 0x189   : > { %1987 = vst [vmem:[#allocation3 + $0x1ec] sm:$0xf] %v1979_v2  ;;  %2048 = vst [vmem:[#allocation3 + $0x184] sm:$0xf] %v2040_v3  ;;  %v1756_v7 = vld [vmem:[#allocation2 + $0xb8] sm:$0xf] }
 0x18a   : > { %2049 = vst [vmem:[#allocation3 + $0x1a8] sm:$0xf] %v2041_v4  ;;  %2110 = vst [vmem:[#allocation3 + $0x140] sm:$0xf] %v2102_v5  ;;  %v1757_v11 = vld [vmem:[#allocation2 + $0xbc] sm:$0xf]  ;;  %v9573_v5 = vpop.f32.mrf.mxu0 }
 0x18b   : > { %2111 = vst [vmem:[#allocation3 + $0x164] sm:$0xf] %v2103_v8  ;;  %v1932_v12 = vld [vmem:[#allocation2 + $0xb8] sm:$0xf]  ;;  %1764 = vst [vmem:[#allocation3 + $0x440] sm:$0xf] %v1756_v7 }
 0x18c   : > { %1765 = vst [vmem:[#allocation3 + $0x464] sm:$0xf] %v1757_v11  ;;  %v1933_v13 = vld [vmem:[#allocation2 + $0xbc] sm:$0xf]  ;;  %1940 = vst [vmem:[#allocation3 + $0x32c] sm:$0xf] %v1932_v12  ;;  %v9576_v11 = vadd.f32 %v9500_v6, %v8473_v36 }
 0x18d   : > { %v2108_v14 = vld [vmem:[#allocation2 + $0xb8] sm:$0xf]  ;;  %v2109_v16 = vld [vmem:[#allocation2 + $0xbc] sm:$0xf]  ;;  %1941 = vst [vmem:[#allocation3 + $0x350] sm:$0xf] %v1933_v13 }
 0x18e   : > { %2116 = vst [vmem:[#allocation3 + $0x218] sm:$0xf] %v2108_v14  ;;  %2117 = vst [vmem:[#allocation3 + $0x23c] sm:$0xf] %v2109_v16  ;;  %v1692_v18 = vld [vmem:[#allocation2 + $0xb0] sm:$0xf] }
 0x18f   : > { %v1693_v32 = vld [vmem:[#allocation2 + $0xb4] sm:$0xf]  ;;  %v1754_v41 = vld [vmem:[#allocation2 + $0xb0] sm:$0xf]  ;;  %1700 = vst [vmem:[#allocation3 + $0x43c] sm:$0xf] %v1692_v18 }
 0x190   : > { %v1755_v22 = vld [vmem:[#allocation2 + $0xb4] sm:$0xf]  ;;  %v1868_v23 = vld [vmem:[#allocation2 + $0xb0] sm:$0xf]  ;;  %1701 = vst [vmem:[#allocation3 + $0x460] sm:$0xf] %v1693_v32 }
 0x191   : > { %v1869_v24 = vld [vmem:[#allocation2 + $0xb4] sm:$0xf]  ;;  %1762 = vst [vmem:[#allocation3 + $0x3f8] sm:$0xf] %v1754_v41  ;;  %v1930_v28 = vld [vmem:[#allocation2 + $0xb0] sm:$0xf] }
 0x192   : > { %v1931_v29 = vld [vmem:[#allocation2 + $0xb4] sm:$0xf]  ;;  %v2044_v30 = vld [vmem:[#allocation2 + $0xb0] sm:$0xf]  ;;  %1763 = vst [vmem:[#allocation3 + $0x41c] sm:$0xf] %v1755_v22 }
 0x193   : > { %1876 = vst [vmem:[#allocation3 + $0x328] sm:$0xf] %v1868_v23  ;;  %1877 = vst [vmem:[#allocation3 + $0x34c] sm:$0xf] %v1869_v24  ;;  %v2045_v48 = vld [vmem:[#allocation2 + $0xb4] sm:$0xf] }
 0x194   : > { %v2106_v53 = vld [vmem:[#allocation2 + $0xb0] sm:$0xf]  ;;  %v2107_v31 = vld [vmem:[#allocation2 + $0xb4] sm:$0xf]  ;;  %1938 = vst [vmem:[#allocation3 + $0x2e4] sm:$0xf] %v1930_v28 }
 0x195   : > { %1939 = vst [vmem:[#allocation3 + $0x308] sm:$0xf] %v1931_v29  ;;  %2052 = vst [vmem:[#allocation3 + $0x214] sm:$0xf] %v2044_v30  ;;  %v1192_v9 = vmax.f32 %v1056_v39, 0.0  ;;  %v1190_v38 = vmax.f32 %v1048_v19, 0.0  ;;  %v9581_v39 = vpop.f32.mrf.mxu0 }
 0x196   : > { %2053 = vst [vmem:[#allocation3 + $0x238] sm:$0xf] %v2045_v48  ;;  %2114 = vst [vmem:[#allocation3 + $0x1d0] sm:$0xf] %v2106_v53  ;;  %v1193_v43 = vmax.f32 %v1059_v20, 0.0  ;;  %v1191_v44 = vmax.f32 %v1051_v21, 0.0 }
 0x197   : > { %2115 = vst [vmem:[#allocation3 + $0x1f4] sm:$0xf] %v2107_v31  ;;  %v8731_v45 = vld [vmem:[#allocation3 + $0x2d4] ss:$36 sps:$4 sm:$0xff]   ;;  %v8733_v46 = vld [vmem:[#allocation3 + $0x204] ss:$36 sps:$4 sm:$0xff]   ;;  %v1127_v31 = vpop.f32.mrf.mxu0 }
 0x198   : > { %v1196_v49 = vmax.f32 %v1072_v25, 0.0  ;;  %v7452_v51 = vpack.c.bf16 %v1193_v43, %v1192_v9  ;;  %v7447_v47 = vpack.c.bf16 %v1191_v44, %v1190_v38  ;;  %v8736_v52 = vld [vmem:[#allocation3 + $0x2d0] ss:$36 sps:$4 sm:$0xff]   ;;  %v8737_v54 = vld [vmem:[#allocation3 + $0x200] ss:$36 sps:$4 sm:$0xff]   ;;  %v1194_v55 = vmax.f32 %v1064_v35, 0.0  ;;  %3741 = vmatprep.mubr.bf16.mxu1 %v8731_v45  ;;  %3878 = vmatprep.mubr.bf16.mxu0 %v8733_v46 }
 0x199   : > { %v8739_v58 = vld [vmem:[#allocation3 + $0x31c] ss:$36 sps:$4 sm:$0xff]   ;;  %v1197_v59 = vmax.f32 %v1075_v33, 0.0  ;;  %v1195_v37 = vmax.f32 %v1067_v62, 0.0  ;;  %3742 = vmatmul.mubr.bf16.gmra.mxu1 %v8736_v52  ;;  %3879 = vmatmul.mubr.bf16.gmra.mxu0 %v8737_v54  ;;  %v8741_v50 = vld [vmem:[#allocation3 + $0x24c] ss:$36 sps:$4 sm:$0xff]  }
 0x19a   : > { %7633 = vst [vmem:[#allocation2 + $0xc8] sm:$0xff] %v7452_v51   ;;  %7632 = vst [vmem:[#allocation2 + $0xc0] sm:$0xff] %v7447_v47   ;;  %v1200_v56 = vmax.f32 %v1088_v34, 0.0  ;;  %3749 = vmatprep.mubr.bf16.mxu1 %v8739_v58  ;;  %v1198_v3 = vmax.f32 %v1080_v15, 0.0  ;;  %v1201_v4 = vmax.f32 %v1091_v42, 0.0  ;;  %3886 = vmatprep.mubr.bf16.mxu0 %v8741_v50  ;;  %v1199_v8 = vmax.f32 %v1083_v27, 0.0  ;;  %v8478_v47 = vpop.f32.mrf.mxu0 }
 0x19b   : > { %v7462_v1 = vpack.c.bf16 %v1197_v59, %v1196_v49  ;;  %v7457_v2 = vpack.c.bf16 %v1195_v37, %v1194_v55  ;;  %v1204_v7 = vmax.f32 %v1104_v57, 0.0  ;;  %v8743_v13 = vld [vmem:[#allocation3 + $0x318] ss:$36 sps:$4 sm:$0xff]   ;;  %v8744_v14 = vld [vmem:[#allocation3 + $0x248] ss:$36 sps:$4 sm:$0xff]   ;;  %v1202_v17 = vmax.f32 %v1096_v61, 0.0 }
 0x19c   : > { %v7472_v12 = vpack.c.bf16 %v1201_v4, %v1200_v56  ;;  %v7467_v16 = vpack.c.bf16 %v1199_v8, %v1198_v3  ;;  %v1205_v18 = vmax.f32 %v1107_v63, 0.0  ;;  %v8745_v32 = vld [vmem:[#allocation3 + $0x364] ss:$36 sps:$4 sm:$0xff]   ;;  %v1203_v41 = vmax.f32 %v1099_v0, 0.0  ;;  %v8747_v19 = vld [vmem:[#allocation3 + $0x294] ss:$36 sps:$4 sm:$0xff]  }
 0x19d   : > { %7635 = vst [vmem:[#allocation2 + $0xd8] sm:$0xff] %v7462_v1   ;;  %7634 = vst [vmem:[#allocation2 + $0xd0] sm:$0xff] %v7457_v2   ;;  %v1208_v21 = vmax.f32 %v9576_v11, 0.0  ;;  %v1206_v22 = vmax.f32 %v9579_v10, 0.0  ;;  %v8750_v46 = vld [vmem:[#allocation3 + $0x360] ss:$36 sps:$4 sm:$0xff]   ;;  %v1123_v37 = vadd.f32 %v9500_v6, %v9566_v60  ;;  %v1115_v50 = vadd.f32 %v9500_v6, %v9573_v5  ;;  %v1130_v5 = vpop.f32.mrf.mxu0 }
 0x19e   : > { %7637 = vst [vmem:[#allocation2 + $0xe8] sm:$0xff] %v7472_v12   ;;  %7636 = vst [vmem:[#allocation2 + $0xe0] sm:$0xff] %v7467_v16   ;;  %v7482_v20 = vpack.c.bf16 %v1205_v18, %v1204_v7  ;;  %v7477_v26 = vpack.c.bf16 %v1203_v41, %v1202_v17  ;;  %v8751_v49 = vld [vmem:[#allocation3 + $0x290] ss:$36 sps:$4 sm:$0xff]   ;;  %v8758_v51 = vld [vmem:[#allocation3 + $0x2dc] ss:$36 sps:$4 sm:$0xff]   ;;  %v1136_v0 = vadd.f32 %v9500_v6, %v9581_v39 }
 0x19f   : > { %v8754_v40 = vld [vmem:[#allocation3 + $0x3ac] ss:$36 sps:$4 sm:$0xff]   ;;  %v1128_v60 = vadd.f32 %v9500_v6, %v1127_v31  ;;  %v1139_v4 = vadd.f32 %v9500_v6, %v8478_v47  ;;  %v1207_v16 = vmax.f32 %v1115_v50, 0.0  ;;  %v8756_v18 = vld [vmem:[#allocation3 + $0x2d8] ss:$36 sps:$4 sm:$0xff]   ;;  %v8813_v47 = vld [vmem:[%s10635_s3 + $0x180] sm:$0xff]  }
 0x1a0   : > { %7639 = vst [vmem:[#allocation2 + $0xf8] sm:$0xff] %v7482_v20   ;;  %7638 = vst [vmem:[#allocation2 + $0xf0] sm:$0xff] %v7477_v26   ;;  %v1212_v17 = vmax.f32 %v1136_v0, 0.0  ;;  %v8760_v20 = vld [vmem:[#allocation3 + $0x3a8] ss:$36 sps:$4 sm:$0xff]  }
 0x1a1   : > { %v1816_v23 = vld [vmem:[#allocation2 + $0xc8] sm:$0xf]  ;;  %v1817_v24 = vld [vmem:[#allocation2 + $0xcc] sm:$0xf]  ;;  %3750 = vmatmul.mubr.bf16.gmra.mxu1 %v8743_v13  ;;  %3887 = vmatmul.mubr.bf16.gmra.mxu0 %v8744_v14  ;;  %v1814_v53 = vld [vmem:[#allocation2 + $0xc0] sm:$0xf]  ;;  %v1131_v13 = vadd.f32 %v9500_v6, %v1130_v5  ;;  %v7487_v41 = vpack.c.bf16 %v1207_v16, %v1206_v22 }
 0x1a2   : > { %v1878_v25 = vld [vmem:[#allocation2 + $0xc8] sm:$0xf]  ;;  %1824 = vst [vmem:[#allocation3 + $0x3b4] sm:$0xf] %v1816_v23  ;;  %1825 = vst [vmem:[#allocation3 + $0x3d8] sm:$0xf] %v1817_v24  ;;  %3757 = vmatprep.mubr.bf16.mxu1 %v8745_v32  ;;  %3894 = vmatprep.mubr.bf16.mxu0 %v8747_v19 }
 0x1a3   : > { %v1879_v28 = vld [vmem:[#allocation2 + $0xcc] sm:$0xf]  ;;  %1886 = vst [vmem:[#allocation3 + $0x370] sm:$0xf] %v1878_v25  ;;  %v1992_v29 = vld [vmem:[#allocation2 + $0xc8] sm:$0xf] }
 0x1a4   : > { %v1993_v30 = vld [vmem:[#allocation2 + $0xcc] sm:$0xf]  ;;  %1887 = vst [vmem:[#allocation3 + $0x394] sm:$0xf] %v1879_v28  ;;  %2000 = vst [vmem:[#allocation3 + $0x2a0] sm:$0xf] %v1992_v29 }
 0x1a5   : > { %2001 = vst [vmem:[#allocation3 + $0x2c4] sm:$0xf] %v1993_v30  ;;  %v2054_v35 = vld [vmem:[#allocation2 + $0xc8] sm:$0xf]  ;;  %v2055_v48 = vld [vmem:[#allocation2 + $0xcc] sm:$0xf] }
 0x1a6   : > { %2062 = vst [vmem:[#allocation3 + $0x25c] sm:$0xf] %v2054_v35  ;;  %2063 = vst [vmem:[#allocation3 + $0x280] sm:$0xf] %v2055_v48  ;;  %v1815_v33 = vld [vmem:[#allocation2 + $0xc4] sm:$0xf] }
 0x1a7   : > { %v1990_v62 = vld [vmem:[#allocation2 + $0xc0] sm:$0xf]  ;;  %v1991_v34 = vld [vmem:[#allocation2 + $0xc4] sm:$0xf]  ;;  %1822 = vst [vmem:[#allocation3 + $0x36c] sm:$0xf] %v1814_v53 }
 0x1a8   : > { %1823 = vst [vmem:[#allocation3 + $0x390] sm:$0xf] %v1815_v33  ;;  %1998 = vst [vmem:[#allocation3 + $0x258] sm:$0xf] %v1990_v62  ;;  %v1820_v36 = vld [vmem:[#allocation2 + $0xd8] sm:$0xf] }
 0x1a9   : > { %1999 = vst [vmem:[#allocation3 + $0x27c] sm:$0xf] %v1991_v34  ;;  %v1821_v9 = vld [vmem:[#allocation2 + $0xdc] sm:$0xf]  ;;  %v1882_v38 = vld [vmem:[#allocation2 + $0xd8] sm:$0xf]  ;;  %3758 = vmatmul.mubr.bf16.gmra.mxu1 %v8750_v46  ;;  %3895 = vmatmul.mubr.bf16.gmra.mxu0 %v8751_v49 }
 0x1aa   : > { %1828 = vst [vmem:[#allocation3 + $0x444] sm:$0xf] %v1820_v36  ;;  %1829 = vst [vmem:[#allocation3 + $0x468] sm:$0xf] %v1821_v9  ;;  %v1883_v43 = vld [vmem:[#allocation2 + $0xdc] sm:$0xf]  ;;  %3765 = vmatprep.mubr.bf16.mxu1 %v8754_v40  ;;  %3902 = vmatprep.mubr.bf16.mxu0 %v8758_v51 }
 0x1ab   : > { %1890 = vst [vmem:[#allocation3 + $0x400] sm:$0xf] %v1882_v38  ;;  %v1944_v44 = vld [vmem:[#allocation2 + $0xd8] sm:$0xf]  ;;  %v1945_v45 = vld [vmem:[#allocation2 + $0xdc] sm:$0xf] }
 0x1ac   : > { %1891 = vst [vmem:[#allocation3 + $0x424] sm:$0xf] %v1883_v43  ;;  %1952 = vst [vmem:[#allocation3 + $0x3bc] sm:$0xf] %v1944_v44  ;;  %v1996_v15 = vld [vmem:[#allocation2 + $0xd8] sm:$0xf] }
 0x1ad   : > { %1953 = vst [vmem:[#allocation3 + $0x3e0] sm:$0xf] %v1945_v45  ;;  %v1997_v42 = vld [vmem:[#allocation2 + $0xdc] sm:$0xf]  ;;  %v2058_v27 = vld [vmem:[#allocation2 + $0xd8] sm:$0xf] }
 0x1ae   : > { %2004 = vst [vmem:[#allocation3 + $0x330] sm:$0xf] %v1996_v15  ;;  %2005 = vst [vmem:[#allocation3 + $0x354] sm:$0xf] %v1997_v42  ;;  %v2059_v52 = vld [vmem:[#allocation2 + $0xdc] sm:$0xf] }
 0x1af   : > { %2066 = vst [vmem:[#allocation3 + $0x2ec] sm:$0xf] %v2058_v27  ;;  %v2120_v54 = vld [vmem:[#allocation2 + $0xd8] sm:$0xf]  ;;  %v2121_v55 = vld [vmem:[#allocation2 + $0xdc] sm:$0xf] }
 0x1b0   : > { %2067 = vst [vmem:[#allocation3 + $0x310] sm:$0xf] %v2059_v52  ;;  %2128 = vst [vmem:[#allocation3 + $0x2a8] sm:$0xf] %v2120_v54  ;;  %v1818_v57 = vld [vmem:[#allocation2 + $0xd0] sm:$0xf] }
 0x1b1   : > { %2129 = vst [vmem:[#allocation3 + $0x2cc] sm:$0xf] %v2121_v55  ;;  %v1819_v58 = vld [vmem:[#allocation2 + $0xd4] sm:$0xf]  ;;  %v1880_v59 = vld [vmem:[#allocation2 + $0xd0] sm:$0xf]  ;;  %3766 = vmatmul.mubr.bf16.gmra.mxu1 %v8760_v20  ;;  %3903 = vmatmul.mubr.bf16.gmra.mxu0 %v8756_v18 }
 0x1b2   : > { %v1881_v56 = vld [vmem:[#allocation2 + $0xd4] sm:$0xf]  ;;  %v1942_v61 = vld [vmem:[#allocation2 + $0xd0] sm:$0xf]  ;;  %1826 = vst [vmem:[#allocation3 + $0x3fc] sm:$0xf] %v1818_v57 }
 0x1b3   : > { %v1943_v63 = vld [vmem:[#allocation2 + $0xd4] sm:$0xf]  ;;  %1827 = vst [vmem:[#allocation3 + $0x420] sm:$0xf] %v1819_v58  ;;  %1888 = vst [vmem:[#allocation3 + $0x3b8] sm:$0xf] %v1880_v59 }
 0x1b4   : > { %v1994_v1 = vld [vmem:[#allocation2 + $0xd0] sm:$0xf]  ;;  %v1995_v2 = vld [vmem:[#allocation2 + $0xd4] sm:$0xf]  ;;  %1889 = vst [vmem:[#allocation3 + $0x3dc] sm:$0xf] %v1881_v56 }
 0x1b5   : > { %v2056_v3 = vld [vmem:[#allocation2 + $0xd0] sm:$0xf]  ;;  %1950 = vst [vmem:[#allocation3 + $0x374] sm:$0xf] %v1942_v61  ;;  %1951 = vst [vmem:[#allocation3 + $0x398] sm:$0xf] %v1943_v63 }
 0x1b6   : > { %v2057_v8 = vld [vmem:[#allocation2 + $0xd4] sm:$0xf]  ;;  %v2118_v7 = vld [vmem:[#allocation2 + $0xd0] sm:$0xf]  ;;  %2002 = vst [vmem:[#allocation3 + $0x2e8] sm:$0xf] %v1994_v1 }
 0x1b7   : > { %v2119_v12 = vld [vmem:[#allocation2 + $0xd4] sm:$0xf]  ;;  %2003 = vst [vmem:[#allocation3 + $0x30c] sm:$0xf] %v1995_v2  ;;  %2064 = vst [vmem:[#allocation3 + $0x2a4] sm:$0xf] %v2056_v3 }
 0x1b8   : > { %2065 = vst [vmem:[#allocation3 + $0x2c8] sm:$0xf] %v2057_v8  ;;  %2126 = vst [vmem:[#allocation3 + $0x260] sm:$0xf] %v2118_v7  ;;  %v1209_v14 = vmax.f32 %v1123_v37, 0.0  ;;  %v1210_v39 = vmax.f32 %v1128_v60, 0.0 }
 0x1b9   : > { %2127 = vst [vmem:[#allocation3 + $0x284] sm:$0xf] %v2119_v12  ;;  %v1213_v19 = vmax.f32 %v1139_v4, 0.0  ;;  %v1211_v23 = vmax.f32 %v1131_v13, 0.0  ;;  %v8761_v24 = vld [vmem:[#allocation3 + $0x3f4] ss:$36 sps:$4 sm:$0xff]  }
 0x1ba   : > { %v7492_v32 = vpack.c.bf16 %v1209_v14, %v1208_v21  ;;  %v8765_v25 = vld [vmem:[#allocation3 + $0x324] ss:$36 sps:$4 sm:$0xff]   ;;  %7640 = vst [vmem:[#allocation2 + $0x100] sm:$0xff] %v7487_v41   ;;  %3773 = vmatprep.mubr.bf16.mxu1 %v8761_v24  ;;  %v8767_v21 = vld [vmem:[#allocation3 + $0x3f0] ss:$36 sps:$4 sm:$0xff]   ;;  %v8794_v48 = vld [vmem:[%s10635_s3 + $0x1d8] sm:$0xff]  }
 0x1bb   : > { %v7502_v6 = vpack.c.bf16 %v1213_v19, %v1212_v17  ;;  %v7497_v26 = vpack.c.bf16 %v1211_v23, %v1210_v39  ;;  %3910 = vmatprep.mubr.bf16.mxu0 %v8765_v25  ;;  %v8784_v11 = vld [vmem:[%s10635_s3 + $0x1e8] sm:$0xff]   ;;  %v8763_v10 = vld [vmem:[#allocation3 + $0x320] ss:$36 sps:$4 sm:$0xff]   ;;  %3774 = vmatmul.mubr.bf16.gmra.mxu1 %v8767_v21  ;;  %v8800_v53 = vld [vmem:[%s10635_s3 + $0x198] sm:$0xff]  }
 0x1bc   : > { %7641 = vst [vmem:[#allocation2 + $0x108] sm:$0xff] %v7492_v32   ;;  %8039 = vmatprep.subr.bf16.mxu0 %v8784_v11  ;;  %v8790_v22 = vld [vmem:[%s10635_s3 + $0x1a8] sm:$0xff]   ;;  %v8770_v28 = vld [vmem:[#allocation3 + $0x43c] ss:$36 sps:$4 sm:$0xff]   ;;  %3911 = vmatmul.mubr.bf16.gmra.mxu0 %v8763_v10  ;;  %v8779_v62 = vld [vmem:[#allocation3 + $0x3b4] ss:$36 sps:$4 sm:$0xff]  }
 0x1bd   : > { %7643 = vst [vmem:[#allocation2 + $0x118] sm:$0xff] %v7502_v6   ;;  %7642 = vst [vmem:[#allocation2 + $0x110] sm:$0xff] %v7497_v26   ;;  %v8774_v29 = vld [vmem:[#allocation3 + $0x36c] ss:$36 sps:$4 sm:$0xff]   ;;  %v8791_v30 = vld [vmem:[%s10635_s3 + $0x1e0] sm:$0xff]   ;;  %8040 = vmatpush3.bf16.msra.mxu0 %v8790_v22  ;;  %3781 = vmatprep.mubr.bf16.mxu1 %v8770_v28 }
 0x1be   : > { %v8792_v35 = vld [vmem:[%s10635_s3 + $0x1a0] sm:$0xff]   ;;  %3918 = vmatprep.mubr.bf16.mxu0 %v8774_v29  ;;  %8041 = vmatprep.subr.bf16.mxu0 %v8791_v30  ;;  %v8772_v31 = vld [vmem:[#allocation3 + $0x368] ss:$36 sps:$4 sm:$0xff]   ;;  %v8776_v33 = vld [vmem:[#allocation3 + $0x438] ss:$36 sps:$4 sm:$0xff]  }
 0x1bf   : > { %v8782_v34 = vld [vmem:[#allocation3 + $0x14] ss:$36 sps:$4 sm:$0xff]   ;;  %v8805_v38 = vld [vmem:[%s10635_s3 + $0x1c8] sm:$0xff]   ;;  %v8787_v46 = vld [vmem:[#allocation3 + $0x3fc] ss:$36 sps:$4 sm:$0xff]  }
 0x1c0   : > { %v8801_v36 = vld [vmem:[%s10635_s3 + $0x1d0] sm:$0xff]   ;;  %v8808_v43 = vld [vmem:[%s10635_s3 + $0x188] sm:$0xff]   ;;  %v8788_v49 = vld [vmem:[#allocation3 + $0x5c] ss:$36 sps:$4 sm:$0xff]  }
 0x1c1   : > { %8042 = vmatpush3.bf16.msra.mxu0 %v8792_v35  ;;  %v8802_v9 = vld [vmem:[%s10635_s3 + $0x190] sm:$0xff]   ;;  %v8812_v42 = vld [vmem:[%s10635_s3 + $0x1c0] sm:$0xff]   ;;  %v1948_v27 = vld [vmem:[#allocation2 + $0xe8] sm:$0xf] }
 0x1c2   : > { %8043 = vmatprep.subr.bf16.mxu0 %v8794_v48  ;;  %v8777_v44 = vld [vmem:[#allocation3 + $0x3b0] ss:$36 sps:$4 sm:$0xff]   ;;  %v1949_v40 = vld [vmem:[#allocation2 + $0xec] sm:$0xf]  ;;  %v2124_v51 = vld [vmem:[#allocation2 + $0xe8] sm:$0xf] }
 0x1c3   : > { %3782 = vmatmul.mubr.bf16.gmra.mxu1 %v8776_v33  ;;  %v8780_v45 = vld [vmem:[#allocation3 + $0x10] ss:$36 sps:$4 sm:$0xff]   ;;  %v8820_v52 = vld [vmem:[%s10635_s3 + $0x228] sm:$0xff]   ;;  %1956 = vst [vmem:[#allocation3 + $0x44c] sm:$0xf] %v1948_v27  ;;  %v9097_v55 = vld [vmem:[%s10635_s3 + $0x238] sm:$0xff]  }
 0x1c4   : > { %3919 = vmatmul.mubr.bf16.gmra.mxu0 %v8772_v31  ;;  %3983 = vmatprep.mubr.bf16.mxu1 %v8782_v34  ;;  %v8803_v15 = vld [vmem:[%s10635_s3 + $0x230] sm:$0xff]   ;;  %1957 = vst [vmem:[#allocation3 + $0x470] sm:$0xf] %v1949_v40  ;;  %v2125_v54 = vld [vmem:[#allocation2 + $0xec] sm:$0xf]  ;;  %v8833_v60 = vld [vmem:[%s10635_s3 + $0x220] sm:$0xff]  }
 0x1c5   : > { %8044 = vmatpush3.bf16.msra.mxu0 %v8800_v53  ;;  %3926 = vmatprep.mubr.bf16.mxu0 %v8779_v62  ;;  %2132 = vst [vmem:[#allocation3 + $0x338] sm:$0xf] %v2124_v51  ;;  %2133 = vst [vmem:[#allocation3 + $0x35c] sm:$0xf] %v2125_v54  ;;  %v1884_v57 = vld [vmem:[#allocation2 + $0xe0] sm:$0xf]  ;;  %v7715_v51 = vpop.f32.mrf.mxu1 }
 0x1c6   : > { %8045 = vmatprep.subr.bf16.mxu0 %v8801_v36  ;;  %v1885_v58 = vld [vmem:[#allocation2 + $0xe4] sm:$0xf]  ;;  %v1946_v59 = vld [vmem:[#allocation2 + $0xe0] sm:$0xf]  ;;  %1892 = vst [vmem:[#allocation3 + $0x448] sm:$0xf] %v1884_v57 }
 0x1c7   : > { %v1947_v37 = vld [vmem:[#allocation2 + $0xe4] sm:$0xf]  ;;  %v2060_v50 = vld [vmem:[#allocation2 + $0xe0] sm:$0xf]  ;;  %1893 = vst [vmem:[#allocation3 + $0x46c] sm:$0xf] %v1885_v58  ;;  %v7716_v54 = vpop.f32.mrf.mxu1 }
 0x1c8   : > { %v2061_v56 = vld [vmem:[#allocation2 + $0xe4] sm:$0xf]  ;;  %1954 = vst [vmem:[#allocation3 + $0x404] sm:$0xf] %v1946_v59  ;;  %v2122_v61 = vld [vmem:[#allocation2 + $0xe0] sm:$0xf] }
 0x1c9   : > { %8046 = vmatpush3.bf16.msra.mxu0 %v8802_v9  ;;  %v2123_v63 = vld [vmem:[#allocation2 + $0xe4] sm:$0xf]  ;;  %1955 = vst [vmem:[#allocation3 + $0x428] sm:$0xf] %v1947_v37  ;;  %2068 = vst [vmem:[#allocation3 + $0x334] sm:$0xf] %v2060_v50  ;;  %v7718_v57 = vpop.f32.mrf.mxu1 }
 0x1ca   : > { %8047 = vmatprep.subr.bf16.mxu0 %v8805_v38  ;;  %2069 = vst [vmem:[#allocation3 + $0x358] sm:$0xf] %v2061_v56  ;;  %v8785_v0 = vld [vmem:[#allocation3 + $0x3f8] ss:$36 sps:$4 sm:$0xff]   ;;  %2130 = vst [vmem:[#allocation3 + $0x2f0] sm:$0xf] %v2122_v61 }
 0x1cb   : > { %3984 = vmatmul.mubr.bf16.vlgmr.msra.gmra.mxu1 %v8780_v45  ;;  %2131 = vst [vmem:[#allocation3 + $0x314] sm:$0xf] %v2123_v63  ;;  %v8793_v1 = vld [vmem:[#allocation3 + $0x58] ss:$36 sps:$4 sm:$0xff]   ;;  %v8797_v2 = vld [vmem:[#allocation3 + $0x444] ss:$36 sps:$4 sm:$0xff]   ;;  %v7719_v58 = vpop.f32.mrf.mxu1 }
 0x1cc   : > { %3927 = vmatmul.mubr.bf16.gmra.mxu0 %v8777_v44  ;;  %8480 = vmatpush3.bf16.msra.mxu1 %v9097_v55  ;;  %v8798_v3 = vld [vmem:[#allocation3 + $0xa4] ss:$36 sps:$4 sm:$0xff]   ;;  %v8846_v4 = vld [vmem:[%s10635_s3 + $0x218] sm:$0xff]   ;;  %v2006_v16 = vld [vmem:[#allocation2 + $0xf0] sm:$0xf]  ;;  %v7717_v55 = vadd.f32 %v7716_v54, %v7715_v51  ;;  %v7720_v37 = vadd.f32 %v7719_v58, %v7718_v57 }
 0x1cd   : > { %8048 = vmatpush3.bf16.msra.mxu0 %v8808_v43  ;;  %3934 = vmatprep.mubr.bf16.mxu0 %v8787_v46  ;;  %v8795_v5 = vld [vmem:[#allocation3 + $0x440] ss:$36 sps:$4 sm:$0xff]   ;;  %v2008_v7 = vld [vmem:[#allocation2 + $0xf8] sm:$0xf]  ;;  %v2009_v12 = vld [vmem:[#allocation2 + $0xfc] sm:$0xf]  ;;  %v7721_v56 = vpop.f32.mrf.mxu1 }
 0x1ce   : > { %3991 = vmatprep.mubr.bf16.mxu1 %v8788_v49  ;;  %8481 = vmatprep.subr.bf16.mxu1 %v8803_v15  ;;  %v8804_v8 = vld [vmem:[#allocation3 + $0xa0] ss:$36 sps:$4 sm:$0xff]   ;;  %v2070_v13 = vld [vmem:[#allocation2 + $0xf8] sm:$0xf]  ;;  %2016 = vst [vmem:[#allocation3 + $0x3c0] sm:$0xf] %v2008_v7 }
 0x1cf   : > { %8049 = vmatprep.subr.bf16.mxu0 %v8812_v42  ;;  %2017 = vst [vmem:[#allocation3 + $0x3e4] sm:$0xf] %v2009_v12  ;;  %v2071_v14 = vld [vmem:[#allocation2 + $0xfc] sm:$0xf]  ;;  %2078 = vst [vmem:[#allocation3 + $0x37c] sm:$0xf] %v2070_v13 }
 0x1d0   : > { %8482 = vmatpush3.bf16.msra.mxu1 %v8803_v15  ;;  %v2007_v17 = vld [vmem:[#allocation2 + $0xf4] sm:$0xf]  ;;  %v8806_v18 = vld [vmem:[#allocation3 + $0xec] ss:$36 sps:$4 sm:$0xff]   ;;  %2079 = vst [vmem:[#allocation3 + $0x3a0] sm:$0xf] %v2071_v14 }
 0x1d1   : > { %8050 = vmatpush3.bf16.msra.mxu0 %v8813_v47  ;;  %8483 = vmatprep.subr.bf16.mxu1 %v8820_v52  ;;  %2014 = vst [vmem:[#allocation3 + $0x378] sm:$0xf] %v2006_v16  ;;  %2015 = vst [vmem:[#allocation3 + $0x39c] sm:$0xf] %v2007_v17  ;;  %v8811_v32 = vld [vmem:[#allocation3 + $0x1c] ss:$36 sps:$4 sm:$0xff]  }
 0x1d2   : > { %v2012_v41 = vld [vmem:[#allocation2 + $0x108] sm:$0xf]  ;;  %v2013_v39 = vld [vmem:[#allocation2 + $0x10c] sm:$0xf]  ;;  %v2010_v25 = vld [vmem:[#allocation2 + $0x100] sm:$0xf] }
 0x1d3   : > { %3992 = vmatmul.mubr.bf16.gmra.mxu1 %v8793_v1  ;;  %2020 = vst [vmem:[#allocation3 + $0x450] sm:$0xf] %v2012_v41  ;;  %v2074_v19 = vld [vmem:[#allocation2 + $0x108] sm:$0xf]  ;;  %v2075_v20 = vld [vmem:[#allocation2 + $0x10c] sm:$0xf] }
 0x1d4   : > { %3935 = vmatmul.mubr.bf16.gmra.mxu0 %v8785_v0  ;;  %3999 = vmatprep.mubr.bf16.mxu1 %v8798_v3  ;;  %2021 = vst [vmem:[#allocation3 + $0x474] sm:$0xf] %v2013_v39  ;;  %2082 = vst [vmem:[#allocation3 + $0x40c] sm:$0xf] %v2074_v19  ;;  %v2136_v23 = vld [vmem:[#allocation2 + $0x108] sm:$0xf]  ;;  %v7722_v0 = vpop.f32.mrf.mxu1 }
 0x1d5   : > { %3942 = vmatprep.mubr.bf16.mxu0 %v8797_v2  ;;  %8484 = vmatpush3.bf16.msra.mxu1 %v8820_v52  ;;  %2083 = vst [vmem:[#allocation3 + $0x430] sm:$0xf] %v2075_v20  ;;  %v2137_v24 = vld [vmem:[#allocation2 + $0x10c] sm:$0xf]  ;;  %2144 = vst [vmem:[#allocation3 + $0x3c8] sm:$0xf] %v2136_v23  ;;  %v9658_v1 = vadd.f32 %v7722_v0, %v7721_v56 }
 0x1d6   : > { %8485 = vmatprep.subr.bf16.mxu1 %v8833_v60  ;;  %2145 = vst [vmem:[#allocation3 + $0x3ec] sm:$0xf] %v2137_v24  ;;  %v2011_v6 = vld [vmem:[#allocation2 + $0x104] sm:$0xf]  ;;  %v2072_v26 = vld [vmem:[#allocation2 + $0x100] sm:$0xf]  ;;  %v7724_v2 = vpop.f32.mrf.mxu1 }
 0x1d7   : > { %v2073_v11 = vld [vmem:[#allocation2 + $0x104] sm:$0xf]  ;;  %2018 = vst [vmem:[#allocation3 + $0x408] sm:$0xf] %v2010_v25  ;;  %v2134_v10 = vld [vmem:[#allocation2 + $0x100] sm:$0xf] }
 0x1d8   : > { %v2135_v21 = vld [vmem:[#allocation2 + $0x104] sm:$0xf]  ;;  %2019 = vst [vmem:[#allocation3 + $0x42c] sm:$0xf] %v2011_v6  ;;  %2080 = vst [vmem:[#allocation3 + $0x3c4] sm:$0xf] %v2072_v26  ;;  %v7725_v3 = vpop.f32.mrf.mxu1 }
 0x1d9   : > { %8486 = vmatpush3.bf16.msra.mxu1 %v8833_v60  ;;  %2081 = vst [vmem:[#allocation3 + $0x3e8] sm:$0xf] %v2073_v11  ;;  %v8859_v22 = vld [vmem:[%s10635_s3 + $0x210] sm:$0xff]   ;;  %v8809_v28 = vld [vmem:[#allocation3 + $0x18] ss:$36 sps:$4 sm:$0xff]   ;;  %v8873_v36 = vld [vmem:[%s10635_s3 + $0x208] sm:$0xff]   ;;  %v9660_v60 = vadd.f32 %v7725_v3, %v7724_v2 }
 0x1da   : > { %8487 = vmatprep.subr.bf16.mxu1 %v8846_v4  ;;  %2142 = vst [vmem:[#allocation3 + $0x380] sm:$0xf] %v2134_v10  ;;  %2143 = vst [vmem:[#allocation3 + $0x3a4] sm:$0xf] %v2135_v21  ;;  %v8814_v29 = vld [vmem:[#allocation3 + $0xe8] ss:$36 sps:$4 sm:$0xff]  }
 0x1db   : > { %4000 = vmatmul.mubr.bf16.gmra.mxu1 %v8804_v8  ;;  %v8815_v30 = vld [vmem:[#allocation3 + $0x134] ss:$36 sps:$4 sm:$0xff]   ;;  %v8819_v35 = vld [vmem:[#allocation3 + $0x64] ss:$36 sps:$4 sm:$0xff]   ;;  %v2141_v53 = vld [vmem:[#allocation2 + $0x11c] sm:$0xf] }
 0x1dc   : > { %3943 = vmatmul.mubr.bf16.gmra.mxu0 %v8795_v5  ;;  %4007 = vmatprep.mubr.bf16.mxu1 %v8806_v18  ;;  %v2140_v48 = vld [vmem:[#allocation2 + $0x118] sm:$0xf]  ;;  %v2076_v31 = vld [vmem:[#allocation2 + $0x110] sm:$0xf]  ;;  %v2077_v33 = vld [vmem:[#allocation2 + $0x114] sm:$0xf] }
 0x1dd   : > { %4144 = vmatprep.mubr.bf16.mxu0 %v8811_v32  ;;  %8488 = vmatpush3.bf16.msra.mxu1 %v8846_v4  ;;  %2148 = vst [vmem:[#allocation3 + $0x458] sm:$0xf] %v2140_v48  ;;  %2149 = vst [vmem:[#allocation3 + $0x47c] sm:$0xf] %v2141_v53  ;;  %v2138_v62 = vld [vmem:[#allocation2 + $0x110] sm:$0xf]  ;;  %v7727_v4 = vpop.f32.mrf.mxu1 }
 0x1de   : > { %8489 = vmatprep.subr.bf16.mxu1 %v8859_v22  ;;  %v2139_v34 = vld [vmem:[#allocation2 + $0x114] sm:$0xf]  ;;  %2084 = vst [vmem:[#allocation3 + $0x454] sm:$0xf] %v2076_v31  ;;  %2085 = vst [vmem:[#allocation3 + $0x478] sm:$0xf] %v2077_v33 }
 0x1df   : > { %2146 = vst [vmem:[#allocation3 + $0x410] sm:$0xf] %v2138_v62  ;;  %2147 = vst [vmem:[#allocation3 + $0x434] sm:$0xf] %v2139_v34  ;;  %v8817_v9 = vld [vmem:[#allocation3 + $0x60] ss:$36 sps:$4 sm:$0xff]   ;;  %v7728_v13 = vpop.f32.mrf.mxu1 }
 0x1e0   : > { %v8821_v38 = vld [vmem:[#allocation3 + $0x130] ss:$36 sps:$4 sm:$0xff]   ;;  %v8822_v43 = vld [vmem:[#allocation3 + $0x17c] ss:$36 sps:$4 sm:$0xff]   ;;  %v8824_v46 = vld [vmem:[#allocation3 + $0xa8] ss:$36 sps:$4 sm:$0xff]   ;;  %v9662_v14 = vadd.f32 %v7728_v13, %v7727_v4 }
 0x1e1   : > { %8490 = vmatpush3.bf16.msra.mxu1 %v8859_v22  ;;  %v8826_v44 = vld [vmem:[#allocation3 + $0xac] ss:$36 sps:$4 sm:$0xff]   ;;  %v8886_v45 = vld [vmem:[%s10635_s3 + $0x200] sm:$0xff]   ;;  %v8827_v49 = vld [vmem:[#allocation3 + $0x178] ss:$36 sps:$4 sm:$0xff]   ;;  %v7730_v16 = vpop.f32.mrf.mxu1 }
 0x1e2   : > { %8491 = vmatprep.subr.bf16.mxu1 %v8873_v36  ;;  %v8828_v15 = vld [vmem:[#allocation3 + $0x1c4] ss:$36 sps:$4 sm:$0xff]   ;;  %v8832_v42 = vld [vmem:[#allocation3 + $0xf4] ss:$36 sps:$4 sm:$0xff]   ;;  %v8835_v47 = vld [vmem:[#allocation3 + $0x20c] ss:$36 sps:$4 sm:$0xff]  }
 0x1e3   : > { %4008 = vmatmul.mubr.bf16.gmra.mxu1 %v8814_v29  ;;  %v8830_v27 = vld [vmem:[#allocation3 + $0xf0] ss:$36 sps:$4 sm:$0xff]   ;;  %v8834_v40 = vld [vmem:[#allocation3 + $0x1c0] ss:$36 sps:$4 sm:$0xff]   ;;  %v8837_v59 = vld [vmem:[#allocation3 + $0x138] ss:$36 sps:$4 sm:$0xff]   ;;  %v7731_v17 = vpop.f32.mrf.mxu1 }
 0x1e4   : > { %4145 = vmatmul.mubr.bf16.vlgmr.msra.gmra.mxu0 %v8809_v28  ;;  %4015 = vmatprep.mubr.bf16.mxu1 %v8815_v30  ;;  %v8839_v52 = vld [vmem:[#allocation3 + $0x13c] ss:$36 sps:$4 sm:$0xff]   ;;  %v8840_v50 = vld [vmem:[#allocation3 + $0x208] ss:$36 sps:$4 sm:$0xff]   ;;  %v8841_v61 = vld [vmem:[#allocation3 + $0x254] ss:$36 sps:$4 sm:$0xff]   ;;  %v9664_v18 = vadd.f32 %v7731_v17, %v7730_v16 }
 0x1e5   : > { %4152 = vmatprep.mubr.bf16.mxu0 %v8819_v35  ;;  %8492 = vmatpush3.bf16.msra.mxu1 %v8873_v36  ;;  %v8845_v63 = vld [vmem:[#allocation3 + $0x184] ss:$36 sps:$4 sm:$0xff]   ;;  %v8847_v8 = vld [vmem:[#allocation3 + $0x250] ss:$36 sps:$4 sm:$0xff]   ;;  %v8848_v7 = vld [vmem:[#allocation3 + $0x29c] ss:$36 sps:$4 sm:$0xff]   ;;  %v7733_v32 = vpop.f32.mrf.mxu1 }
 0x1e6   : > { %8493 = vmatprep.subr.bf16.mxu1 %v8886_v45  ;;  %v8843_v5 = vld [vmem:[#allocation3 + $0x180] ss:$36 sps:$4 sm:$0xff]   ;;  %v8852_v12 = vld [vmem:[#allocation3 + $0x1cc] ss:$36 sps:$4 sm:$0xff]   ;;  %v8853_v39 = vld [vmem:[#allocation3 + $0x298] ss:$36 sps:$4 sm:$0xff]  }
 0x1e7   : > { %v8850_v41 = vld [vmem:[#allocation3 + $0x1c8] ss:$36 sps:$4 sm:$0xff]   ;;  %v8858_v20 = vld [vmem:[#allocation3 + $0x214] ss:$36 sps:$4 sm:$0xff]   ;;  %v7734_v23 = vpop.f32.mrf.mxu1  ;;  %v9673_v11 = vld [vmem:[%s10636_s4] ss:$0 sm:$0xff]  ;;  %v7827_v10 = vpop.f32.mrf.mxu0 }
 0x1e8   : > { %v8854_v19 = vld [vmem:[#allocation3 + $0x2e4] ss:$36 sps:$4 sm:$0xff]   ;;  %v9666_v24 = vadd.f32 %v7734_v23, %v7733_v32  ;;  %v8856_v21 = vld [vmem:[#allocation3 + $0x210] ss:$36 sps:$4 sm:$0xff]   ;;  %v8865_v29 = vld [vmem:[#allocation3 + $0x25c] ss:$36 sps:$4 sm:$0xff]   ;;  %v3664_v48 = vadd.f32 %v7717_v55, %v9673_v11  ;;  %v3675_v56 = vadd.f32 %v9660_v60, %v9673_v11  ;;  %v3683_v32 = vadd.f32 %v9664_v18, %v9673_v11 }
 0x1e9   : > { %8494 = vmatpush3.bf16.msra.mxu1 %v8886_v45  ;;  %v7736_v25 = vpop.f32.mrf.mxu1  ;;  %v8860_v22 = vld [vmem:[#allocation3 + $0x2e0] ss:$36 sps:$4 sm:$0xff]   ;;  %v8861_v28 = vld [vmem:[#allocation3 + $0x32c] ss:$36 sps:$4 sm:$0xff]   ;;  %v7828_v30 = vpop.f32.mrf.mxu0 }
 0x1ea   : > { %v7829_v53 = vadd.f32 %v7828_v30, %v7827_v10  ;;  %v8870_v2 = vld [vmem:[#allocation3 + $0x2a0] ss:$36 sps:$4 sm:$0xff]  }
 0x1eb   : > { %4016 = vmatmul.mubr.bf16.gmra.mxu1 %v8821_v38  ;;  %v7737_v6 = vpop.f32.mrf.mxu1  ;;  %v7830_v31 = vpop.f32.mrf.mxu0  ;;  %v3667_v38 = vadd.f32 %v7720_v37, %v9673_v11  ;;  %v8882_v23 = vld [vmem:[#allocation3 + $0x404] ss:$36 sps:$4 sm:$0xff]  }
 0x1ec   : > { %4153 = vmatmul.mubr.bf16.gmra.mxu0 %v8817_v9  ;;  %4023 = vmatprep.mubr.bf16.mxu1 %v8822_v43  ;;  %v9668_v26 = vadd.f32 %v7737_v6, %v7736_v25  ;;  %v9676_v62 = vadd.f32 %v7829_v53, %v3664_v48  ;;  %v8885_v25 = vld [vmem:[#allocation3 + $0x334] ss:$36 sps:$4 sm:$0xff]  }
 0x1ed   : > { %4160 = vmatprep.mubr.bf16.mxu0 %v8826_v44  ;;  %v7739_v35 = vpop.f32.mrf.mxu1  ;;  %v7831_v36 = vpop.f32.mrf.mxu0 }
 0x1ee   : > { %v7832_v43 = vadd.f32 %v7831_v36, %v7830_v31  ;;  %v8892_v31 = vld [vmem:[#allocation3 + $0x37c] ss:$36 sps:$4 sm:$0xff]  }
 0x1ef   : > { %v7740_v33 = vpop.f32.mrf.mxu1  ;;  %v7833_v44 = vpop.f32.mrf.mxu0  ;;  %v8880_v36 = vld [vmem:[#allocation3 + $0x400] ss:$36 sps:$4 sm:$0xff]  }
 0x1f0   : > { %v9678_v34 = vadd.f32 %v7740_v33, %v7739_v35  ;;  %v3691_v33 = vadd.f32 %v9668_v26, %v9673_v11 }
 0x1f1   : > { %v7742_v9 = vpop.f32.mrf.mxu1  ;;  %v7834_v51 = vpop.f32.mrf.mxu0 }
 0x1f2   : > { %v7835_v54 = vadd.f32 %v7834_v51, %v7833_v44  ;;  %v8889_v44 = vld [vmem:[#allocation3 + $0x44c] ss:$36 sps:$4 sm:$0xff]  }
 0x1f3   : > { %4024 = vmatmul.mubr.bf16.gmra.mxu1 %v8827_v49  ;;  %v7743_v45 = vpop.f32.mrf.mxu1  ;;  %v8866_v49 = vld [vmem:[#allocation3 + $0x328] ss:$36 sps:$4 sm:$0xff]   ;;  %v7836_v55 = vpop.f32.mrf.mxu0 }
 0x1f4   : > { %4161 = vmatmul.mubr.bf16.gmra.mxu0 %v8824_v46  ;;  %4031 = vmatprep.mubr.bf16.mxu1 %v8828_v15  ;;  %v8863_v46 = vld [vmem:[#allocation3 + $0x258] ss:$36 sps:$4 sm:$0xff]   ;;  %v9681_v15 = vadd.f32 %v7832_v43, %v3667_v38 }
 0x1f5   : > { %4168 = vmatprep.mubr.bf16.mxu0 %v8832_v42  ;;  %v9683_v42 = vadd.f32 %v7743_v45, %v7742_v9  ;;  %v7837_v37 = vpop.f32.mrf.mxu0  ;;  %v8883_v9 = vld [vmem:[#allocation3 + $0x330] ss:$36 sps:$4 sm:$0xff]  }
 0x1fb   : > { %4032 = vmatmul.mubr.bf16.gmra.mxu1 %v8834_v40  ;;  %v8872_v40 = vld [vmem:[#allocation3 + $0x2a4] ss:$36 sps:$4 sm:$0xff]  }
 0x1fc   : > { %4169 = vmatmul.mubr.bf16.gmra.mxu0 %v8830_v27  ;;  %4039 = vmatprep.mubr.bf16.mxu1 %v8835_v47  ;;  %v8869_v27 = vld [vmem:[#allocation3 + $0x374] ss:$36 sps:$4 sm:$0xff]   ;;  %v7745_v47 = vpop.f32.mrf.mxu1 }
 0x1fd   : > { %4176 = vmatprep.mubr.bf16.mxu0 %v8839_v52  ;;  %v3672_v52 = vadd.f32 %v9658_v1, %v9673_v11  ;;  %v8867_v1 = vld [vmem:[#allocation3 + $0x370] ss:$36 sps:$4 sm:$0xff]  }
 0x1fe   : > { %v7746_v57 = vpop.f32.mrf.mxu1 }
 0x1ff   : > { %v9687_v58 = vadd.f32 %v7835_v54, %v3672_v52  ;;  %v8890_v54 = vld [vmem:[#allocation3 + $0x378] ss:$36 sps:$4 sm:$0xff]  }
 0x203   : > { %4040 = vmatmul.mubr.bf16.gmra.mxu1 %v8840_v50  ;;  %v7748_v50 = vpop.f32.mrf.mxu1 }
 0x204   : > { %4177 = vmatmul.mubr.bf16.gmra.mxu0 %v8837_v59  ;;  %4047 = vmatprep.mubr.bf16.mxu1 %v8841_v61  ;;  %v9689_v59 = vadd.f32 %v7746_v57, %v7745_v47  ;;  %v7838_v61 = vadd.f32 %v7837_v37, %v7836_v55 }
 0x205   : > { %4184 = vmatprep.mubr.bf16.mxu0 %v8845_v63  ;;  %v7839_v63 = vpop.f32.mrf.mxu0  ;;  %v7749_v0 = vpop.f32.mrf.mxu1 }
 0x206   : > { %v9693_v3 = vadd.f32 %v7838_v61, %v3675_v56  ;;  %v9695_v4 = vadd.f32 %v7749_v0, %v7748_v50  ;;  %v8896_v50 = vld [vmem:[#allocation3 + $0x3c4] ss:$36 sps:$4 sm:$0xff]   ;;  %v3699_v56 = vadd.f32 %v9683_v42, %v9673_v11 }
 0x207   : > { %v8887_v61 = vld [vmem:[#allocation3 + $0x448] ss:$36 sps:$4 sm:$0xff]  }
 0x20b   : > { %4048 = vmatmul.mubr.bf16.gmra.mxu1 %v8847_v8  ;;  %v8879_v8 = vld [vmem:[#allocation3 + $0x2ec] ss:$36 sps:$4 sm:$0xff]  }
 0x20c   : > { %4185 = vmatmul.mubr.bf16.gmra.mxu0 %v8843_v5  ;;  %4055 = vmatprep.mubr.bf16.mxu1 %v8848_v7  ;;  %v8876_v5 = vld [vmem:[#allocation3 + $0x3bc] ss:$36 sps:$4 sm:$0xff]   ;;  %v7840_v7 = vpop.f32.mrf.mxu0 }
 0x20d   : > { %4192 = vmatprep.mubr.bf16.mxu0 %v8852_v12  ;;  %v3680_v12 = vadd.f32 %v9662_v14, %v9673_v11  ;;  %v7841_v13 = vadd.f32 %v7840_v7, %v7839_v63 }
 0x20e   : > { %v7842_v60 = vpop.f32.mrf.mxu0 }
 0x20f   : > { %v9699_v16 = vadd.f32 %v7841_v13, %v3680_v12  ;;  %v3704_v12 = vadd.f32 %v9689_v59, %v9673_v11 }
 0x210   : > { %v7843_v17 = vpop.f32.mrf.mxu0 }
 0x213   : > { %4056 = vmatmul.mubr.bf16.gmra.mxu1 %v8853_v39  ;;  %v8874_v39 = vld [vmem:[#allocation3 + $0x3b8] ss:$36 sps:$4 sm:$0xff]   ;;  %v7751_v14 = vpop.f32.mrf.mxu1  ;;  %v7845_v6 = vpop.f32.mrf.mxu0 }
 0x214   : > { %4193 = vmatmul.mubr.bf16.gmra.mxu0 %v8850_v41  ;;  %4063 = vmatprep.mubr.bf16.mxu1 %v8854_v19  ;;  %v7844_v41 = vadd.f32 %v7843_v17, %v7842_v60  ;;  %v8877_v19 = vld [vmem:[#allocation3 + $0x2e8] ss:$36 sps:$4 sm:$0xff]  }
 0x215   : > { %4200 = vmatprep.mubr.bf16.mxu0 %v8858_v20  ;;  %v7752_v10 = vpop.f32.mrf.mxu1 }
 0x216   : > { %v9703_v20 = vadd.f32 %v7844_v41, %v3683_v32  ;;  %v8894_v32 = vld [vmem:[#allocation3 + $0x3c0] ss:$36 sps:$4 sm:$0xff]  }
 0x21b   : > { %4064 = vmatmul.mubr.bf16.gmra.mxu1 %v8860_v22  ;;  %v3688_v22 = vadd.f32 %v9666_v24, %v9673_v11 }
 0x21c   : > { %4201 = vmatmul.mubr.bf16.gmra.mxu0 %v8856_v21  ;;  %4071 = vmatprep.mubr.bf16.mxu1 %v8861_v28  ;;  %v7846_v21 = vpop.f32.mrf.mxu0  ;;  %v9707_v28 = vadd.f32 %v7752_v10, %v7751_v14  ;;  %v8897_v14 = vld [vmem:[#allocation3 + $0x68] ss:$36 sps:$4 sm:$0xff]  }
 0x21d   : > { %4208 = vmatprep.mubr.bf16.mxu0 %v8865_v29  ;;  %v7847_v18 = vadd.f32 %v7846_v21, %v7845_v6  ;;  %v7754_v29 = vpop.f32.mrf.mxu1  ;;  %v8898_v21 = vld [vmem:[#allocation3 + $0xb0] ss:$36 sps:$4 sm:$0xff]  }
 0x21e   : > { %v7848_v30 = vpop.f32.mrf.mxu0 }
 0x21f   : > { %v9709_v35 = vadd.f32 %v7847_v18, %v3688_v22  ;;  %v7755_v48 = vpop.f32.mrf.mxu1 }
 0x220   : > { %v7849_v53 = vpop.f32.mrf.mxu0  ;;  %v9713_v38 = vadd.f32 %v7755_v48, %v7754_v29  ;;  %v3712_v48 = vadd.f32 %v9707_v28, %v9673_v11 }
 0x221   : > { %v7850_v43 = vadd.f32 %v7849_v53, %v7848_v30  ;;  %v7757_v24 = vpop.f32.mrf.mxu1 }
 0x222   : > { %v7851_v45 = vpop.f32.mrf.mxu0 }
 0x223   : > { %4072 = vmatmul.mubr.bf16.gmra.mxu1 %v8866_v49  ;;  %v7758_v49 = vpop.f32.mrf.mxu1 }
 0x224   : > { %4209 = vmatmul.mubr.bf16.gmra.mxu0 %v8863_v46  ;;  %4079 = vmatprep.mubr.bf16.mxu1 %v8869_v27  ;;  %v9715_v46 = vadd.f32 %v7850_v43, %v3691_v33  ;;  %v7852_v27 = vpop.f32.mrf.mxu0  ;;  %v9719_v26 = vadd.f32 %v7758_v49, %v7757_v24  ;;  %v8906_v24 = vld [vmem:[#allocation3 + $0x454] ss:$36 sps:$4 sm:$0xff]  }
 0x225   : > { %4216 = vmatprep.mubr.bf16.mxu0 %v8872_v40  ;;  %v3696_v40 = vadd.f32 %v9678_v34, %v9673_v11  ;;  %v7853_v51 = vadd.f32 %v7852_v27, %v7851_v45  ;;  %v7760_v47 = vpop.f32.mrf.mxu1  ;;  %v3715_v45 = vadd.f32 %v9713_v38, %v9673_v11  ;;  %v8902_v49 = vld [vmem:[#allocation3 + $0xf8] ss:$36 sps:$4 sm:$0xff]  }
 0x226   : > { %v7854_v52 = vpop.f32.mrf.mxu0 }
 0x227   : > { %v9721_v55 = vadd.f32 %v7853_v51, %v3696_v40  ;;  %v7761_v57 = vpop.f32.mrf.mxu1  ;;  %v8903_v51 = vld [vmem:[#allocation3 + $0x140] ss:$36 sps:$4 sm:$0xff]  }
 0x228   : > { %v7855_v37 = vpop.f32.mrf.mxu0  ;;  %v9725_v63 = vadd.f32 %v7761_v57, %v7760_v47  ;;  %v8904_v47 = vld [vmem:[#allocation3 + $0x450] ss:$36 sps:$4 sm:$0xff]  }
 0x229   : > { %v7856_v0 = vadd.f32 %v7855_v37, %v7854_v52  ;;  %v7763_v34 = vpop.f32.mrf.mxu1  ;;  %v8907_v52 = vld [vmem:[#allocation3 + $0x188] ss:$36 sps:$4 sm:$0xff]  }
 0x22b   : > { %4080 = vmatmul.mubr.bf16.gmra.mxu1 %v8867_v1  ;;  %v8893_v1 = vld [vmem:[#allocation3 + $0x20] ss:$36 sps:$4 sm:$0xff]  }
 0x22c   : > { %4217 = vmatmul.mubr.bf16.gmra.mxu0 %v8870_v2  ;;  %4087 = vmatprep.mubr.bf16.mxu1 %v8876_v5  ;;  %v7857_v2 = vpop.f32.mrf.mxu0  ;;  %v9727_v5 = vadd.f32 %v7856_v0, %v3699_v56  ;;  %v3720_v56 = vadd.f32 %v9719_v26, %v9673_v11  ;;  %v3723_v26 = vadd.f32 %v9725_v63, %v9673_v11 }
 0x22d   : > { %4224 = vmatprep.mubr.bf16.mxu0 %v8879_v8  ;;  %v7764_v8 = vpop.f32.mrf.mxu1 }
 0x22e   : > { %v7858_v7 = vpop.f32.mrf.mxu0  ;;  %v9731_v13 = vadd.f32 %v7764_v8, %v7763_v34  ;;  %v8918_v8 = vld [vmem:[%s10637_s5 + $0x178] sm:$0xff]  }
 0x22f   : > { %v7859_v42 = vadd.f32 %v7858_v7, %v7857_v2  ;;  %v7766_v60 = vpop.f32.mrf.mxu1  ;;  %v8919_v7 = vld [vmem:[%s10637_s5 + $0x138] sm:$0xff]   ;;  %8251 = vmatprep.subr.bf16.mxu0 %v8918_v8 }
 0x230   : > { %v7860_v17 = vpop.f32.mrf.mxu0  ;;  %8252 = vmatpush3.bf16.msra.mxu0 %v8919_v7 }
 0x231   : > { %v9733_v41 = vadd.f32 %v7859_v42, %v3704_v12 }
 0x233   : > { %4088 = vmatmul.mubr.bf16.gmra.mxu1 %v8874_v39  ;;  %v7767_v39 = vpop.f32.mrf.mxu1 }
 0x234   : > { %4225 = vmatmul.mubr.bf16.gmra.mxu0 %v8877_v19  ;;  %4095 = vmatprep.mubr.bf16.mxu1 %v8882_v23  ;;  %v7861_v19 = vpop.f32.mrf.mxu0  ;;  %v8901_v23 = vld [vmem:[#allocation3 + $0x40c] ss:$36 sps:$4 sm:$0xff]   ;;  %v9737_v6 = vadd.f32 %v7767_v39, %v7766_v60  ;;  %v8909_v60 = vld [vmem:[#allocation3 + $0x218] ss:$36 sps:$4 sm:$0xff]   ;;  %v8910_v39 = vld [vmem:[#allocation3 + $0x260] ss:$36 sps:$4 sm:$0xff]  }
 0x235   : > { %4232 = vmatprep.mubr.bf16.mxu0 %v8885_v25  ;;  %v3707_v25 = vadd.f32 %v9695_v4, %v9673_v11  ;;  %v7862_v10 = vadd.f32 %v7861_v19, %v7860_v17  ;;  %v7769_v59 = vpop.f32.mrf.mxu1 }
 0x236   : > { %v7863_v22 = vpop.f32.mrf.mxu0 }
 0x237   : > { %v9739_v18 = vadd.f32 %v7862_v10, %v3707_v25  ;;  %v7770_v29 = vpop.f32.mrf.mxu1 }
 0x238   : > { %v7864_v30 = vpop.f32.mrf.mxu0  ;;  %v9743_v53 = vadd.f32 %v7770_v29, %v7769_v59 }
 0x239   : > { %v7865_v4 = vadd.f32 %v7864_v30, %v7863_v22 }
 0x23a   : > { %v7866_v33 = vpop.f32.mrf.mxu0 }
 0x23b   : > { %4096 = vmatmul.mubr.bf16.gmra.mxu1 %v8880_v36  ;;  %v8899_v36 = vld [vmem:[#allocation3 + $0x408] ss:$36 sps:$4 sm:$0xff]  }
 0x23c   : > { %4233 = vmatmul.mubr.bf16.gmra.mxu0 %v8883_v9  ;;  %4103 = vmatprep.mubr.bf16.mxu1 %v8889_v44  ;;  %v9745_v9 = vadd.f32 %v7865_v4, %v3712_v48  ;;  %v7867_v44 = vpop.f32.mrf.mxu0 }
 0x23d   : > { %4240 = vmatprep.mubr.bf16.mxu0 %v8892_v31  ;;  %v7772_v31 = vpop.f32.mrf.mxu1  ;;  %v7868_v40 = vadd.f32 %v7867_v44, %v7866_v33  ;;  %v3731_v33 = vadd.f32 %v9737_v6, %v9673_v11  ;;  %v8912_v44 = vld [vmem:[#allocation3 + $0x2f0] ss:$36 sps:$4 sm:$0xff]  }
 0x23f   : > { %v7773_v43 = vpop.f32.mrf.mxu1  ;;  %v9751_v28 = vadd.f32 %v7868_v40, %v3715_v45  ;;  %v8921_v40 = vld [vmem:[%s10637_s5 + $0x38] sm:$0xff]  }
 0x240   : > { %v9749_v27 = vadd.f32 %v7773_v43, %v7772_v31  ;;  %v8911_v31 = vld [vmem:[#allocation3 + $0x2a8] ss:$36 sps:$4 sm:$0xff]  }
 0x242   : > { %v3739_v8 = vadd.f32 %v9749_v27, %v9673_v11 }
 0x243   : > { %4104 = vmatmul.mubr.bf16.gmra.mxu1 %v8887_v61 }
 0x244   : > { %4241 = vmatmul.mubr.bf16.gmra.mxu0 %v8890_v54  ;;  %8495 = vmatprep.mubr.bf16.mxu1 %v8893_v1  ;;  %v8908_v54 = vld [vmem:[#allocation3 + $0x1d0] ss:$36 sps:$4 sm:$0xff]  }
 0x245   : > { %4248 = vmatprep.mubr.bf16.mxu0 %v8896_v50 }
 0x24b   : > { %8496 = vmatmul.mubr.bf16.vlgmr.msra.gmra.mxu1 %v8897_v14 }
 0x24c   : > { %4249 = vmatmul.mubr.bf16.gmra.mxu0 %v8894_v32  ;;  %8499 = vmatprep.mubr.bf16.mxu1 %v8898_v21  ;;  %v3728_v21 = vadd.f32 %v9731_v13, %v9673_v11 }
 0x24d   : > { %4256 = vmatprep.mubr.bf16.mxu0 %v8901_v23 }
 0x253   : > { %8500 = vmatmul.mubr.bf16.gmra.mxu1 %v8902_v49  ;;  %v8920_v49 = vld [vmem:[%s10637_s5 + $0x78] sm:$0xff]  }
 0x254   : > { %4257 = vmatmul.mubr.bf16.gmra.mxu0 %v8899_v36  ;;  %8503 = vmatprep.mubr.bf16.mxu1 %v8903_v51 }
 0x255   : > { %4264 = vmatprep.mubr.bf16.mxu0 %v8906_v24  ;;  %8171 = vmatprep.subr.bf16.mxu1 %v8920_v49 }
 0x256   : > { %8172 = vmatpush3.bf16.msra.mxu1 %v8921_v40 }
 0x259   : > { %v7775_v57 = vpop.f32.mrf.mxu1  ;;  %v7869_v37 = vpop.f32.mrf.mxu0 }
 0x25b   : > { %8504 = vmatmul.mubr.bf16.gmra.mxu1 %v8907_v52  ;;  %v7776_v38 = vpop.f32.mrf.mxu1  ;;  %v7870_v50 = vpop.f32.mrf.mxu0 }
 0x25c   : > { %4265 = vmatmul.mubr.bf16.gmra.mxu0 %v8904_v47  ;;  %8507 = vmatprep.mubr.bf16.mxu1 %v8908_v54  ;;  %v9755_v61 = vadd.f32 %v7776_v38, %v7775_v57  ;;  %v7871_v0 = vadd.f32 %v7870_v50, %v7869_v37  ;;  %v3736_v47 = vadd.f32 %v9743_v53, %v9673_v11  ;;  %v8914_v50 = vld [vmem:[#allocation3 + $0x380] ss:$36 sps:$4 sm:$0xff]  }
 0x25d   : > { %v7778_v1 = vpop.f32.mrf.mxu1  ;;  %v7872_v34 = vpop.f32.mrf.mxu0 }
 0x25e   : > { %v9757_v2 = vadd.f32 %v7871_v0, %v3720_v56  ;;  %v8922_v56 = vld [vmem:[%s10637_s5 + $0x170] sm:$0xff]   ;;  %v3744_v27 = vadd.f32 %v9755_v61, %v9673_v11 }
 0x25f   : > { %v7779_v12 = vpop.f32.mrf.mxu1  ;;  %v7873_v42 = vpop.f32.mrf.mxu0  ;;  %v8923_v0 = vld [vmem:[%s10637_s5 + $0x130] sm:$0xff]   ;;  %8253 = vmatprep.subr.bf16.mxu0 %v8922_v56  ;;  %v8929_v56 = vld [vmem:[%s10637_s5 + $0x128] sm:$0xff]  }
 0x260   : > { %v9767_v17 = vadd.f32 %v7779_v12, %v7778_v1  ;;  %v7874_v32 = vadd.f32 %v7873_v42, %v7872_v34  ;;  %v8913_v34 = vld [vmem:[#allocation3 + $0x338] ss:$36 sps:$4 sm:$0xff]   ;;  %8254 = vmatpush3.bf16.msra.mxu0 %v8923_v0 }
 0x261   : > { %v7781_v19 = vpop.f32.mrf.mxu1  ;;  %v7875_v23 = vpop.f32.mrf.mxu0 }
 0x262   : > { %v9769_v25 = vadd.f32 %v7874_v32, %v3723_v26  ;;  %v8924_v26 = vld [vmem:[%s10637_s5 + $0x70] sm:$0xff]  }
 0x263   : > { %8508 = vmatmul.mubr.bf16.gmra.mxu1 %v8909_v60  ;;  %v7782_v14 = vpop.f32.mrf.mxu1  ;;  %v7876_v10 = vpop.f32.mrf.mxu0  ;;  %v8925_v32 = vld [vmem:[%s10637_s5 + $0x30] sm:$0xff]   ;;  %8173 = vmatprep.subr.bf16.mxu1 %v8924_v26  ;;  %v8930_v26 = vld [vmem:[%s10637_s5 + $0x60] sm:$0xff]  }
 0x264   : > { %8511 = vmatprep.mubr.bf16.mxu1 %v8910_v39  ;;  %v9773_v59 = vadd.f32 %v7782_v14, %v7781_v19  ;;  %v7877_v63 = vadd.f32 %v7876_v10, %v7875_v23  ;;  %8174 = vmatpush3.bf16.msra.mxu1 %v8925_v32  ;;  %v8931_v32 = vld [vmem:[%s10637_s5 + $0x20] sm:$0xff]  }
 0x265   : > { %v7784_v22 = vpop.f32.mrf.mxu1  ;;  %v7878_v29 = vpop.f32.mrf.mxu0 }
 0x266   : > { %v9775_v30 = vadd.f32 %v7877_v63, %v3728_v21 }
 0x267   : > { %v7785_v48 = vpop.f32.mrf.mxu1  ;;  %v7879_v4 = vpop.f32.mrf.mxu0 }
 0x268   : > { %v9779_v36 = vadd.f32 %v7785_v48, %v7784_v22  ;;  %v7880_v43 = vadd.f32 %v7879_v4, %v7878_v29  ;;  %v8916_v22 = vld [vmem:[#allocation3 + $0x410] ss:$36 sps:$4 sm:$0xff]   ;;  %v8915_v4 = vld [vmem:[#allocation3 + $0x3c8] ss:$36 sps:$4 sm:$0xff]  }
 0x269   : > { %v7787_v24 = vpop.f32.mrf.mxu1  ;;  %v7881_v45 = vpop.f32.mrf.mxu0 }
 0x26a   : > { %v9781_v13 = vadd.f32 %v7880_v43, %v3731_v33 }
 0x26b   : > { %8512 = vmatmul.mubr.bf16.gmra.mxu1 %v8911_v31  ;;  %v7788_v51 = vpop.f32.mrf.mxu1  ;;  %v7882_v6 = vpop.f32.mrf.mxu0  ;;  %v3747_v31 = vadd.f32 %v9767_v17, %v9673_v11  ;;  %v3752_v17 = vadd.f32 %v9773_v59, %v9673_v11 }
 0x26c   : > { %8515 = vmatprep.mubr.bf16.mxu1 %v8912_v44  ;;  %v9791_v52 = vadd.f32 %v7788_v51, %v7787_v24  ;;  %v7883_v54 = vadd.f32 %v7882_v6, %v7881_v45  ;;  %v8926_v24 = vld [vmem:[%s10637_s5 + $0x68] sm:$0xff]  }
 0x26d   : > { %v9793_v57 = vpop.f32.mrf.mxu1  ;;  %v7884_v37 = vpop.f32.mrf.mxu0  ;;  %v8927_v45 = vld [vmem:[%s10637_s5 + $0x28] sm:$0xff]   ;;  %8175 = vmatprep.subr.bf16.mxu1 %v8926_v24 }
 0x26e   : > { %v9795_v38 = vadd.f32 %v7883_v54, %v3736_v47  ;;  %8176 = vmatpush3.bf16.msra.mxu1 %v8927_v45 }
 0x26f   : > { %v9803_v53 = vpop.f32.mrf.mxu1  ;;  %v7885_v1 = vpop.f32.mrf.mxu0  ;;  %8177 = vmatprep.subr.bf16.mxu1 %v8930_v26 }
 0x270   : > { %v7886_v7 = vadd.f32 %v7885_v1, %v7884_v37  ;;  %v8917_v1 = vld [vmem:[#allocation3 + $0x458] ss:$36 sps:$4 sm:$0xff]  }
 0x271   : > { %v7793_v12 = vpop.f32.mrf.mxu1  ;;  %v7887_v42 = vpop.f32.mrf.mxu0 }
 0x272   : > { %v9807_v60 = vadd.f32 %v7886_v7, %v3739_v8  ;;  %8178 = vmatpush3.bf16.msra.mxu1 %v8931_v32 }
 0x273   : > { %8516 = vmatmul.mubr.bf16.gmra.mxu1 %v8913_v34  ;;  %v7794_v39 = vpop.f32.mrf.mxu1  ;;  %v7888_v19 = vpop.f32.mrf.mxu0  ;;  %v3755_v34 = vadd.f32 %v9779_v36, %v9673_v11  ;;  %v3760_v36 = vadd.f32 %v9791_v52, %v9673_v11  ;;  %v8932_v52 = vld [vmem:[%s10637_s5 + $0x58] sm:$0xff]  }
 0x274   : > { %8519 = vmatprep.mubr.bf16.mxu1 %v8914_v50  ;;  %v9817_v23 = vadd.f32 %v7794_v39, %v7793_v12  ;;  %v7889_v14 = vadd.f32 %v7888_v19, %v7887_v42  ;;  %v8928_v50 = vld [vmem:[%s10637_s5 + $0x168] sm:$0xff]   ;;  %8179 = vmatprep.subr.bf16.mxu1 %v8932_v52 }
 0x275   : > { %v9819_v10 = vpop.f32.mrf.mxu1  ;;  %v7890_v21 = vpop.f32.mrf.mxu0  ;;  %8255 = vmatprep.subr.bf16.mxu0 %v8928_v50  ;;  %v8933_v50 = vld [vmem:[%s10637_s5 + $0x18] sm:$0xff]  }
 0x276   : > { %v9821_v63 = vadd.f32 %v7889_v14, %v3744_v27  ;;  %8256 = vmatpush3.bf16.msra.mxu0 %v8929_v56  ;;  %v7792_v27 = vadd.f32 %v9803_v53, %v9793_v57  ;;  %8180 = vmatpush3.bf16.msra.mxu1 %v8933_v50 }
 0x277   : > { %v7797_v29 = vpop.f32.mrf.mxu1  ;;  %v7891_v48 = vpop.f32.mrf.mxu0 }
 0x278   : > { %v7892_v33 = vadd.f32 %v7891_v48, %v7890_v21 }
 0x27a   : > { %v9825_v44 = vadd.f32 %v7892_v33, %v3747_v31 }
 0x27b   : > { %v7799_v43 = vpop.f32.mrf.mxu1  ;;  %8520 = vmatmul.mubr.bf16.gmra.mxu1 %v8915_v4 }
 0x27c   : > { %v7893_v61 = vpop.f32.mrf.mxu0  ;;  %8523 = vmatprep.mubr.bf16.mxu1 %v8916_v22 }
 0x27d   : > { %v7800_v49 = vpop.f32.mrf.mxu1 }
 0x27e   : > { %v7894_v40 = vpop.f32.mrf.mxu0  ;;  %v9835_v51 = vadd.f32 %v7800_v49, %v7799_v43  ;;  %v3763_v43 = vadd.f32 %v7792_v27, %v9673_v11 }
 0x27f   : > { %v7895_v6 = vadd.f32 %v7894_v40, %v7893_v61  ;;  %v9837_v47 = vpop.f32.mrf.mxu1  ;;  %v3768_v40 = vadd.f32 %v9817_v23, %v9673_v11  ;;  %v8934_v23 = vld [vmem:[%s10637_s5 + $0x160] sm:$0xff]  }
 0x280   : > { %v7896_v54 = vpop.f32.mrf.mxu0  ;;  %8257 = vmatprep.subr.bf16.mxu0 %v8934_v23  ;;  %v3776_v27 = vadd.f32 %v9835_v51, %v9673_v11 }
 0x281   : > { %v9839_v37 = vadd.f32 %v7895_v6, %v3752_v17  ;;  %v7803_v0 = vpop.f32.mrf.mxu1  ;;  %v7798_v17 = vadd.f32 %v7797_v29, %v9819_v10 }
 0x282   : > { %v7897_v59 = vpop.f32.mrf.mxu0 }
 0x283   : > { %v7898_v8 = vadd.f32 %v7897_v59, %v7896_v54  ;;  %v7805_v7 = vpop.f32.mrf.mxu1  ;;  %8524 = vmatmul.mubr.bf16.gmra.mxu1 %v8917_v1 }
 0x284   : > { %v7899_v12 = vpop.f32.mrf.mxu0 }
 0x285   : > { %v9849_v42 = vadd.f32 %v7898_v8, %v3755_v34  ;;  %v7806_v39 = vpop.f32.mrf.mxu1  ;;  %v3771_v8 = vadd.f32 %v7798_v17, %v9673_v11 }
 0x286   : > { %v7900_v19 = vpop.f32.mrf.mxu0  ;;  %v7807_v14 = vadd.f32 %v7806_v39, %v7805_v7 }
 0x287   : > { %v7901_v21 = vadd.f32 %v7900_v19, %v7899_v12  ;;  %v7808_v22 = vpop.f32.mrf.mxu1 }
 0x288   : > { %v7902_v48 = vpop.f32.mrf.mxu0  ;;  %v3784_v50 = vadd.f32 %v7807_v14, %v9673_v11  ;;  %v8937_v14 = vld [vmem:[%s10637_s5 + $0x10] sm:$0xff]  }
 0x289   : > { %v9861_v4 = vadd.f32 %v7901_v21, %v3760_v36  ;;  %v7809_v31 = vpop.f32.mrf.mxu1  ;;  %v7804_v21 = vadd.f32 %v7803_v0, %v9837_v47 }
 0x28a   : > { %v7903_v33 = vpop.f32.mrf.mxu0 }
 0x28b   : > { %v7904_v61 = vadd.f32 %v7903_v33, %v7902_v48  ;;  %v7939_v45 = vpop.f32.mrf.mxu1 }
 0x28c   : > { %v7905_v24 = vpop.f32.mrf.mxu0 }
 0x28d   : > { %v9864_v49 = vadd.f32 %v7904_v61, %v3763_v43  ;;  %v7940_v53 = vpop.f32.mrf.mxu1 }
 0x28e   : > { %v7906_v57 = vpop.f32.mrf.mxu0  ;;  %v7941_v54 = vadd.f32 %v7940_v53, %v7939_v45 }
 0x28f   : > { %v7907_v6 = vadd.f32 %v7906_v57, %v7905_v24  ;;  %v7942_v59 = vpop.f32.mrf.mxu1 }
 0x290   : > { %v7908_v56 = vpop.f32.mrf.mxu0  ;;  %v9878_v34 = vadd.f32 %v7941_v54, %v9676_v62 }
 0x291   : > { %v9875_v1 = vadd.f32 %v7907_v6, %v3768_v40  ;;  %v7943_v29 = vpop.f32.mrf.mxu1 }
 0x292   : > { %v7909_v10 = vpop.f32.mrf.mxu0  ;;  %v7944_v12 = vadd.f32 %v7943_v29, %v7942_v59  ;;  %v8935_v29 = vld [vmem:[%s10637_s5 + $0x120] sm:$0xff]  }
 0x293   : > { %v7910_v7 = vadd.f32 %v7909_v10, %v7908_v56  ;;  %v7945_v32 = vpop.f32.mrf.mxu1  ;;  %v7810_v56 = vadd.f32 %v7809_v31, %v7808_v22  ;;  %8258 = vmatpush3.bf16.msra.mxu0 %v8935_v29 }
 0x294   : > { %v7911_v26 = vpop.f32.mrf.mxu0  ;;  %v9887_v19 = vadd.f32 %v7944_v12, %v9681_v15  ;;  %v3779_v15 = vadd.f32 %v7804_v21, %v9673_v11 }
 0x295   : > { %v9884_v39 = vadd.f32 %v7910_v7, %v3771_v8  ;;  %v7946_v36 = vpop.f32.mrf.mxu1  ;;  %v3787_v12 = vadd.f32 %v7810_v56, %v9673_v11 }
 0x296   : > { %v7912_v62 = vpop.f32.mrf.mxu0  ;;  %v7947_v33 = vadd.f32 %v7946_v36, %v7945_v32 }
 0x297   : > { %v7913_v48 = vadd.f32 %v7912_v62, %v7911_v26  ;;  %v7948_v61 = vpop.f32.mrf.mxu1 }
 0x298   : > { %v7914_v43 = vpop.f32.mrf.mxu0  ;;  %v9895_v45 = vadd.f32 %v7947_v33, %v9687_v58 }
 0x299   : > { %v9892_v24 = vadd.f32 %v7913_v48, %v3776_v27  ;;  %v7949_v57 = vpop.f32.mrf.mxu1 }
 0x29a   : > { %v7915_v52 = vpop.f32.mrf.mxu0  ;;  %v7950_v40 = vadd.f32 %v7949_v57, %v7948_v61 }
 0x29b   : > { %v7916_v53 = vadd.f32 %v7915_v52, %v7914_v43  ;;  %v7951_v6 = vpop.f32.mrf.mxu1 }
 0x29c   : > { %v7917_v17 = vpop.f32.mrf.mxu0  ;;  %v9901_v47 = vadd.f32 %v7950_v40, %v9693_v3  ;;  %v8936_v3 = vld [vmem:[%s10637_s5 + $0x50] sm:$0xff]   ;;  %v8938_v40 = vld [vmem:[%s10637_s5 + $0x48] sm:$0xff]  }
 0x29d   : > { %v9898_v51 = vadd.f32 %v7916_v53, %v3779_v15  ;;  %v7952_v54 = vpop.f32.mrf.mxu1  ;;  %8181 = vmatprep.subr.bf16.mxu1 %v8936_v3  ;;  %v8941_v3 = vld [vmem:[%s10637_s5 + $0x118] sm:$0xff]  }
 0x29e   : > { %v7918_v0 = vpop.f32.mrf.mxu0  ;;  %v7953_v59 = vadd.f32 %v7952_v54, %v7951_v6  ;;  %8182 = vmatpush3.bf16.msra.mxu1 %v8937_v14 }
 0x29f   : > { %v7919_v58 = vadd.f32 %v7918_v0, %v7917_v17  ;;  %v7954_v10 = vpop.f32.mrf.mxu1  ;;  %v8940_v17 = vld [vmem:[%s10637_s5 + $0x158] sm:$0xff]   ;;  %8183 = vmatprep.subr.bf16.mxu1 %v8938_v40 }
 0x2a0   : > { %v7920_v23 = vpop.f32.mrf.mxu0  ;;  %v4002_v7 = vadd.f32 %v7953_v59, %v9699_v16  ;;  %8259 = vmatprep.subr.bf16.mxu0 %v8940_v17  ;;  %v8950_v17 = vld [vmem:[%s10637_s5 + $0x150] sm:$0xff]  }
 0x2a1   : > { %v9907_v8 = vadd.f32 %v7919_v58, %v3784_v50  ;;  %v7955_v31 = vpop.f32.mrf.mxu1  ;;  %8260 = vmatpush3.bf16.msra.mxu0 %v8941_v3 }
 0x2a2   : > { %v7921_v22 = vpop.f32.mrf.mxu0  ;;  %v7956_v32 = vadd.f32 %v7955_v31, %v7954_v10  ;;  %8261 = vmatprep.subr.bf16.mxu0 %v8950_v17 }
 0x2a3   : > { %10649 = vst [vmem:[#allocation8_spill] sm:$0xff] %v9907_v8  ;;  %v7922_v26 = vadd.f32 %v7921_v22, %v7920_v23  ;;  %v7957_v62 = vpop.f32.mrf.mxu1  ;;  %v8943_v22 = vld [vmem:[%s10637_s5] sm:$0xff]  }
 0x2a4   : > { %v8051_v36 = vpop.f32.mrf.mxu0  ;;  %v9920_v27 = vadd.f32 %v7956_v32, %v9703_v20  ;;  %v8939_v20 = vld [vmem:[%s10637_s5 + $0x8] sm:$0xff]  }
 0x2a5   : > { %v9917_v16 = vadd.f32 %v7922_v26, %v3787_v12  ;;  %v7958_v21 = vpop.f32.mrf.mxu1  ;;  %8184 = vmatpush3.bf16.msra.mxu1 %v8939_v20 }
 0x2a6   : > { %v8052_v48 = vpop.f32.mrf.mxu0  ;;  %v7959_v33 = vadd.f32 %v7958_v21, %v7957_v62 }
 0x2a7   : > { %10650 = vst [vmem:[#allocation9_spill] sm:$0xff] %v9917_v16  ;;  %v8053_v43 = vadd.f32 %v8052_v48, %v8051_v36  ;;  %v7960_v61 = vpop.f32.mrf.mxu1 }
 0x2a8   : > { %v8054_v52 = vpop.f32.mrf.mxu0  ;;  %v9923_v57 = vadd.f32 %v7959_v33, %v9709_v35 }
 0x2a9   : > { %v9926_v11 = vadd.f32 %v8053_v43, %v9878_v34  ;;  %v7961_v15 = vpop.f32.mrf.mxu1 }
 0x2aa   : > { %v8055_v53 = vpop.f32.mrf.mxu0  ;;  %v7962_v6 = vadd.f32 %v7961_v15, %v7960_v61 }
 0x2ab   : > { %v8056_v35 = vadd.f32 %v8055_v53, %v8054_v52  ;;  %v7963_v0 = vpop.f32.mrf.mxu1 }
 0x2ac   : > { %v9937_v54 = vpop.f32.mrf.mxu0  ;;  %v9940_v34 = vadd.f32 %v7962_v6, %v9715_v46 }
 0x2ad   : > { %v9943_v50 = vadd.f32 %v8056_v35, %v9887_v19  ;;  %v7964_v56 = vpop.f32.mrf.mxu1  ;;  %v8942_v19 = vld [vmem:[%s10637_s5 + $0x40] sm:$0xff]  }
 0x2ae   : > { %v9945_v58 = vpop.f32.mrf.mxu0  ;;  %v7965_v59 = vadd.f32 %v7964_v56, %v7963_v0  ;;  %8185 = vmatprep.subr.bf16.mxu1 %v8942_v19 }
 0x2af   : > { %v7966_v23 = vpop.f32.mrf.mxu1  ;;  %8186 = vmatpush3.bf16.msra.mxu1 %v8943_v22 }
 0x2b0   : > { %v9947_v10 = vpop.f32.mrf.mxu0  ;;  %v9950_v29 = vadd.f32 %v7965_v59, %v9721_v55 }
 0x2b1   : > { %v7967_v46 = vpop.f32.mrf.mxu1 }
 0x2b2   : > { %v9955_v14 = vpop.f32.mrf.mxu0  ;;  %v7968_v31 = vadd.f32 %v7967_v46, %v7966_v23  ;;  %v8952_v23 = vld [vmem:[%s10637_s5 + $0x110] sm:$0xff]  }
 0x2b3   : > { %v7969_v12 = vpop.f32.mrf.mxu1  ;;  %8262 = vmatpush3.bf16.msra.mxu0 %v8952_v23 }
 0x2b4   : > { %v8063_v55 = vpop.f32.mrf.mxu0  ;;  %v9964_v26 = vadd.f32 %v7968_v31, %v9727_v5  ;;  %v8947_v5 = vld [vmem:[%s10637_s5 + $0xf8] sm:$0xff]  }
 0x2b5   : > { %v7970_v32 = vpop.f32.mrf.mxu1  ;;  %8211 = vmatprep.subr.bf16.mxu1 %v8947_v5 }
 0x2b6   : > { %v8064_v62 = vpop.f32.mrf.mxu0  ;;  %v7971_v36 = vadd.f32 %v7970_v32, %v7969_v12 }
 0x2b7   : > { %v8065_v21 = vadd.f32 %v8064_v62, %v8063_v55  ;;  %v7972_v48 = vpop.f32.mrf.mxu1 }
 0x2b8   : > { %v9966_v33 = vpop.f32.mrf.mxu0  ;;  %v9969_v43 = vadd.f32 %v7971_v36, %v9733_v41 }
 0x2b9   : > { %v9971_v61 = vadd.f32 %v8065_v21, %v4002_v7  ;;  %v7973_v52 = vpop.f32.mrf.mxu1 }
 0x2ba   : > { %v9973_v15 = vpop.f32.mrf.mxu0  ;;  %v7974_v53 = vadd.f32 %v7973_v52, %v7972_v48 }
 0x2bb   : > { %v7975_v40 = vpop.f32.mrf.mxu1 }
 0x2bc   : > { %v9978_v20 = vpop.f32.mrf.mxu0  ;;  %v9984_v41 = vadd.f32 %v7974_v53, %v9739_v18  ;;  %v8965_v53 = vld [vmem:[%s10637_s5 + $0x148] sm:$0xff]  }
 0x2bd   : > { %v7976_v7 = vpop.f32.mrf.mxu1  ;;  %8263 = vmatprep.subr.bf16.mxu0 %v8965_v53 }
 0x2be   : > { %v9986_v6 = vpop.f32.mrf.mxu0  ;;  %v7977_v35 = vadd.f32 %v7976_v7, %v7975_v40  ;;  %v8966_v40 = vld [vmem:[%s10637_s5 + $0x108] sm:$0xff]  }
 0x2bf   : > { %v7978_v0 = vpop.f32.mrf.mxu1  ;;  %8264 = vmatpush3.bf16.msra.mxu0 %v8966_v40 }
 0x2c0   : > { %v9988_v56 = vpop.f32.mrf.mxu0  ;;  %v9991_v59 = vadd.f32 %v7977_v35, %v9745_v9 }
 0x2c1   : > { %v7979_v3 = vpop.f32.mrf.mxu1 }
 0x2c2   : > { %v9996_v46 = vpop.f32.mrf.mxu0  ;;  %v7980_v18 = vadd.f32 %v7979_v3, %v7978_v0  ;;  %v8969_v3 = vld [vmem:[%s10637_s5 + $0x140] sm:$0xff]  }
 0x2c3   : > { %v7981_v19 = vpop.f32.mrf.mxu1  ;;  %8265 = vmatprep.subr.bf16.mxu0 %v8969_v3 }
 0x2c4   : > { %v9998_v22 = vpop.f32.mrf.mxu0  ;;  %v10001_v31 = vadd.f32 %v7980_v18, %v9751_v28  ;;  %v8970_v18 = vld [vmem:[%s10637_s5 + $0x100] sm:$0xff]  }
 0x2c5   : > { %v7982_v12 = vpop.f32.mrf.mxu1  ;;  %8266 = vmatpush3.bf16.msra.mxu0 %v8970_v18 }
 0x2c6   : > { %10651 = vst [vmem:[#allocation10_spill] sm:$0xff] %v10001_v31  ;;  %v10003_v55 = vpop.f32.mrf.mxu0  ;;  %v7983_v9 = vadd.f32 %v7982_v12, %v7981_v19  ;;  %v10039_v19 = vld [vmem:[%s10637_s5 + $0x238] sm:$0xff]  }
 0x2c7   : > { %v7984_v32 = vpop.f32.mrf.mxu1  ;;  %10654 = vst [vmem:[#allocation13_spill] sm:$0xff] %v10039_v19  ;;  %8527 = vmatprep.subr.bf16.mxu0 %v10039_v19 }
 0x2c8   : > { %v10005_v62 = vpop.f32.mrf.mxu0  ;;  %v10008_v36 = vadd.f32 %v7983_v9, %v9757_v2 }
 0x2c9   : > { %v7985_v21 = vpop.f32.mrf.mxu1 }
 0x2ca   : > { %v10010_v48 = vpop.f32.mrf.mxu0  ;;  %v7986_v52 = vadd.f32 %v7985_v21, %v7984_v32 }
 0x2cb   : > { %v7987_v28 = vpop.f32.mrf.mxu1 }
 0x2cc   : > { %v10015_v5 = vpop.f32.mrf.mxu0  ;;  %v10021_v17 = vadd.f32 %v7986_v52, %v9769_v25 }
 0x2cd   : > { %v7988_v2 = vpop.f32.mrf.mxu1 }
 0x2ce   : > { %10652 = vst [vmem:[#allocation11_spill] sm:$0xff] %v10021_v17  ;;  %v10023_v7 = vpop.f32.mrf.mxu0  ;;  %v7989_v35 = vadd.f32 %v7988_v2, %v7987_v28 }
 0x2cf   : > { %v7990_v0 = vpop.f32.mrf.mxu1 }
 0x2d0   : > { %v10025_v23 = vpop.f32.mrf.mxu0  ;;  %v10034_v25 = vadd.f32 %v7989_v35, %v9775_v30 }
 0x2d1   : > { %v7991_v12 = vpop.f32.mrf.mxu1 }
 0x2d2   : > { %10653 = vst [vmem:[#allocation12_spill] sm:$0xff] %v10034_v25  ;;  %v10041_v9 = vpop.f32.mrf.mxu0  ;;  %v7992_v32 = vadd.f32 %v7991_v12, %v7990_v0 }
 0x2d3   : > { %v7993_v21 = vpop.f32.mrf.mxu1 }
 0x2d4   : > { %v10043_v52 = vpop.f32.mrf.mxu0  ;;  %v10047_v53 = vadd.f32 %v7992_v32, %v9781_v13 }
 0x2d5   : > { %v7994_v30 = vpop.f32.mrf.mxu1 }
 0x2d6   : > { %10655 = vst [vmem:[#allocation14_spill] sm:$0xff] %v10047_v53  ;;  %v10049_v28 = vpop.f32.mrf.mxu0  ;;  %v7995_v40 = vadd.f32 %v7994_v30, %v7993_v21 }
 0x2d7   : > { %v7996_v2 = vpop.f32.mrf.mxu1 }
 0x2d8   : > { %v10051_v35 = vpop.f32.mrf.mxu0  ;;  %v10054_v16 = vadd.f32 %v7995_v40, %v9795_v38 }
 0x2d9   : > { %v7997_v0 = vpop.f32.mrf.mxu1 }
 0x2da   : > { %10656 = vst [vmem:[#allocation15_spill] sm:$0xff] %v10054_v16  ;;  %v10056_v3 = vpop.f32.mrf.mxu0  ;;  %v7998_v18 = vadd.f32 %v7997_v0, %v7996_v2 }
 0x2db   : > { %v7999_v12 = vpop.f32.mrf.mxu1 }
 0x2dc   : > { %v10058_v8 = vpop.f32.mrf.mxu0  ;;  %v10061_v13 = vadd.f32 %v7998_v18, %v9807_v60 }
 0x2dd   : > { %v8000_v32 = vpop.f32.mrf.mxu1 }
 0x2de   : > { %10657 = vst [vmem:[#allocation16_spill] sm:$0xff] %v10061_v13  ;;  %v10063_v19 = vpop.f32.mrf.mxu0  ;;  %v8001_v21 = vadd.f32 %v8000_v32, %v7999_v12 }
 0x2df   : > { %v8002_v30 = vpop.f32.mrf.mxu1 }
 0x2e0   : > { %v10065_v53 = vpop.f32.mrf.mxu0  ;;  %v10068_v38 = vadd.f32 %v8001_v21, %v9821_v63 }
 0x2e1   : > { %v8003_v40 = vpop.f32.mrf.mxu1 }
 0x2e2   : > { %10658 = vst [vmem:[#allocation17_spill] sm:$0xff] %v10068_v38  ;;  %v10070_v25 = vpop.f32.mrf.mxu0  ;;  %v8004_v2 = vadd.f32 %v8003_v40, %v8002_v30 }
 0x2e3   : > { %v8005_v0 = vpop.f32.mrf.mxu1 }
 0x2e4   : > { %v10072_v16 = vpop.f32.mrf.mxu0  ;;  %v10075_v60 = vadd.f32 %v8004_v2, %v9825_v44 }
 0x2e5   : > { %v8006_v18 = vpop.f32.mrf.mxu1 }
 0x2e6   : > { %10659 = vst [vmem:[#allocation18_spill] sm:$0xff] %v10075_v60  ;;  %v10077_v13 = vpop.f32.mrf.mxu0  ;;  %v8007_v12 = vadd.f32 %v8006_v18, %v8005_v0 }
 0x2e7   : > { %10660 = vst [vmem:[#allocation19_spill] sm:$0xff] %v10077_v13  ;;  %v8008_v32 = vpop.f32.mrf.mxu1 }
 0x2e8   : > { %v10079_v31 = vpop.f32.mrf.mxu0  ;;  %v10082_v63 = vadd.f32 %v8007_v12, %v9839_v37 }
 0x2e9   : > { %10661 = vst [vmem:[#allocation20_spill] sm:$0xff] %v10079_v31  ;;  %v8009_v21 = vpop.f32.mrf.mxu1 }
 0x2ea   : > { %10662 = vst [vmem:[#allocation21_spill] sm:$0xff] %v10082_v63  ;;  %v10084_v38 = vpop.f32.mrf.mxu0  ;;  %v8010_v30 = vadd.f32 %v8009_v21, %v8008_v32 }
 0x2eb   : > { %10663 = vst [vmem:[#allocation22_spill] sm:$0xff] %v10084_v38  ;;  %v8011_v40 = vpop.f32.mrf.mxu1 }
 0x2ec   : > { %v10086_v17 = vpop.f32.mrf.mxu0  ;;  %v10089_v44 = vadd.f32 %v8010_v30, %v9849_v42 }
 0x2ed   : > { %v8012_v2 = vpop.f32.mrf.mxu1 }
 0x2ee   : > { %10664 = vst [vmem:[#allocation23_spill] sm:$0xff] %v10089_v44  ;;  %v10091_v60 = vpop.f32.mrf.mxu0  ;;  %v8013_v0 = vadd.f32 %v8012_v2, %v8011_v40 }
 0x2ef   : > { %v8014_v18 = vpop.f32.mrf.mxu1 }
 0x2f0   : > { %v10093_v13 = vpop.f32.mrf.mxu0  ;;  %v10096_v37 = vadd.f32 %v8013_v0, %v9861_v4 }
 0x2f1   : > { %v8015_v12 = vpop.f32.mrf.mxu1 }
 0x2f2   : > { %10665 = vst [vmem:[#allocation24_spill] sm:$0xff] %v10096_v37  ;;  %v10098_v63 = vpop.f32.mrf.mxu0  ;;  %v8016_v32 = vadd.f32 %v8015_v12, %v8014_v18 }
 0x2f3   : > { %10666 = vst [vmem:[#allocation25_spill] sm:$0xff] %v10098_v63  ;;  %v8017_v21 = vpop.f32.mrf.mxu1 }
 0x2f4   : > { %v10100_v38 = vpop.f32.mrf.mxu0  ;;  %v10103_v42 = vadd.f32 %v8016_v32, %v9864_v49 }
 0x2f5   : > { %v8018_v30 = vpop.f32.mrf.mxu1 }
 0x2f6   : > { %10667 = vst [vmem:[#allocation26_spill] sm:$0xff] %v10103_v42  ;;  %v10105_v44 = vpop.f32.mrf.mxu0  ;;  %v8019_v40 = vadd.f32 %v8018_v30, %v8017_v21 }
 0x2f7   : > { %10668 = vst [vmem:[#allocation27_spill] sm:$0xff] %v10105_v44  ;;  %v8020_v2 = vpop.f32.mrf.mxu1 }
 0x2f8   : > { %v10107_v31 = vpop.f32.mrf.mxu0  ;;  %v10110_v4 = vadd.f32 %v8019_v40, %v9875_v1 }
 0x2f9   : > { %v8021_v0 = vpop.f32.mrf.mxu1 }
 0x2fa   : > { %10669 = vst [vmem:[#allocation28_spill] sm:$0xff] %v10110_v4  ;;  %v10112_v37 = vpop.f32.mrf.mxu0  ;;  %v8022_v18 = vadd.f32 %v8021_v0, %v8020_v2 }
 0x2fb   : > { %10670 = vst [vmem:[#allocation29_spill] sm:$0xff] %v10112_v37  ;;  %v8023_v12 = vpop.f32.mrf.mxu1 }
 0x2fc   : > { %v10114_v63 = vpop.f32.mrf.mxu0  ;;  %v10117_v49 = vadd.f32 %v8022_v18, %v9884_v39 }
 0x2fd   : > { %v8024_v32 = vpop.f32.mrf.mxu1 }
 0x2fe   : > { %10671 = vst [vmem:[#allocation30_spill] sm:$0xff] %v10117_v49  ;;  %v10119_v42 = vpop.f32.mrf.mxu0  ;;  %v8025_v21 = vadd.f32 %v8024_v32, %v8023_v12 }
 0x2ff   : > { %v8026_v30 = vpop.f32.mrf.mxu1 }
 0x300   : > { %v10121_v44 = vpop.f32.mrf.mxu0  ;;  %v10124_v1 = vadd.f32 %v8025_v21, %v9892_v24  ;;  %v8059_v24 = vadd.f32 %v9945_v58, %v9937_v54  ;;  %v8071_v54 = vadd.f32 %v9986_v6, %v9978_v20 }
 0x301   : > { %v8027_v40 = vpop.f32.mrf.mxu1 }
 0x302   : > { %10672 = vst [vmem:[#allocation31_spill] sm:$0xff] %v10124_v1  ;;  %v10126_v4 = vpop.f32.mrf.mxu0  ;;  %v8028_v2 = vadd.f32 %v8027_v40, %v8026_v30  ;;  %v8062_v30 = vadd.f32 %v9955_v14, %v9947_v10  ;;  %v8074_v10 = vadd.f32 %v9996_v46, %v9988_v56 }
 0x303   : > { %v10128_v0 = vpop.f32.mrf.mxu1 }
 0x304   : > { %10673 = vst [vmem:[#allocation32_spill] sm:$0xff] %v10128_v0  ;;  %v10130_v37 = vpop.f32.mrf.mxu0  ;;  %v10133_v39 = vadd.f32 %v8028_v2, %v9898_v51  ;;  %v4155_v51 = vadd.f32 %v8059_v24, %v9895_v45  ;;  %v4158_v49 = vadd.f32 %v8062_v30, %v9901_v47  ;;  %v8068_v47 = vadd.f32 %v9973_v15, %v9966_v33 }
 0x305   : > { %v10135_v18 = vpop.f32.mrf.mxu1  ;;  %v4174_v56 = vadd.f32 %v8074_v10, %v9940_v34  ;;  %v8083_v33 = vadd.f32 %v10023_v7, %v10015_v5 }
 0x306   : > { %10674 = vst [vmem:[#allocation33_spill] sm:$0xff] %v10133_v39  ;;  %10675 = vst [vmem:[#allocation34_spill] sm:$0xff] %v10135_v18  ;;  %v10137_v12 = vpop.f32.mrf.mxu0 }
 0x307   : > { %v10139_v32 = vpop.f32.mrf.mxu1 }
 0x308   : > { %10676 = vst [vmem:[#allocation35_spill] sm:$0xff] %v10139_v32  ;;  %v10147_v40 = vpop.f32.mrf.mxu0 }
 0x309   : > { %v10143_v21 = vpop.f32.mrf.mxu1  ;;  %10678 = vst [vmem:[#allocation37_spill] sm:$0xff] %v10147_v40 }
 0x30a   : > { %10677 = vst [vmem:[#allocation36_spill] sm:$0xff] %v10143_v21  ;;  %v10151_v18 = vpop.f32.mrf.mxu0 }
 0x30b   : > { %v8497_v1 = vpop.f32.mrf.mxu1 }
 0x30c   : > { %v4316_v39 = vadd.f32 %v8497_v1, %v4155_v51  ;;  %v10161_v1 = vpop.f32.mrf.mxu0 }
 0x30d   : > { %v4307_v2 = vpop.f32.mrf.mxu1 }
 0x30e   : > { %v4308_v58 = vadd.f32 %v4307_v2, %v9926_v11  ;;  %v4436_v14 = vmax.f32 %v4316_v39, 0.0  ;;  %v4171_v11 = vadd.f32 %v8071_v54, %v9923_v57  ;;  %v10165_v46 = vpop.f32.mrf.mxu0  ;;  %v4166_v39 = vadd.f32 %v8068_v47, %v9920_v27 }
 0x30f   : > { %v8498_v32 = vpop.f32.mrf.mxu1  ;;  %v8077_v57 = vadd.f32 %v10003_v55, %v9998_v22  ;;  %v4187_v27 = vadd.f32 %v8083_v33, %v9969_v43 }
 0x310   : > { %v4319_v21 = vadd.f32 %v8498_v32, %v4158_v49  ;;  %v4434_v30 = vmax.f32 %v4308_v58, 0.0  ;;  %v8080_v58 = vadd.f32 %v10010_v48, %v10005_v62  ;;  %v10177_v5 = vpop.f32.mrf.mxu0 }
 0x311   : > { %v4310_v0 = vpop.f32.mrf.mxu1  ;;  %v4179_v62 = vadd.f32 %v8077_v57, %v9950_v29  ;;  %v8089_v29 = vadd.f32 %v10049_v28, %v10043_v52 }
 0x312   : > { %v4437_v40 = vmax.f32 %v4319_v21, 0.0  ;;  %v4311_v45 = vadd.f32 %v4310_v0, %v9943_v50 }
 0x313   : > { %v8501_v24 = vpop.f32.mrf.mxu1 }
 0x314   : > { %v7512_v51 = vpack.c.bf16 %v4437_v40, %v4436_v14  ;;  %v4435_v20 = vmax.f32 %v4311_v45, 0.0  ;;  %v4332_v32 = vadd.f32 %v8501_v24, %v4171_v11  ;;  %v8086_v40 = vadd.f32 %v10041_v9, %v10025_v23 }
 0x315   : > { %v4323_v6 = vpop.f32.mrf.mxu1  ;;  %v8095_v11 = vadd.f32 %v10063_v19, %v10058_v8  ;;  %v8092_v8 = vadd.f32 %v10056_v3, %v10051_v35 }
 0x316   : > { %7644 = vst [vmem:[#allocation4 + $0x8] sm:$0xff] %v7512_v51   ;;  %v7507_v49 = vpack.c.bf16 %v4435_v20, %v4434_v30  ;;  %v4324_v15 = vadd.f32 %v4323_v6, %v9971_v61  ;;  %v4440_v34 = vmax.f32 %v4332_v32, 0.0  ;;  %v4190_v48 = vadd.f32 %v8086_v40, %v9984_v41  ;;  %v10182_v30 = vpop.f32.mrf.mxu0 }
 0x317   : > { %v8502_v50 = vpop.f32.mrf.mxu1  ;;  %v4182_v32 = vadd.f32 %v8080_v58, %v9964_v26  ;;  %v4203_v26 = vadd.f32 %v8095_v11, %v10008_v36  ;;  %v8107_v36 = vadd.f32 %v10091_v60, %v10086_v17  ;;  %v8948_v17 = vld [vmem:[%s10637_s5 + $0xb8] sm:$0xff]   ;;  %v10682_v60 = vld [vmem:[#allocation25_spill] sm:$0xff] }
 0x318   : > { %7508 = vst [vmem:[#allocation4] sm:$0xff] %v7507_v49   ;;  %v4335_v0 = vadd.f32 %v8502_v50, %v4174_v56  ;;  %v4438_v61 = vmax.f32 %v4324_v15, 0.0  ;;  %v8098_v56 = vadd.f32 %v10070_v25, %v10065_v53  ;;  %v10193_v19 = vpop.f32.mrf.mxu0 }
 0x319   : > { %v4326_v21 = vpop.f32.mrf.mxu1 }
 0x31a   : > { %v4441_v2 = vmax.f32 %v4335_v0, 0.0  ;;  %v4327_v54 = vadd.f32 %v4326_v21, %v4166_v39  ;;  %v10198_v3 = vpop.f32.mrf.mxu0 }
 0x31b   : > { %v8505_v7 = vpop.f32.mrf.mxu1 }
 0x31c   : > { %v7522_v10 = vpack.c.bf16 %v4441_v2, %v4440_v34  ;;  %v4439_v14 = vmax.f32 %v4327_v54, 0.0  ;;  %v4348_v24 = vadd.f32 %v8505_v7, %v4187_v27  ;;  %v4195_v34 = vadd.f32 %v8089_v29, %v9991_v59  ;;  %v10679_v2 = vld [vmem:[#allocation11_spill] sm:$0xff] }
 0x31d   : > { %v4628_v45 = vld [vmem:[#allocation4 + $0x8] sm:$0xf]  ;;  %v4629_v22 = vld [vmem:[#allocation4 + $0xc] sm:$0xf]  ;;  %v4339_v47 = vpop.f32.mrf.mxu1  ;;  %v4206_v35 = vadd.f32 %v8098_v56, %v10679_v2  ;;  %v10685_v56 = vld [vmem:[#allocation15_spill] sm:$0xff]  ;;  %v8119_v2 = vadd.f32 %v10119_v42, %v10114_v63 }
 0x31e   : > { %v4642_v55 = vld [vmem:[#allocation4 + $0x8] sm:$0xf]  ;;  %4632 = vst [vmem:[#allocation5 + $0x48] sm:$0xf] %v4628_v45  ;;  %4633 = vst [vmem:[#allocation5 + $0x6c] sm:$0xf] %v4629_v22  ;;  %v7517_v9 = vpack.c.bf16 %v4439_v14, %v4438_v61  ;;  %v4340_v6 = vadd.f32 %v4339_v47, %v4179_v62 }
 0x31f   : > { %v4643_v23 = vld [vmem:[#allocation4 + $0xc] sm:$0xf]  ;;  %4646 = vst [vmem:[#allocation5 + $0x4] sm:$0xf] %v4642_v55  ;;  %7646 = vst [vmem:[#allocation4 + $0x18] sm:$0xff] %v7522_v10   ;;  %v8506_v20 = vpop.f32.mrf.mxu1  ;;  %v4444_v50 = vmax.f32 %v4348_v24, 0.0  ;;  %v8110_v24 = vadd.f32 %v10682_v60, %v10093_v13 }
 0x320   : > { %4647 = vst [vmem:[#allocation5 + $0x28] sm:$0xf] %v4643_v23  ;;  %v4626_v51 = vld [vmem:[#allocation4] sm:$0xf]  ;;  %v4627_v43 = vld [vmem:[#allocation4 + $0x4] sm:$0xf]  ;;  %v4351_v49 = vadd.f32 %v8506_v20, %v4190_v48 }
 0x321   : > { %4630 = vst [vmem:[#allocation5] sm:$0xf] %v4626_v51  ;;  %4631 = vst [vmem:[#allocation5 + $0x24] sm:$0xf] %v4627_v43  ;;  %v4342_v41 = vpop.f32.mrf.mxu1  ;;  %v4442_v39 = vmax.f32 %v4340_v6, 0.0  ;;  %v10680_v45 = vld [vmem:[#allocation10_spill] sm:$0xff]  ;;  %v10215_v6 = vpop.f32.mrf.mxu0 }
 0x322   : > { %7645 = vst [vmem:[#allocation4 + $0x10] sm:$0xff] %v7517_v9   ;;  %v4445_v33 = vmax.f32 %v4351_v49, 0.0  ;;  %v4343_v15 = vadd.f32 %v4342_v41, %v4182_v32  ;;  %v4198_v59 = vadd.f32 %v8092_v8, %v10680_v45  ;;  %v10681_v22 = vld [vmem:[#allocation19_spill] sm:$0xff]  ;;  %v8949_v43 = vld [vmem:[%s10637_s5 + $0xf0] sm:$0xff]   ;;  %v10683_v20 = vld [vmem:[#allocation20_spill] sm:$0xff] }
 0x323   : > { %v8509_v0 = vpop.f32.mrf.mxu1  ;;  %v8101_v55 = vadd.f32 %v10681_v22, %v10072_v16  ;;  %v10684_v16 = vld [vmem:[#allocation22_spill] sm:$0xff]  ;;  %v10689_v42 = vld [vmem:[#allocation27_spill] sm:$0xff] }
 0x324   : > { %v7532_v57 = vpack.c.bf16 %v4445_v33, %v4444_v50  ;;  %v4443_v21 = vmax.f32 %v4343_v15, 0.0  ;;  %v4364_v53 = vadd.f32 %v8509_v0, %v4203_v26  ;;  %v8104_v11 = vadd.f32 %v10684_v16, %v10683_v20  ;;  %v8951_v13 = vld [vmem:[%s10637_s5 + $0xb0] sm:$0xff]   ;;  %v8956_v33 = vld [vmem:[%s10637_s5 + $0xe8] sm:$0xff]   ;;  %v8958_v20 = vld [vmem:[%s10637_s5 + $0xe0] sm:$0xff]  }
 0x325   : > { %v4355_v28 = vpop.f32.mrf.mxu1  ;;  %v4219_v50 = vadd.f32 %v8107_v36, %v10685_v56  ;;  %v8113_v22 = vadd.f32 %v10689_v42, %v10100_v38  ;;  %v10690_v38 = vld [vmem:[#allocation21_spill] sm:$0xff] }
 0x326   : > { %v4660_v40 = vld [vmem:[#allocation4 + $0x18] sm:$0xf]  ;;  %v4661_v52 = vld [vmem:[#allocation4 + $0x1c] sm:$0xf]  ;;  %7648 = vst [vmem:[#allocation4 + $0x28] sm:$0xff] %v7532_v57   ;;  %v7527_v25 = vpack.c.bf16 %v4443_v21, %v4442_v39  ;;  %v4356_v14 = vadd.f32 %v4355_v28, %v4195_v34  ;;  %v4448_v62 = vmax.f32 %v4364_v53, 0.0 }
 0x327   : > { %4664 = vst [vmem:[#allocation5 + $0x50] sm:$0xf] %v4660_v40  ;;  %4665 = vst [vmem:[#allocation5 + $0x74] sm:$0xf] %v4661_v52  ;;  %v8510_v61 = vpop.f32.mrf.mxu1  ;;  %v8946_v9 = vld [vmem:[#allocation5 + $0x4] ss:$36 sps:$4 sm:$0xff]  }
 0x328   : > { %7647 = vst [vmem:[#allocation4 + $0x20] sm:$0xff] %v7527_v25   ;;  %v4367_v27 = vadd.f32 %v8510_v61, %v4206_v35  ;;  %v8944_v23 = vld [vmem:[#allocation5] ss:$36 sps:$4 sm:$0xff]   ;;  %5609 = vmatprep.mubr.bf16.mxu1 %v8946_v9  ;;  %v4446_v32 = vmax.f32 %v4356_v14, 0.0  ;;  %v10228_v35 = vpop.f32.mrf.mxu0 }
 0x329   : > { %v4644_v54 = vld [vmem:[#allocation4 + $0x10] sm:$0xf]  ;;  %v4645_v58 = vld [vmem:[#allocation4 + $0x14] sm:$0xf]  ;;  %v4358_v47 = vpop.f32.mrf.mxu1  ;;  %5610 = vmatmul.mubr.bf16.vlgmr.msra.gmra.mxu1 %v8944_v23  ;;  %v10686_v28 = vld [vmem:[#allocation12_spill] sm:$0xff]  ;;  %v8122_v23 = vadd.f32 %v10126_v4, %v10121_v44 }
 0x32a   : > { %v4658_v7 = vld [vmem:[#allocation4 + $0x10] sm:$0xf]  ;;  %4648 = vst [vmem:[#allocation5 + $0x4c] sm:$0xf] %v4644_v54  ;;  %4649 = vst [vmem:[#allocation5 + $0x70] sm:$0xf] %v4645_v58  ;;  %v4359_v51 = vadd.f32 %v4358_v47, %v4198_v59  ;;  %8212 = vmatpush3.bf16.msra.mxu1 %v8948_v17  ;;  %v4211_v25 = vadd.f32 %v8101_v55, %v10686_v28 }
 0x32b   : > { %v4659_v10 = vld [vmem:[#allocation4 + $0x14] sm:$0xf]  ;;  %4662 = vst [vmem:[#allocation5 + $0x8] sm:$0xf] %v4658_v7  ;;  %v4449_v48 = vmax.f32 %v4367_v27, 0.0  ;;  %v8513_v49 = vpop.f32.mrf.mxu1  ;;  %8213 = vmatprep.subr.bf16.mxu1 %v8949_v43  ;;  %v10687_v53 = vld [vmem:[#allocation16_spill] sm:$0xff] }
 0x32c   : > { %4663 = vst [vmem:[#allocation5 + $0x2c] sm:$0xf] %v4659_v10  ;;  %v4447_v41 = vmax.f32 %v4359_v51, 0.0  ;;  %v4380_v52 = vadd.f32 %v8513_v49, %v4219_v50  ;;  %v4222_v34 = vadd.f32 %v8110_v24, %v10687_v53  ;;  %v10688_v59 = vld [vmem:[#allocation14_spill] sm:$0xff]  ;;  %v8953_v47 = vld [vmem:[#allocation5 + $0x48] ss:$36 sps:$4 sm:$0xff]   ;;  %v4235_v51 = vadd.f32 %v8119_v2, %v10690_v38 }
 0x32d   : > { %v7542_v29 = vpack.c.bf16 %v4449_v48, %v4448_v62  ;;  %v4636_v15 = vld [vmem:[#allocation4 + $0x28] sm:$0xf]  ;;  %v4637_v8 = vld [vmem:[#allocation4 + $0x2c] sm:$0xf]  ;;  %v4371_v39 = vpop.f32.mrf.mxu1  ;;  %v4214_v63 = vadd.f32 %v8104_v11, %v10688_v59  ;;  %v10238_v48 = vpop.f32.mrf.mxu0  ;;  %v10698_v38 = vld [vmem:[#allocation34_spill] sm:$0xff] }
 0x32e   : > { %v4650_v0 = vld [vmem:[#allocation4 + $0x28] sm:$0xf]  ;;  %4640 = vst [vmem:[#allocation5 + $0xd8] sm:$0xf] %v4636_v15  ;;  %4641 = vst [vmem:[#allocation5 + $0xfc] sm:$0xf] %v4637_v8  ;;  %v7537_v40 = vpack.c.bf16 %v4447_v41, %v4446_v32  ;;  %v4372_v27 = vadd.f32 %v4371_v39, %v4211_v25  ;;  %8214 = vmatpush3.bf16.msra.mxu1 %v8951_v13  ;;  %v8131_v25 = vadd.f32 %v10165_v46, %v10161_v1 }
 0x32f   : > { %v4651_v57 = vld [vmem:[#allocation4 + $0x2c] sm:$0xf]  ;;  %4654 = vst [vmem:[#allocation5 + $0x94] sm:$0xf] %v4650_v0  ;;  %v4676_v21 = vld [vmem:[#allocation4 + $0x28] sm:$0xf]  ;;  %v8514_v61 = vpop.f32.mrf.mxu1  ;;  %8215 = vmatprep.subr.bf16.mxu1 %v8956_v33 }
 0x330   : > { %v4677_v26 = vld [vmem:[#allocation4 + $0x2c] sm:$0xf]  ;;  %7650 = vst [vmem:[#allocation4 + $0x38] sm:$0xff] %v7542_v29   ;;  %4655 = vst [vmem:[#allocation5 + $0xb8] sm:$0xf] %v4651_v57  ;;  %v4383_v45 = vadd.f32 %v8514_v61, %v4222_v34  ;;  %v4452_v9 = vmax.f32 %v4380_v52, 0.0 }
 0x331   : > { %4680 = vst [vmem:[#allocation5 + $0x54] sm:$0xf] %v4676_v21  ;;  %4681 = vst [vmem:[#allocation5 + $0x78] sm:$0xf] %v4677_v26  ;;  %v4690_v54 = vld [vmem:[#allocation4 + $0x28] sm:$0xf]  ;;  %v4374_v55 = vpop.f32.mrf.mxu1  ;;  %v10254_v21 = vpop.f32.mrf.mxu0 }
 0x332   : > { %v4691_v58 = vld [vmem:[#allocation4 + $0x2c] sm:$0xf]  ;;  %v4634_v7 = vld [vmem:[#allocation4 + $0x20] sm:$0xf]  ;;  %4694 = vst [vmem:[#allocation5 + $0x10] sm:$0xf] %v4690_v54  ;;  %v4375_v60 = vadd.f32 %v4374_v55, %v4214_v63 }
 0x333   : > { %4695 = vst [vmem:[#allocation5 + $0x34] sm:$0xf] %v4691_v58  ;;  %v4635_v36 = vld [vmem:[#allocation4 + $0x24] sm:$0xf]  ;;  %4638 = vst [vmem:[#allocation5 + $0x90] sm:$0xf] %v4634_v7  ;;  %v8517_v43 = vpop.f32.mrf.mxu1 }
 0x334   : > { %v4674_v10 = vld [vmem:[#allocation4 + $0x20] sm:$0xf]  ;;  %v4675_v14 = vld [vmem:[#allocation4 + $0x24] sm:$0xf]  ;;  %7649 = vst [vmem:[#allocation4 + $0x30] sm:$0xff] %v7537_v40   ;;  %v4453_v17 = vmax.f32 %v4383_v45, 0.0  ;;  %v4396_v50 = vadd.f32 %v8517_v43, %v4235_v51  ;;  %v8134_v45 = vadd.f32 %v10182_v30, %v10177_v5 }
 0x335   : > { %4639 = vst [vmem:[#allocation5 + $0xb4] sm:$0xf] %v4635_v36  ;;  %4678 = vst [vmem:[#allocation5 + $0xc] sm:$0xf] %v4674_v10  ;;  %v8955_v24 = vld [vmem:[#allocation5 + $0x4c] ss:$36 sps:$4 sm:$0xff]   ;;  %v4387_v13 = vpop.f32.mrf.mxu1 }
 0x336   : > { %4679 = vst [vmem:[#allocation5 + $0x30] sm:$0xf] %v4675_v14  ;;  %v8957_v62 = vld [vmem:[%s10637_s5 + $0xa8] sm:$0xff]   ;;  %v4450_v16 = vmax.f32 %v4372_v27, 0.0  ;;  %v7552_v11 = vpack.c.bf16 %v4453_v17, %v4452_v9  ;;  %v4451_v49 = vmax.f32 %v4375_v60, 0.0  ;;  %5617 = vmatprep.mubr.bf16.mxu1 %v8955_v24  ;;  %v8959_v32 = vld [vmem:[%s10637_s5 + $0xa0] sm:$0xff]   ;;  %v8125_v27 = vadd.f32 %v10137_v12, %v10130_v37 }
 0x337   : > { %v10691_v44 = vld [vmem:[#allocation29_spill] sm:$0xff]  ;;  %v4668_v29 = vld [vmem:[#allocation4 + $0x38] sm:$0xf]  ;;  %v4669_v41 = vld [vmem:[#allocation4 + $0x3c] sm:$0xf]  ;;  %5618 = vmatmul.mubr.bf16.gmra.mxu1 %v8953_v47  ;;  %v8518_v28 = vpop.f32.mrf.mxu1  ;;  %v4456_v46 = vmax.f32 %v4396_v50, 0.0 }
 0x338   : > { %v8116_v4 = vadd.f32 %v10691_v44, %v10107_v31  ;;  %v4708_v56 = vld [vmem:[#allocation4 + $0x38] sm:$0xf]  ;;  %4672 = vst [vmem:[#allocation5 + $0xe0] sm:$0xf] %v4668_v29  ;;  %4673 = vst [vmem:[#allocation5 + $0x104] sm:$0xf] %v4669_v41  ;;  %v7547_v15 = vpack.c.bf16 %v4451_v49, %v4450_v16  ;;  %8216 = vmatpush3.bf16.msra.mxu1 %v8957_v62 }
 0x339   : > { %v8963_v33 = vld [vmem:[%s10637_s5 + $0xd8] sm:$0xff]   ;;  %4712 = vst [vmem:[#allocation5 + $0x5c] sm:$0xf] %v4708_v56  ;;  %7652 = vst [vmem:[#allocation4 + $0x48] sm:$0xff] %v7552_v11   ;;  %v10692_v8 = vld [vmem:[#allocation17_spill] sm:$0xff]  ;;  %8217 = vmatprep.subr.bf16.mxu1 %v8958_v20  ;;  %v4390_v14 = vpop.f32.mrf.mxu1 }
 0x33a   : > { %v4709_v31 = vld [vmem:[#allocation4 + $0x3c] sm:$0xf]  ;;  %v4227_v0 = vadd.f32 %v8113_v22, %v10692_v8  ;;  %7651 = vst [vmem:[#allocation4 + $0x40] sm:$0xff] %v7547_v15   ;;  %v10694_v7 = vld [vmem:[#allocation18_spill] sm:$0xff]  ;;  %v10695_v55 = vld [vmem:[#allocation37_spill] sm:$0xff] }
 0x33b   : > { %v10693_v39 = vld [vmem:[#allocation23_spill] sm:$0xff]  ;;  %4713 = vst [vmem:[#allocation5 + $0x80] sm:$0xf] %v4709_v31  ;;  %v4652_v26 = vld [vmem:[#allocation4 + $0x30] sm:$0xf]  ;;  %v4230_v61 = vadd.f32 %v8116_v4, %v10694_v7  ;;  %v8128_v47 = vadd.f32 %v10151_v18, %v10695_v55  ;;  %v8521_v9 = vpop.f32.mrf.mxu1  ;;  %v10696_v30 = vld [vmem:[#allocation28_spill] sm:$0xff] }
 0x33c   : > { %v4238_v57 = vadd.f32 %v8122_v23, %v10693_v39  ;;  %v4653_v40 = vld [vmem:[#allocation4 + $0x34] sm:$0xf]  ;;  %v4666_v52 = vld [vmem:[#allocation4 + $0x30] sm:$0xf]  ;;  %4656 = vst [vmem:[#allocation5 + $0xdc] sm:$0xf] %v4652_v26  ;;  %v4388_v54 = vadd.f32 %v4387_v13, %v4227_v0  ;;  %8218 = vmatpush3.bf16.msra.mxu1 %v8959_v32  ;;  %v8144_v23 = vpop.f32.mrf.mxu0  ;;  %v4251_v60 = vadd.f32 %v8131_v25, %v10696_v30 }
 0x33d   : > { %4657 = vst [vmem:[#allocation5 + $0x100] sm:$0xf] %v4653_v40  ;;  %v4667_v53 = vld [vmem:[#allocation4 + $0x34] sm:$0xf]  ;;  %4670 = vst [vmem:[#allocation5 + $0x98] sm:$0xf] %v4666_v52  ;;  %v4391_v63 = vadd.f32 %v4390_v14, %v4230_v61  ;;  %8219 = vmatprep.subr.bf16.mxu1 %v8963_v33  ;;  %v4403_v44 = vpop.f32.mrf.mxu1  ;;  %v8143_v40 = vadd.f32 %v10254_v21, %v10238_v48  ;;  %v8137_v48 = vadd.f32 %v10198_v3, %v10193_v19 }
 0x33e   : > { %v4692_v34 = vld [vmem:[#allocation4 + $0x30] sm:$0xf]  ;;  %v4693_v2 = vld [vmem:[#allocation4 + $0x34] sm:$0xf]  ;;  %v4399_v58 = vadd.f32 %v8518_v28, %v4238_v57  ;;  %v8964_v36 = vld [vmem:[%s10637_s5 + $0x98] sm:$0xff]   ;;  %v4454_v12 = vmax.f32 %v4388_v54, 0.0  ;;  %v4412_v29 = vadd.f32 %v8521_v9, %v4251_v60  ;;  %v8145_v8 = vpop.f32.mrf.mxu0  ;;  %v8140_v19 = vadd.f32 %v10228_v35, %v10215_v6 }
 0x33f   : > { %4671 = vst [vmem:[#allocation5 + $0xbc] sm:$0xf] %v4667_v53  ;;  %4696 = vst [vmem:[#allocation5 + $0x58] sm:$0xf] %v4692_v34  ;;  %v4706_v10 = vld [vmem:[#allocation4 + $0x30] sm:$0xf]  ;;  %v8522_v26 = vpop.f32.mrf.mxu1 }
 0x340   : > { %4697 = vst [vmem:[#allocation5 + $0x7c] sm:$0xf] %v4693_v2  ;;  %v4707_v1 = vld [vmem:[#allocation4 + $0x34] sm:$0xf]  ;;  %4710 = vst [vmem:[#allocation5 + $0x14] sm:$0xf] %v4706_v10  ;;  %8220 = vmatpush3.bf16.msra.mxu1 %v8964_v36  ;;  %v8146_v10 = vadd.f32 %v8145_v8, %v8144_v23 }
 0x341   : > { %4711 = vst [vmem:[#allocation5 + $0x38] sm:$0xf] %v4707_v1  ;;  %v4457_v59 = vmax.f32 %v4399_v58, 0.0  ;;  %v8960_v42 = vld [vmem:[#allocation5 + $0x90] ss:$36 sps:$4 sm:$0xff]   ;;  %v4455_v5 = vmax.f32 %v4391_v63, 0.0  ;;  %v4406_v21 = vpop.f32.mrf.mxu1 }
 0x342   : > { %v8962_v22 = vld [vmem:[#allocation5 + $0x94] ss:$36 sps:$4 sm:$0xff]   ;;  %v10697_v62 = vld [vmem:[#allocation32_spill] sm:$0xff]  ;;  %v4684_v51 = vld [vmem:[#allocation4 + $0x48] sm:$0xf]  ;;  %v4460_v1 = vmax.f32 %v4412_v29, 0.0 }
 0x343   : > { %v8967_v37 = vld [vmem:[%s10637_s5 + $0xd0] sm:$0xff]   ;;  %v7562_v17 = vpack.c.bf16 %v4457_v59, %v4456_v46  ;;  %5625 = vmatprep.mubr.bf16.mxu1 %v8962_v22  ;;  %v8031_v18 = vadd.f32 %v10698_v38, %v10697_v62  ;;  %v4685_v43 = vld [vmem:[#allocation4 + $0x4c] sm:$0xf]  ;;  %v4698_v20 = vld [vmem:[#allocation4 + $0x48] sm:$0xf]  ;;  %v7557_v32 = vpack.c.bf16 %v4455_v5, %v4454_v12  ;;  %v8525_v22 = vpop.f32.mrf.mxu1 }
 0x344   : > { %v8968_v24 = vld [vmem:[%s10637_s5 + $0x90] sm:$0xff]   ;;  %5626 = vmatmul.mubr.bf16.gmra.mxu1 %v8960_v42  ;;  %v8974_v4 = vld [vmem:[%s10637_s5 + $0xc8] sm:$0xff]   ;;  %4688 = vst [vmem:[#allocation5 + $0xe4] sm:$0xf] %v4684_v51  ;;  %4689 = vst [vmem:[#allocation5 + $0x108] sm:$0xf] %v4685_v43  ;;  %8221 = vmatprep.subr.bf16.mxu1 %v8967_v37 }
 0x345   : > { %v4699_v16 = vld [vmem:[#allocation4 + $0x4c] sm:$0xf]  ;;  %4702 = vst [vmem:[#allocation5 + $0xa0] sm:$0xf] %v4698_v20  ;;  %v4724_v11 = vld [vmem:[#allocation4 + $0x48] sm:$0xf]  ;;  %8222 = vmatpush3.bf16.msra.mxu1 %v8968_v24  ;;  %v4419_v62 = vpop.f32.mrf.mxu1 }
 0x346   : > { %v4725_v49 = vld [vmem:[#allocation4 + $0x4c] sm:$0xf]  ;;  %7654 = vst [vmem:[#allocation4 + $0x58] sm:$0xff] %v7562_v17   ;;  %v10699_v41 = vld [vmem:[#allocation24_spill] sm:$0xff]  ;;  %v10700_v50 = vld [vmem:[#allocation30_spill] sm:$0xff]  ;;  %8223 = vmatprep.subr.bf16.mxu1 %v8974_v4 }
 0x347   : > { %v4243_v56 = vadd.f32 %v8125_v27, %v10699_v41  ;;  %v4254_v13 = vadd.f32 %v8134_v45, %v10700_v50  ;;  %v10701_v33 = vld [vmem:[#allocation35_spill] sm:$0xff]  ;;  %v10702_v31 = vld [vmem:[#allocation36_spill] sm:$0xff]  ;;  %4703 = vst [vmem:[#allocation5 + $0xc4] sm:$0xf] %v4699_v16  ;;  %4728 = vst [vmem:[#allocation5 + $0x60] sm:$0xf] %v4724_v11  ;;  %v8526_v11 = vpop.f32.mrf.mxu1 }
 0x348   : > { %v8034_v15 = vadd.f32 %v10702_v31, %v10701_v33  ;;  %4729 = vst [vmem:[#allocation5 + $0x84] sm:$0xf] %v4725_v49  ;;  %v4738_v0 = vld [vmem:[#allocation4 + $0x48] sm:$0xf]  ;;  %v4739_v39 = vld [vmem:[#allocation4 + $0x4c] sm:$0xf] }
 0x349   : > { %v4682_v57 = vld [vmem:[#allocation4 + $0x40] sm:$0xf]  ;;  %4742 = vst [vmem:[#allocation5 + $0x1c] sm:$0xf] %v4738_v0  ;;  %4743 = vst [vmem:[#allocation5 + $0x40] sm:$0xf] %v4739_v39  ;;  %v4404_v53 = vadd.f32 %v4403_v44, %v4243_v56  ;;  %v4415_v34 = vadd.f32 %v8522_v26, %v4254_v13  ;;  %v4422_v0 = vpop.f32.mrf.mxu1 }
 0x34a   : > { %v4683_v52 = vld [vmem:[#allocation4 + $0x44] sm:$0xf]  ;;  %4686 = vst [vmem:[#allocation5 + $0x9c] sm:$0xf] %v4682_v57  ;;  %v4722_v28 = vld [vmem:[#allocation4 + $0x40] sm:$0xf] }
 0x34b   : > { %v4723_v25 = vld [vmem:[#allocation4 + $0x44] sm:$0xf]  ;;  %7653 = vst [vmem:[#allocation4 + $0x50] sm:$0xff] %v7557_v32   ;;  %v10703_v2 = vld [vmem:[#allocation26_spill] sm:$0xff]  ;;  %v8978_v58 = vld [vmem:[%s10637_s5 + $0x88] sm:$0xff]   ;;  %v4461_v46 = vmax.f32 %v4415_v34, 0.0 }
 0x34c   : > { %v4246_v54 = vadd.f32 %v8128_v47, %v10703_v2  ;;  %v10704_v7 = vld [vmem:[#allocation8_spill] sm:$0xff]  ;;  %4687 = vst [vmem:[#allocation5 + $0xc0] sm:$0xf] %v4683_v52  ;;  %4726 = vst [vmem:[#allocation5 + $0x18] sm:$0xf] %v4722_v28  ;;  %v10705_v59 = vld [vmem:[#allocation9_spill] sm:$0xff]  ;;  %8224 = vmatpush3.bf16.msra.mxu1 %v8978_v58 }
 0x34d   : > { %v4106_v61 = vadd.f32 %v8031_v18, %v10704_v7  ;;  %4727 = vst [vmem:[#allocation5 + $0x3c] sm:$0xf] %v4723_v25  ;;  %v8971_v36 = vld [vmem:[#allocation5 + $0xd8] ss:$36 sps:$4 sm:$0xff]   ;;  %v8986_v45 = vld [vmem:[%s10637_s5 + $0xc0] sm:$0xff]   ;;  %v4109_v63 = vadd.f32 %v8034_v15, %v10705_v59  ;;  %v4458_v47 = vmax.f32 %v4404_v53, 0.0  ;;  %v7572_v23 = vpack.c.bf16 %v4461_v46, %v4460_v1 }
 0x34e   : > { %v4407_v14 = vadd.f32 %v4406_v21, %v4246_v54  ;;  %v8973_v27 = vld [vmem:[#allocation5 + $0xdc] ss:$36 sps:$4 sm:$0xff]   ;;  %v8975_v3 = vld [vmem:[#allocation5 + $0x10] ss:$36 sps:$4 sm:$0xff]   ;;  %v4716_v6 = vld [vmem:[#allocation4 + $0x58] sm:$0xf]  ;;  %8225 = vmatprep.subr.bf16.mxu1 %v8986_v45 }
 0x34f   : > { %v8977_v42 = vld [vmem:[#allocation5 + $0x14] ss:$36 sps:$4 sm:$0xff]   ;;  %v8982_v55 = vld [vmem:[#allocation5 + $0xc] ss:$36 sps:$4 sm:$0xff]   ;;  %5633 = vmatprep.mubr.bf16.mxu1 %v8973_v27  ;;  %v4267_v37 = vadd.f32 %v8143_v40, %v4106_v61  ;;  %v8985_v12 = vld [vmem:[#allocation5 + $0x5c] ss:$36 sps:$4 sm:$0xff]   ;;  %v4270_v43 = vadd.f32 %v8146_v10, %v4109_v63 }
 0x350   : > { %v4459_v9 = vmax.f32 %v4407_v14, 0.0  ;;  %v8987_v17 = vld [vmem:[%s10637_s5 + $0x80] sm:$0xff]   ;;  %v8988_v5 = vld [vmem:[%s10637_s5 + $0x230] sm:$0xff]   ;;  %v4717_v35 = vld [vmem:[#allocation4 + $0x5c] sm:$0xf]  ;;  %5739 = vmatprep.mubr.bf16.mxu0 %v8977_v42  ;;  %5634 = vmatmul.mubr.bf16.gmra.mxu1 %v8971_v36  ;;  %7656 = vst [vmem:[#allocation4 + $0x68] sm:$0xff] %v7572_v23  }
 0x351   : > { %v4756_v30 = vld [vmem:[#allocation4 + $0x58] sm:$0xf]  ;;  %4720 = vst [vmem:[#allocation5 + $0xec] sm:$0xf] %v4716_v6  ;;  %4721 = vst [vmem:[#allocation5 + $0x110] sm:$0xf] %v4717_v35  ;;  %v4428_v51 = vadd.f32 %v8525_v22, %v4267_v37  ;;  %5740 = vmatmul.mubr.bf16.vlgmr.msra.gmra.mxu0 %v8975_v3  ;;  %5674 = vmatprep.mubr.bf16.mxu1 %v8982_v55  ;;  %v4431_v13 = vadd.f32 %v8526_v11, %v4270_v43 }
 0x352   : > { %v10706_v60 = vld [vmem:[#allocation31_spill] sm:$0xff]  ;;  %4760 = vst [vmem:[#allocation5 + $0x68] sm:$0xf] %v4756_v30  ;;  %v7567_v18 = vpack.c.bf16 %v4459_v9, %v4458_v47  ;;  %v4700_v44 = vld [vmem:[#allocation4 + $0x50] sm:$0xf]  ;;  %5747 = vmatprep.mubr.bf16.mxu0 %v8985_v12  ;;  %v8991_v49 = vld [vmem:[%s10637_s5 + $0x228] sm:$0xff]   ;;  %8226 = vmatpush3.bf16.msra.mxu1 %v8987_v17 }
 0x353   : > { %v4259_v24 = vadd.f32 %v8137_v48, %v10706_v60  ;;  %v4757_v38 = vld [vmem:[#allocation4 + $0x5c] sm:$0xf]  ;;  %v4701_v4 = vld [vmem:[#allocation4 + $0x54] sm:$0xf]  ;;  %v4714_v16 = vld [vmem:[#allocation4 + $0x50] sm:$0xf] }
 0x354   : > { %v8989_v20 = vld [vmem:[%s10637_s5 + $0x1f8] sm:$0xff]   ;;  %4761 = vst [vmem:[#allocation5 + $0x8c] sm:$0xf] %v4757_v38  ;;  %4704 = vst [vmem:[#allocation5 + $0xe8] sm:$0xf] %v4700_v44  ;;  %v10707_v56 = vld [vmem:[#allocation13_spill] sm:$0xff] }
 0x355   : > { %4705 = vst [vmem:[#allocation5 + $0x10c] sm:$0xf] %v4701_v4  ;;  %v4715_v32 = vld [vmem:[#allocation4 + $0x54] sm:$0xf]  ;;  %4718 = vst [vmem:[#allocation5 + $0xa4] sm:$0xf] %v4714_v16  ;;  %8528 = vmatpush3.bf16.msra.mxu0 %v10707_v56  ;;  %v4420_v50 = vadd.f32 %v4419_v62, %v4259_v24  ;;  %8291 = vmatprep.subr.bf16.mxu1 %v8989_v20 }
 0x356   : > { %v4740_v29 = vld [vmem:[#allocation4 + $0x50] sm:$0xf]  ;;  %v4741_v41 = vld [vmem:[#allocation4 + $0x54] sm:$0xf]  ;;  %7655 = vst [vmem:[#allocation4 + $0x60] sm:$0xff] %v7567_v18   ;;  %v10708_v33 = vld [vmem:[#allocation33_spill] sm:$0xff]  ;;  %8529 = vmatprep.subr.bf16.mxu0 %v8988_v5 }
 0x357   : > { %v4262_v31 = vadd.f32 %v8140_v19, %v10708_v33  ;;  %4719 = vst [vmem:[#allocation5 + $0xc8] sm:$0xf] %v4715_v32  ;;  %4744 = vst [vmem:[#allocation5 + $0x64] sm:$0xf] %v4740_v29  ;;  %v4754_v15 = vld [vmem:[#allocation4 + $0x50] sm:$0xf] }
 0x358   : > { %4745 = vst [vmem:[#allocation5 + $0x88] sm:$0xf] %v4741_v41  ;;  %v4755_v8 = vld [vmem:[#allocation4 + $0x54] sm:$0xf]  ;;  %4758 = vst [vmem:[#allocation5 + $0x20] sm:$0xf] %v4754_v15 }
 0x359   : > { %4759 = vst [vmem:[#allocation5 + $0x44] sm:$0xf] %v4755_v8  ;;  %v4464_v39 = vmax.f32 %v4428_v51, 0.0  ;;  %v4465_v57 = vmax.f32 %v4431_v13, 0.0  ;;  %v4423_v26 = vadd.f32 %v4422_v0, %v4262_v31  ;;  %v8990_v40 = vld [vmem:[%s10637_s5 + $0x1b8] sm:$0xff]   ;;  %v8995_v52 = vld [vmem:[%s10637_s5 + $0x1f0] sm:$0xff]   ;;  %8530 = vmatpush3.bf16.msra.mxu0 %v8988_v5 }
 0x35a   : > { %v8980_v28 = vld [vmem:[#allocation5 + $0x8] ss:$36 sps:$4 sm:$0xff]   ;;  %v8983_v25 = vld [vmem:[#allocation5 + $0x58] ss:$36 sps:$4 sm:$0xff]   ;;  %v8997_v53 = vld [vmem:[%s10637_s5 + $0x220] sm:$0xff]   ;;  %v4462_v34 = vmax.f32 %v4420_v50, 0.0  ;;  %8531 = vmatprep.subr.bf16.mxu0 %v8991_v49 }
 0x35b   : > { %v7582_v2 = vpack.c.bf16 %v4465_v57, %v4464_v39  ;;  %v4463_v54 = vmax.f32 %v4423_v26, 0.0  ;;  %v8994_v58 = vld [vmem:[#allocation5 + $0x54] ss:$36 sps:$4 sm:$0xff]   ;;  %v4732_v61 = vld [vmem:[#allocation4 + $0x68] sm:$0xf]  ;;  %5675 = vmatmul.mubr.bf16.vlgmr.msra.gmra.mxu1 %v8980_v28  ;;  %5748 = vmatmul.mubr.bf16.gmra.mxu0 %v8983_v25  ;;  %v9010_v3 = vld [vmem:[%s10637_s5 + $0x1e0] sm:$0xff]  }
 0x35c   : > { %v8996_v7 = vld [vmem:[%s10637_s5 + $0x1b0] sm:$0xff]   ;;  %v4733_v48 = vld [vmem:[#allocation4 + $0x6c] sm:$0xf]  ;;  %v4746_v21 = vld [vmem:[#allocation4 + $0x68] sm:$0xf]  ;;  %8292 = vmatpush3.bf16.msra.mxu1 %v8990_v40  ;;  %5682 = vmatprep.mubr.bf16.mxu1 %v8994_v58 }
 0x35d   : > { %v9001_v36 = vld [vmem:[%s10637_s5 + $0x1e8] sm:$0xff]   ;;  %4736 = vst [vmem:[#allocation5 + $0xf0] sm:$0xf] %v4732_v61  ;;  %4737 = vst [vmem:[#allocation5 + $0x114] sm:$0xf] %v4733_v48  ;;  %v7577_v1 = vpack.c.bf16 %v4463_v54, %v4462_v34  ;;  %8293 = vmatprep.subr.bf16.mxu1 %v8995_v52  ;;  %8532 = vmatpush3.bf16.msra.mxu0 %v8991_v49  ;;  %v9003_v59 = vld [vmem:[%s10637_s5 + $0x218] sm:$0xff]  }
 0x35e   : > { %v4747_v10 = vld [vmem:[#allocation4 + $0x6c] sm:$0xf]  ;;  %4750 = vst [vmem:[#allocation5 + $0xac] sm:$0xf] %v4746_v21  ;;  %7658 = vst [vmem:[#allocation4 + $0x78] sm:$0xff] %v7582_v2   ;;  %8533 = vmatprep.subr.bf16.mxu0 %v8997_v53  ;;  %v9012_v42 = vld [vmem:[%s10637_s5 + $0x210] sm:$0xff]  }
 0x35f   : > { %4751 = vst [vmem:[#allocation5 + $0xd0] sm:$0xf] %v4747_v10  ;;  %v4730_v46 = vld [vmem:[#allocation4 + $0x60] sm:$0xf]  ;;  %v4731_v14 = vld [vmem:[#allocation4 + $0x64] sm:$0xf] }
 0x360   : > { %4734 = vst [vmem:[#allocation5 + $0xa8] sm:$0xf] %v4730_v46  ;;  %4735 = vst [vmem:[#allocation5 + $0xcc] sm:$0xf] %v4731_v14  ;;  %v9000_v27 = vld [vmem:[#allocation5 + $0xa4] ss:$36 sps:$4 sm:$0xff]   ;;  %8294 = vmatpush3.bf16.msra.mxu1 %v8996_v7 }
 0x361   : > { %7657 = vst [vmem:[#allocation4 + $0x70] sm:$0xff] %v7577_v1   ;;  %v9002_v45 = vld [vmem:[%s10637_s5 + $0x1a8] sm:$0xff]   ;;  %v8998_v63 = vld [vmem:[#allocation5 + $0xa0] ss:$36 sps:$4 sm:$0xff]   ;;  %5755 = vmatprep.mubr.bf16.mxu0 %v9000_v27  ;;  %v8992_v19 = vld [vmem:[#allocation5 + $0x50] ss:$36 sps:$4 sm:$0xff]   ;;  %8295 = vmatprep.subr.bf16.mxu1 %v9001_v36 }
 0x362   : > { %8534 = vmatpush3.bf16.msra.mxu0 %v8997_v53  ;;  %v9006_v22 = vld [vmem:[#allocation5 + $0x9c] ss:$36 sps:$4 sm:$0xff]   ;;  %v9009_v23 = vld [vmem:[#allocation5 + $0xec] ss:$36 sps:$4 sm:$0xff]   ;;  %v9018_v38 = vld [vmem:[#allocation5 + $0xe4] ss:$36 sps:$4 sm:$0xff]  }
 0x363   : > { %5683 = vmatmul.mubr.bf16.gmra.mxu1 %v8992_v19  ;;  %8535 = vmatprep.subr.bf16.mxu0 %v9003_v59  ;;  %v9011_v9 = vld [vmem:[%s10637_s5 + $0x1a0] sm:$0xff]   ;;  %v9013_v37 = vld [vmem:[%s10637_s5 + $0x1d8] sm:$0xff]   ;;  %v9015_v35 = vld [vmem:[%s10637_s5 + $0x208] sm:$0xff]  }
 0x364   : > { %5756 = vmatmul.mubr.bf16.gmra.mxu0 %v8998_v63  ;;  %8296 = vmatpush3.bf16.msra.mxu1 %v9002_v45  ;;  %v9014_v30 = vld [vmem:[%s10637_s5 + $0x198] sm:$0xff]   ;;  %v9020_v24 = vld [vmem:[%s10637_s5 + $0x1d0] sm:$0xff]   ;;  %v9007_v62 = vld [vmem:[#allocation5 + $0xe8] ss:$36 sps:$4 sm:$0xff]  }
 0x365   : > { %v4764_v55 = vld [vmem:[#allocation4 + $0x78] sm:$0xf]  ;;  %v4765_v47 = vld [vmem:[#allocation4 + $0x7c] sm:$0xf]  ;;  %5690 = vmatprep.mubr.bf16.mxu1 %v9006_v22  ;;  %5763 = vmatprep.mubr.bf16.mxu0 %v9009_v23  ;;  %v9022_v18 = vld [vmem:[%s10637_s5 + $0x200] sm:$0xff]  }
 0x366   : > { %4768 = vst [vmem:[#allocation5 + $0xf8] sm:$0xf] %v4764_v55  ;;  %4769 = vst [vmem:[#allocation5 + $0x11c] sm:$0xf] %v4765_v47  ;;  %8536 = vmatpush3.bf16.msra.mxu0 %v9003_v59  ;;  %8297 = vmatprep.subr.bf16.mxu1 %v9010_v3  ;;  %v9004_v60 = vld [vmem:[#allocation5 + $0x98] ss:$36 sps:$4 sm:$0xff]  }
 0x367   : > { %8537 = vmatprep.subr.bf16.mxu0 %v9012_v42  ;;  %v9019_v51 = vld [vmem:[#allocation5 + $0x20] ss:$36 sps:$4 sm:$0xff]   ;;  %v9021_v43 = vld [vmem:[%s10637_s5 + $0x190] sm:$0xff]   ;;  %v9023_v20 = vld [vmem:[%s10637_s5 + $0x1c8] sm:$0xff]   ;;  %v10647_v47 = vmov 0.0  }
 0x368   : > { %v4748_v12 = vld [vmem:[#allocation4 + $0x70] sm:$0xf]  ;;  %v4749_v17 = vld [vmem:[#allocation4 + $0x74] sm:$0xf]  ;;  %8298 = vmatpush3.bf16.msra.mxu1 %v9011_v9  ;;  %v9024_v44 = vld [vmem:[%s10637_s5 + $0x188] sm:$0xff]  }
 0x369   : > { %v4762_v5 = vld [vmem:[#allocation4 + $0x70] sm:$0xf]  ;;  %4752 = vst [vmem:[#allocation5 + $0xf4] sm:$0xf] %v4748_v12  ;;  %4753 = vst [vmem:[#allocation5 + $0x118] sm:$0xf] %v4749_v17  ;;  %8299 = vmatprep.subr.bf16.mxu1 %v9013_v37 }
 0x36a   : > { %v4763_v6 = vld [vmem:[#allocation4 + $0x74] sm:$0xf]  ;;  %4766 = vst [vmem:[#allocation5 + $0xb0] sm:$0xf] %v4762_v5  ;;  %8538 = vmatpush3.bf16.msra.mxu0 %v9012_v42  ;;  %v9016_v4 = vld [vmem:[#allocation5 + $0xe0] ss:$36 sps:$4 sm:$0xff]  }
 0x36b   : > { %4767 = vst [vmem:[#allocation5 + $0xd4] sm:$0xf] %v4763_v6  ;;  %5691 = vmatmul.mubr.bf16.gmra.mxu1 %v9004_v60  ;;  %8539 = vmatprep.subr.bf16.mxu0 %v9015_v35  ;;  %v9030_v16 = vld [vmem:[%s10637_s5 + $0x1c0] sm:$0xff]   ;;  %v9025_v49 = vld [vmem:[#allocation5 + $0x68] ss:$36 sps:$4 sm:$0xff]   ;;  %v9042_v0 = vld [vmem:[%s10639_s7 + $0x78] sm:$0xff]  }
 0x36c   : > { %5764 = vmatmul.mubr.bf16.gmra.mxu0 %v9007_v62  ;;  %8300 = vmatpush3.bf16.msra.mxu1 %v9014_v30  ;;  %v9028_v11 = vld [vmem:[#allocation5 + $0x1c] ss:$36 sps:$4 sm:$0xff]   ;;  %v9035_v56 = vld [vmem:[#allocation5 + $0x64] ss:$36 sps:$4 sm:$0xff]   ;;  %v9038_v33 = vld [vmem:[#allocation5 + $0xac] ss:$36 sps:$4 sm:$0xff]  }
 0x36d   : > { %5698 = vmatprep.mubr.bf16.mxu1 %v9018_v38  ;;  %8543 = vmatprep.mubr.bf16.mxu0 %v9019_v51  ;;  %v9031_v29 = vld [vmem:[%s10637_s5 + $0x180] sm:$0xff]   ;;  %v9026_v41 = vld [vmem:[#allocation5 + $0x18] ss:$36 sps:$4 sm:$0xff]   ;;  %v9036_v31 = vld [vmem:[#allocation5 + $0xa8] ss:$36 sps:$4 sm:$0xff]  }
 0x36e   : > { %8540 = vmatpush3.bf16.msra.mxu0 %v9015_v35  ;;  %8301 = vmatprep.subr.bf16.mxu1 %v9020_v24  ;;  %v9032_v50 = vld [vmem:[#allocation5 + $0xf8] ss:$36 sps:$4 sm:$0xff]   ;;  %v9033_v13 = vld [vmem:[#allocation5 + $0x60] ss:$36 sps:$4 sm:$0xff]   ;;  %v9039_v8 = vld [vmem:[#allocation5 + $0xf0] ss:$36 sps:$4 sm:$0xff]  }
 0x36f   : > { %8541 = vmatprep.subr.bf16.mxu0 %v9022_v18  ;;  %v9043_v39 = vld [vmem:[%s10639_s7 + $0x38] sm:$0xff]   ;;  %v9044_v57 = vld [vmem:[%s10639_s7 + $0x70] sm:$0xff]   ;;  %v9046_v40 = vld [vmem:[%s10639_s7 + $0x68] sm:$0xff]  }
 0x370   : > { %8302 = vmatpush3.bf16.msra.mxu1 %v9021_v43  ;;  %v9041_v15 = vld [vmem:[#allocation5 + $0xf4] ss:$36 sps:$4 sm:$0xff]   ;;  %v9047_v52 = vld [vmem:[%s10639_s7 + $0x28] sm:$0xff]   ;;  %v9048_v28 = vld [vmem:[%s10639_s7 + $0x60] sm:$0xff]  }
 0x371   : > { %8303 = vmatprep.subr.bf16.mxu1 %v9023_v20  ;;  %v9045_v26 = vld [vmem:[%s10639_s7 + $0x30] sm:$0xff]   ;;  %v9049_v25 = vld [vmem:[%s10639_s7 + $0x20] sm:$0xff]   ;;  %v9050_v53 = vld [vmem:[%s10639_s7 + $0x58] sm:$0xff]  }
 0x372   : > { %8542 = vmatpush3.bf16.msra.mxu0 %v9022_v18  ;;  %v9029_v32 = vld [vmem:[#allocation5 + $0xb0] ss:$36 sps:$4 sm:$0xff]   ;;  %v9051_v34 = vld [vmem:[%s10639_s7 + $0xf8] sm:$0xff]   ;;  %v9058_v21 = vld [vmem:[%s10639_s7 + $0x48] sm:$0xff]  }
 0x373   : > { %5699 = vmatmul.mubr.bf16.gmra.mxu1 %v9016_v4  ;;  %v9053_v2 = vld [vmem:[%s10639_s7 + $0xb8] sm:$0xff]   ;;  %8365 = vmatprep.subr.bf16.mxu0 %v9051_v34  ;;  %v9054_v58 = vld [vmem:[%s10639_s7 + $0x50] sm:$0xff]   ;;  %v9059_v36 = vld [vmem:[%s10639_s7 + $0xe8] sm:$0xff]  }
 0x374   : > { %8304 = vmatpush3.bf16.msra.mxu1 %v9024_v44  ;;  %5804 = vmatprep.mubr.bf16.mxu1 %v9028_v11  ;;  %v9052_v54 = vld [vmem:[%s10639_s7 + $0x18] sm:$0xff]   ;;  %v9055_v7 = vld [vmem:[%s10639_s7 + $0xf0] sm:$0xff]   ;;  %v9060_v10 = vld [vmem:[%s10639_s7 + $0x8] sm:$0xff]  }
 0x375   : > { %8544 = vmatmul.mubr.bf16.vlgmr.msra.gmra.mxu0 %v9025_v49  ;;  %8305 = vmatprep.subr.bf16.mxu1 %v9030_v16  ;;  %v9056_v61 = vld [vmem:[%s10639_s7 + $0x10] sm:$0xff]   ;;  %v9061_v1 = vld [vmem:[%s10639_s7 + $0xa8] sm:$0xff]   ;;  %v9062_v46 = vld [vmem:[%s10639_s7 + $0x40] sm:$0xff]  }
 0x376   : > { %8547 = vmatprep.mubr.bf16.mxu0 %v9029_v32  ;;  %8366 = vmatpush3.bf16.msra.mxu0 %v9053_v2  ;;  %v9057_v48 = vld [vmem:[%s10639_s7 + $0xb0] sm:$0xff]   ;;  %v9063_v14 = vld [vmem:[%s10639_s7 + $0xe0] sm:$0xff]   ;;  %v9069_v59 = vld [vmem:[%s10639_s7 + $0xd8] sm:$0xff]  }
 0x377   : > { %8367 = vmatprep.subr.bf16.mxu0 %v9055_v7  ;;  %v9064_v27 = vld [vmem:[%s10639_s7] sm:$0xff]   ;;  %v9070_v63 = vld [vmem:[%s10639_s7 + $0x98] sm:$0xff]   ;;  %v9071_v19 = vld [vmem:[%s10639_s7 + $0xd0] sm:$0xff]  }
 0x378   : > { %8306 = vmatpush3.bf16.msra.mxu1 %v9031_v29  ;;  %v9065_v45 = vld [vmem:[%s10639_s7 + $0xa0] sm:$0xff]   ;;  %v9072_v3 = vld [vmem:[%s10639_s7 + $0x90] sm:$0xff]   ;;  %v9073_v42 = vld [vmem:[%s10639_s7 + $0xc8] sm:$0xff]  }
 0x379   : > { %8343 = vmatprep.subr.bf16.mxu1 %v9042_v0  ;;  %v9074_v22 = vld [vmem:[%s10639_s7 + $0x88] sm:$0xff]   ;;  %v9075_v55 = vld [vmem:[%s10639_s7 + $0xc0] sm:$0xff]  }
 0x37a   : > { %8368 = vmatpush3.bf16.msra.mxu0 %v9057_v48  ;;  %v9076_v9 = vld [vmem:[%s10639_s7 + $0x80] sm:$0xff]  }
 0x37b   : > { %5805 = vmatmul.mubr.bf16.vlgmr.msra.gmra.mxu1 %v9026_v41  ;;  %8369 = vmatprep.subr.bf16.mxu0 %v9059_v36 }
 0x37c   : > { %5812 = vmatprep.mubr.bf16.mxu1 %v9035_v56  ;;  %8344 = vmatpush3.bf16.msra.mxu1 %v9043_v39 }
 0x37d   : > { %8548 = vmatmul.mubr.bf16.gmra.mxu0 %v9032_v50  ;;  %8345 = vmatprep.subr.bf16.mxu1 %v9044_v57 }
 0x37e   : > { %8370 = vmatpush3.bf16.msra.mxu0 %v9061_v1 }
 0x37f   : > { %8371 = vmatprep.subr.bf16.mxu0 %v9063_v14 }
 0x380   : > { %8346 = vmatpush3.bf16.msra.mxu1 %v9045_v26 }
 0x381   : > { %8347 = vmatprep.subr.bf16.mxu1 %v9046_v40 }
 0x382   : > { %8372 = vmatpush3.bf16.msra.mxu0 %v9065_v45 }
 0x383   : > { %5813 = vmatmul.mubr.bf16.gmra.mxu1 %v9033_v13  ;;  %8373 = vmatprep.subr.bf16.mxu0 %v9069_v59 }
 0x384   : > { %5820 = vmatprep.mubr.bf16.mxu1 %v9038_v33  ;;  %8348 = vmatpush3.bf16.msra.mxu1 %v9047_v52 }
 0x385   : > { %8349 = vmatprep.subr.bf16.mxu1 %v9048_v28 }
 0x386   : > { %8374 = vmatpush3.bf16.msra.mxu0 %v9070_v63 }
 0x387   : > { %8375 = vmatprep.subr.bf16.mxu0 %v9071_v19 }
 0x388   : > { %8350 = vmatpush3.bf16.msra.mxu1 %v9049_v25 }
 0x389   : > { %8351 = vmatprep.subr.bf16.mxu1 %v9050_v53 }
 0x38a   : > { %8376 = vmatpush3.bf16.msra.mxu0 %v9072_v3 }
 0x38b   : > { %5821 = vmatmul.mubr.bf16.gmra.mxu1 %v9036_v31  ;;  %8377 = vmatprep.subr.bf16.mxu0 %v9073_v42 }
 0x38c   : > { %5828 = vmatprep.mubr.bf16.mxu1 %v9041_v15  ;;  %8352 = vmatpush3.bf16.msra.mxu1 %v9052_v54 }
 0x38d   : > { %8353 = vmatprep.subr.bf16.mxu1 %v9054_v58 }
 0x38e   : > { %8378 = vmatpush3.bf16.msra.mxu0 %v9074_v22 }
 0x38f   : > { %8379 = vmatprep.subr.bf16.mxu0 %v9075_v55 }
 0x390   : > { %8354 = vmatpush3.bf16.msra.mxu1 %v9056_v61  ;;  %v10511_v61 = vld [vmem:[%s10638_s6] ss:$0 sm:$0xff] }
 0x391   : > { %8355 = vmatprep.subr.bf16.mxu1 %v9058_v21 }
 0x392   : > { %8380 = vmatpush3.bf16.msra.mxu0 %v9076_v9 }
 0x393   : > { %5829 = vmatmul.mubr.bf16.gmra.mxu1 %v9039_v8  ;;  %8571 = vmatprep.subr.bf16.mxu0 %v10647_v47 }
 0x394   : > { %8356 = vmatpush3.bf16.msra.mxu1 %v9060_v10 }
 0x395   : > { %8357 = vmatprep.subr.bf16.mxu1 %v9062_v46 }
 0x398   : > { %8358 = vmatpush3.bf16.msra.mxu1 %v9064_v27 }
 0x399   : > { %8551 = vmatprep.subr.bf16.mxu1 %v10647_v47 }
 0x3e9   : > { %v8187_v23 = vpop.f32.mrf.mxu1 }
 0x3eb   : > { %v8188_v37 = vpop.f32.mrf.mxu1 }
 0x3ec   : > { %v8189_v7 = vadd.f32 %v8188_v37, %v8187_v23 }
 0x3ed   : > { %v8190_v12 = vpop.f32.mrf.mxu1 }
 0x3ee   : > { %v5612_v1 = vadd.f32 %v8189_v7, %v10511_v61 }
 0x3ef   : > { %v8191_v17 = vpop.f32.mrf.mxu1 }
 0x3f0   : > { %v8192_v46 = vadd.f32 %v8191_v17, %v8190_v12 }
 0x3f2   : > { %v5615_v3 = vadd.f32 %v8192_v46, %v10511_v61 }
 0x3f7   : > { %v8193_v5 = vpop.f32.mrf.mxu1 }
 0x3f9   : > { %v8194_v6 = vpop.f32.mrf.mxu1 }
 0x3fa   : > { %v8195_v63 = vadd.f32 %v8194_v6, %v8193_v5 }
 0x3fb   : > { %v8196_v35 = vpop.f32.mrf.mxu1 }
 0x3fd   : > { %v8197_v30 = vpop.f32.mrf.mxu1 }
 0x3fe   : > { %v8198_v12 = vadd.f32 %v8197_v30, %v8196_v35 }
 0x404   : > { %v10472_v60 = vpop.f32.mrf.mxu1 }
 0x406   : > { %v10474_v24 = vpop.f32.mrf.mxu1 }
 0x408   : > { %v10476_v62 = vpop.f32.mrf.mxu1 }
 0x40a   : > { %v10478_v38 = vpop.f32.mrf.mxu1 }
 0x410   : > { %v10480_v18 = vpop.f32.mrf.mxu1 }
 0x411   : > { %v8267_v51 = vpop.f32.mrf.mxu0 }
 0x412   : > { %v10482_v43 = vpop.f32.mrf.mxu1 }
 0x413   : > { %v8268_v20 = vpop.f32.mrf.mxu0 }
 0x414   : > { %v10484_v44 = vpop.f32.mrf.mxu1  ;;  %v8269_v42 = vadd.f32 %v8268_v20, %v8267_v51  ;;  %v8201_v51 = vadd.f32 %v10474_v24, %v10472_v60 }
 0x415   : > { %v8270_v4 = vpop.f32.mrf.mxu0 }
 0x416   : > { %v10486_v16 = vpop.f32.mrf.mxu1 }
 0x417   : > { %v8271_v11 = vpop.f32.mrf.mxu0 }
 0x418   : > { %v8272_v17 = vadd.f32 %v8271_v11, %v8270_v4 }
 0x41b   : > { %v8227_v49 = vpop.f32.mrf.mxu1  ;;  %v8273_v32 = vpop.f32.mrf.mxu0 }
 0x41d   : > { %v8228_v29 = vpop.f32.mrf.mxu1  ;;  %v8274_v41 = vpop.f32.mrf.mxu0 }
 0x41e   : > { %v8229_v36 = vadd.f32 %v8228_v29, %v8227_v49  ;;  %v5620_v29 = vadd.f32 %v8195_v63, %v10511_v61  ;;  %v8275_v20 = vadd.f32 %v8274_v41, %v8273_v32 }
 0x41f   : > { %v8230_v56 = vpop.f32.mrf.mxu1  ;;  %v10488_v50 = vpop.f32.mrf.mxu0 }
 0x420   : > { %v5677_v45 = vadd.f32 %v8229_v36, %v5612_v1 }
 0x421   : > { %v8231_v13 = vpop.f32.mrf.mxu1  ;;  %v10490_v33 = vpop.f32.mrf.mxu0 }
 0x422   : > { %v8232_v59 = vadd.f32 %v8231_v13, %v8230_v56  ;;  %v5742_v37 = vadd.f32 %v8269_v42, %v5677_v45  ;;  %v8278_v60 = vadd.f32 %v10490_v33, %v10488_v50 }
 0x423   : > { %v8233_v31 = vpop.f32.mrf.mxu1 }
 0x424   : > { %v10492_v15 = vpop.f32.mrf.mxu0  ;;  %v5680_v9 = vadd.f32 %v8232_v59, %v5615_v3 }
 0x425   : > { %v8234_v8 = vpop.f32.mrf.mxu1 }
 0x426   : > { %v10494_v0 = vpop.f32.mrf.mxu0  ;;  %v8235_v22 = vadd.f32 %v8234_v8, %v8233_v31  ;;  %v5745_v6 = vadd.f32 %v8272_v17, %v5680_v9  ;;  %v5623_v8 = vadd.f32 %v8198_v12, %v10511_v61 }
 0x427   : > { %v8236_v39 = vpop.f32.mrf.mxu1 }
 0x428   : > { %v10496_v57 = vpop.f32.mrf.mxu0 }
 0x429   : > { %v8237_v26 = vpop.f32.mrf.mxu1 }
 0x42a   : > { %v10498_v40 = vpop.f32.mrf.mxu0  ;;  %v8238_v5 = vadd.f32 %v8237_v26, %v8236_v39  ;;  %v5628_v39 = vadd.f32 %v8201_v51, %v10511_v61  ;;  %v8204_v26 = vadd.f32 %v10478_v38, %v10476_v62  ;;  %v8281_v38 = vadd.f32 %v10494_v0, %v10492_v15 }
 0x42b   : > { %v8239_v52 = vpop.f32.mrf.mxu1  ;;  %v8210_v15 = vadd.f32 %v10486_v16, %v10484_v44 }
 0x42c   : > { %v10500_v28 = vpop.f32.mrf.mxu0  ;;  %v5688_v30 = vadd.f32 %v8238_v5, %v5623_v8 }
 0x42d   : > { %v8240_v25 = vpop.f32.mrf.mxu1 }
 0x42e   : > { %v10502_v53 = vpop.f32.mrf.mxu0  ;;  %v8241_v4 = vadd.f32 %v8240_v25, %v8239_v52  ;;  %v5753_v52 = vadd.f32 %v8278_v60, %v5688_v30 }
 0x42f   : > { %v8242_v34 = vpop.f32.mrf.mxu1  ;;  %v8287_v44 = vadd.f32 %v10502_v53, %v10500_v28 }
 0x430   : > { %v10504_v2 = vpop.f32.mrf.mxu0  ;;  %v5693_v42 = vadd.f32 %v8241_v4, %v5628_v39 }
 0x431   : > { %v8243_v54 = vpop.f32.mrf.mxu1 }
 0x432   : > { %v10513_v48 = vpop.f32.mrf.mxu0  ;;  %v8244_v41 = vadd.f32 %v8243_v54, %v8242_v34 }
 0x433   : > { %v10506_v58 = vpop.f32.mrf.mxu1  ;;  %10709 = vst [vmem:[#allocation11_spill] sm:$0xff] %v10513_v48  ;;  %v5685_v48 = vadd.f32 %v8235_v22, %v5620_v29  ;;  %v5758_v29 = vadd.f32 %v8281_v38, %v5693_v42  ;;  %v10711_v38 = vmov 0.0  }
 0x435   : > { %v10515_v21 = vpop.f32.mrf.mxu1  ;;  %v8545_v14 = vpop.f32.mrf.mxu0  ;;  %v5750_v59 = vadd.f32 %v8275_v20, %v5685_v48 }
 0x437   : > { %v10517_v10 = vpop.f32.mrf.mxu1  ;;  %v5871_v55 = vpop.f32.mrf.mxu0 }
 0x439   : > { %v10520_v27 = vpop.f32.mrf.mxu1  ;;  %v8546_v36 = vpop.f32.mrf.mxu0 }
 0x43b   : > { %v8307_v19 = vpop.f32.mrf.mxu1  ;;  %v5874_v45 = vpop.f32.mrf.mxu0 }
 0x43d   : > { %v8308_v23 = vpop.f32.mrf.mxu1  ;;  %v8549_v3 = vpop.f32.mrf.mxu0 }
 0x43e   : > { %v8309_v49 = vadd.f32 %v8308_v23, %v8307_v19  ;;  %v8207_v23 = vadd.f32 %v10482_v43, %v10480_v18  ;;  %v8284_v18 = vadd.f32 %v10498_v40, %v10496_v57  ;;  %v5639_v57 = vadd.f32 %v8210_v15, %v10511_v61 }
 0x43f   : > { %v8310_v7 = vpop.f32.mrf.mxu1  ;;  %v5887_v34 = vpop.f32.mrf.mxu0 }
 0x440   : > { %v5807_v47 = vadd.f32 %v8309_v49, %v5742_v37  ;;  %v8247_v37 = vadd.f32 %v10515_v21, %v10506_v58  ;;  %v5636_v12 = vadd.f32 %v8207_v23, %v10511_v61  ;;  %v8250_v58 = vadd.f32 %v10520_v27, %v10517_v10 }
 0x441   : > { %v8311_v56 = vpop.f32.mrf.mxu1 }
 0x442   : > { %v8312_v13 = vadd.f32 %v8311_v56, %v8310_v7  ;;  %v5872_v1 = vadd.f32 %v5871_v55, %v5807_v47  ;;  %v5631_v55 = vadd.f32 %v8204_v26, %v10511_v61  ;;  %v8550_v56 = vpop.f32.mrf.mxu0 }
 0x443   : > { %v8313_v31 = vpop.f32.mrf.mxu1 }
 0x444   : > { %v5810_v46 = vadd.f32 %v8312_v13, %v5745_v6  ;;  %v5902_v24 = vmax.f32 %v5872_v1, 0.0  ;;  %v5696_v9 = vadd.f32 %v8244_v41, %v5631_v55  ;;  %v5701_v13 = vadd.f32 %v8247_v37, %v5636_v12  ;;  %v5890_v8 = vpop.f32.mrf.mxu0  ;;  %v9086_v37 = vld [vmem:[%s10641_s9 + $0x8] sm:$0xff]  }
 0x445   : > { %v8314_v35 = vpop.f32.mrf.mxu1  ;;  %v9090_v12 = vld [vmem:[%s10643_s11 + $0x28] sm:$0xff]  }
 0x446   : > { %v5875_v11 = vadd.f32 %v5874_v45, %v5810_v46  ;;  %v8315_v63 = vadd.f32 %v8314_v35, %v8313_v31  ;;  %v5761_v5 = vadd.f32 %v8284_v18, %v5696_v9  ;;  %v5704_v46 = vadd.f32 %v8250_v58, %v5639_v57  ;;  %v10710_v35 = vld [vmem:[#allocation11_spill] sm:$0xff]  ;;  %v9083_v9 = vld [vmem:[%s10641_s9 + $0x20] sm:$0xff]  }
 0x447   : > { %v8316_v19 = vpop.f32.mrf.mxu1  ;;  %v5766_v10 = vadd.f32 %v8287_v44, %v5701_v13  ;;  %v8290_v30 = vadd.f32 %v10710_v35, %v10504_v2  ;;  %v9091_v18 = vld [vmem:[%s10643_s11 + $0x20] sm:$0xff]  }
 0x448   : > { %v5903_v32 = vmax.f32 %v5875_v11, 0.0  ;;  %v5815_v47 = vadd.f32 %v8315_v63, %v5750_v59 }
 0x449   : > { %v8317_v48 = vpop.f32.mrf.mxu1  ;;  %v5769_v53 = vadd.f32 %v8290_v30, %v5704_v46  ;;  %v9093_v46 = vld [vmem:[%s10643_s11 + $0x10] sm:$0xff]  }
 0x44a   : > { %v7587_v22 = vpack.c.bf16 %v5903_v32, %v5902_v24  ;;  %v8318_v25 = vadd.f32 %v8317_v48, %v8316_v19  ;;  %v5880_v50 = vadd.f32 %v8545_v14, %v5815_v47 }
 0x44b   : > { %v8319_v62 = vpop.f32.mrf.mxu1 }
 0x44c   : > { %7588 = vst [vmem:[#allocation6] sm:$0xff] %v7587_v22   ;;  %v5818_v33 = vadd.f32 %v8318_v25, %v5753_v52  ;;  %v5904_v0 = vmax.f32 %v5880_v50, 0.0  ;;  %v9081_v50 = vld [vmem:[%s10641_s9 + $0x30] sm:$0xff]  }
 0x44d   : > { %v8320_v54 = vpop.f32.mrf.mxu1 }
 0x44e   : > { %v5883_v49 = vadd.f32 %v8546_v36, %v5818_v33  ;;  %v8321_v7 = vadd.f32 %v8320_v54, %v8319_v62  ;;  %v9080_v62 = vld [vmem:[%s10641_s9 + $0x38] sm:$0xff]   ;;  %v9082_v33 = vld [vmem:[%s10641_s9 + $0x28] sm:$0xff]   ;;  %v9085_v54 = vld [vmem:[%s10641_s9 + $0x10] sm:$0xff]  }
 0x44f   : > { %v8322_v43 = vpop.f32.mrf.mxu1 }
 0x450   : > { %v5905_v14 = vmax.f32 %v5883_v49, 0.0  ;;  %v5823_v17 = vadd.f32 %v8321_v7, %v5758_v29  ;;  %v9087_v49 = vld [vmem:[%s10641_s9] sm:$0xff]   ;;  %v9088_v29 = vld [vmem:[%s10643_s11 + $0x38] sm:$0xff]   ;;  %v9089_v7 = vld [vmem:[%s10643_s11 + $0x30] sm:$0xff]  }
 0x451   : > { %v8323_v6 = vpop.f32.mrf.mxu1 }
 0x452   : > { %v7592_v21 = vpack.c.bf16 %v5905_v14, %v5904_v0  ;;  %v8324_v36 = vadd.f32 %v8323_v6, %v8322_v43  ;;  %v5888_v16 = vadd.f32 %v5887_v34, %v5823_v17  ;;  %v9084_v34 = vld [vmem:[%s10641_s9 + $0x18] sm:$0xff]   ;;  %v7151_v6 = vld [vmem:[%s10640_s8] ss:$0 sm:$0xff] }
 0x453   : > { %v8325_v51 = vpop.f32.mrf.mxu1  ;;  %v5950_v20 = vld [vmem:[#allocation6] sm:$0xf]  ;;  %v5951_v31 = vld [vmem:[#allocation6 + $0x4] sm:$0xf]  ;;  %v9092_v43 = vld [vmem:[%s10643_s11 + $0x18] sm:$0xff]  }
 0x454   : > { %7659 = vst [vmem:[#allocation6 + $0x8] sm:$0xff] %v7592_v21   ;;  %v5826_v40 = vadd.f32 %v8324_v36, %v5761_v5  ;;  %5952 = vst [vmem:[#allocation7] sm:$0xf] %v5950_v20  ;;  %v5906_v4 = vmax.f32 %v5888_v16, 0.0 }
 0x455   : > { %5953 = vst [vmem:[#allocation7 + $0x10] sm:$0xf] %v5951_v31  ;;  %v8326_v1 = vpop.f32.mrf.mxu1 }
 0x456   : > { %v5891_v45 = vadd.f32 %v5890_v8, %v5826_v40  ;;  %v8327_v27 = vadd.f32 %v8326_v1, %v8325_v51 }
 0x457   : > { %v8328_v59 = vpop.f32.mrf.mxu1 }
 0x458   : > { %v5907_v61 = vmax.f32 %v5891_v45, 0.0  ;;  %v5831_v11 = vadd.f32 %v8327_v27, %v5766_v10  ;;  %v9094_v45 = vld [vmem:[%s10643_s11 + $0x8] sm:$0xff]   ;;  %v9095_v10 = vld [vmem:[%s10643_s11] sm:$0xff]  }
 0x459   : > { %v8329_v63 = vpop.f32.mrf.mxu1  ;;  %v7188_v27 = vld [vmem:[%s10642_s10] ss:$0 sm:$0xff] }
 0x45a   : > { %v7597_v28 = vpack.c.bf16 %v5907_v61, %v5906_v4  ;;  %v8330_v39 = vadd.f32 %v8329_v63, %v8328_v59  ;;  %v5896_v60 = vadd.f32 %v8549_v3, %v5831_v11 }
 0x45b   : > { %v5954_v26 = vld [vmem:[#allocation6 + $0x8] sm:$0xf]  ;;  %v5955_v19 = vld [vmem:[#allocation6 + $0xc] sm:$0xf] }
 0x45c   : > { %7660 = vst [vmem:[#allocation6 + $0x10] sm:$0xff] %v7597_v28   ;;  %v5834_v24 = vadd.f32 %v8330_v39, %v5769_v53  ;;  %5956 = vst [vmem:[#allocation7 + $0x4] sm:$0xf] %v5954_v26  ;;  %v5908_v47 = vmax.f32 %v5896_v60, 0.0  ;;  %v9066_v42 = vld [vmem:[#allocation7] ss:$16 sps:$4 sm:$0xff]  }
 0x45d   : > { %5957 = vst [vmem:[#allocation7 + $0x14] sm:$0xf] %v5955_v19  ;;  %v7197_v26 = vld [vmem:[%s10644_s12] ss:$0 sm:$0xff] }
 0x45e   : > { %v5899_v32 = vadd.f32 %v8550_v56, %v5834_v24 }
 0x460   : > { %v5909_v41 = vmax.f32 %v5899_v32, 0.0 }
 0x462   : > { %v7602_v48 = vpack.c.bf16 %v5909_v41, %v5908_v47 }
 0x463   : > { %v5958_v22 = vld [vmem:[#allocation6 + $0x10] sm:$0xf]  ;;  %v5959_v52 = vld [vmem:[#allocation6 + $0x14] sm:$0xf] }
 0x464   : > { %7661 = vst [vmem:[#allocation6 + $0x18] sm:$0xff] %v7602_v48   ;;  %v9068_v2 = vld [vmem:[#allocation7 + $0x4] ss:$16 sps:$4 sm:$0xff]   ;;  %5960 = vst [vmem:[#allocation7 + $0x8] sm:$0xf] %v5958_v22 }
 0x465   : > { %5961 = vst [vmem:[#allocation7 + $0x18] sm:$0xf] %v5959_v52  ;;  %6285 = vmatprep.mubr.bf16.mxu1 %v9068_v2 }
 0x466   : > { %6286 = vmatmul.mubr.bf16.vlgmr.msra.gmra.mxu1 %v9066_v42 }
 0x467   : > { %8552 = vmatpush3.bf16.msra.mxu1 %v9080_v62  ;;  %8567 = vmatprep.mubr.msk.bf16.mxu1 %vm9107_vm1, %v10711_v38 }
 0x468   : > { %8553 = vmatprep.subr.bf16.mxu1 %v10711_v38 }
 0x46b   : > { %v5962_v25 = vld [vmem:[#allocation6 + $0x18] sm:$0xf]  ;;  %v5963_v55 = vld [vmem:[#allocation6 + $0x1c] sm:$0xf]  ;;  %8554 = vmatpush3.bf16.msra.mxu1 %v9081_v50 }
 0x46c   : > { %5964 = vst [vmem:[#allocation7 + $0xc] sm:$0xf] %v5962_v25  ;;  %5965 = vst [vmem:[#allocation7 + $0x1c] sm:$0xf] %v5963_v55  ;;  %v9077_v3 = vld [vmem:[#allocation7 + $0x8] ss:$16 sps:$4 sm:$0xff]   ;;  %8555 = vmatprep.subr.bf16.mxu1 %v10711_v38 }
 0x46f   : > { %8556 = vmatpush3.bf16.msra.mxu1 %v9082_v33 }
 0x470   : > { %8557 = vmatprep.subr.bf16.mxu1 %v10711_v38 }
 0x473   : > { %v9079_v23 = vld [vmem:[#allocation7 + $0xc] ss:$16 sps:$4 sm:$0xff]   ;;  %8558 = vmatpush3.bf16.msra.mxu1 %v9083_v9 }
 0x474   : > { %6326 = vmatprep.mubr.bf16.mxu0 %v9079_v23  ;;  %8559 = vmatprep.subr.bf16.mxu1 %v10711_v38 }
 0x475   : > { %6327 = vmatmul.mubr.bf16.vlgmr.msra.gmra.mxu0 %v9077_v3 }
 0x476   : > { %8587 = vmatprep.mubr.msk.bf16.mxu0 %vm9107_vm1, %v10711_v38  ;;  %8572 = vmatpush3.bf16.msra.mxu0 %v9088_v29 }
 0x477   : > { %8560 = vmatpush3.bf16.msra.mxu1 %v9084_v34  ;;  %8573 = vmatprep.subr.bf16.mxu0 %v10711_v38 }
 0x478   : > { %8561 = vmatprep.subr.bf16.mxu1 %v10711_v38 }
 0x47a   : > { %8574 = vmatpush3.bf16.msra.mxu0 %v9089_v7 }
 0x47b   : > { %8562 = vmatpush3.bf16.msra.mxu1 %v9085_v54  ;;  %8575 = vmatprep.subr.bf16.mxu0 %v10711_v38 }
 0x47c   : > { %8563 = vmatprep.subr.bf16.mxu1 %v10711_v38 }
 0x47e   : > { %8576 = vmatpush3.bf16.msra.mxu0 %v9090_v12 }
 0x47f   : > { %8564 = vmatpush3.bf16.msra.mxu1 %v9086_v37  ;;  %8577 = vmatprep.subr.bf16.mxu0 %v10711_v38 }
 0x480   : > { %8565 = vmatprep.subr.bf16.mxu1 %v10711_v38 }
 0x482   : > { %8578 = vmatpush3.bf16.msra.mxu0 %v9091_v18 }
 0x483   : > { %8566 = vmatpush3.bf16.msra.mxu1 %v9087_v49  ;;  %8579 = vmatprep.subr.bf16.mxu0 %v10711_v38 }
 0x486   : > { %8580 = vmatpush3.bf16.msra.mxu0 %v9092_v43 }
 0x487   : > { %8581 = vmatprep.subr.bf16.mxu0 %v10711_v38 }
 0x48a   : > { %8582 = vmatpush3.bf16.msra.mxu0 %v9093_v46 }
 0x48b   : > { %8583 = vmatprep.subr.bf16.mxu0 %v10711_v38 }
 0x48e   : > { %8584 = vmatpush3.bf16.msra.mxu0 %v9094_v45 }
 0x48f   : > { %8585 = vmatprep.subr.bf16.mxu0 %v10711_v38 }
 0x492   : > { %8586 = vmatpush3.bf16.msra.mxu0 %v9095_v10 }
 0x526   : > { %v8359_v15 = vpop.f32.mrf.mxu1 }
 0x528   : > { %v8360_v0 = vpop.f32.mrf.mxu1 }
 0x529   : > { %v8361_v5 = vadd.f32 %v8360_v0, %v8359_v15 }
 0x52a   : > { %v8362_v14 = vpop.f32.mrf.mxu1 }
 0x52b   : > { %v6288_v51 = vadd.f32 %v8361_v5, %v7151_v6 }
 0x52c   : > { %v8363_v17 = vpop.f32.mrf.mxu1 }
 0x52d   : > { %v8364_v58 = vadd.f32 %v8363_v17, %v8362_v14 }
 0x52f   : > { %v6291_v31 = vadd.f32 %v8364_v58, %v7151_v6 }
 0x535   : > { %v8381_v56 = vpop.f32.mrf.mxu0 }
 0x537   : > { %v8382_v13 = vpop.f32.mrf.mxu0 }
 0x538   : > { %v8383_v21 = vadd.f32 %v8382_v13, %v8381_v56 }
 0x539   : > { %v8384_v36 = vpop.f32.mrf.mxu0 }
 0x53a   : > { %v6329_v57 = vadd.f32 %v8383_v21, %v6288_v51 }
 0x53b   : > { %v8385_v20 = vpop.f32.mrf.mxu0 }
 0x53c   : > { %v8386_v44 = vadd.f32 %v8385_v20, %v8384_v36  ;;  %v6335_v40 = vmax.f32 %v6329_v57, 0.0 }
 0x53e   : > { %v6332_v16 = vadd.f32 %v8386_v44, %v6291_v31 }
 0x540   : > { %v6336_v8 = vmax.f32 %v6332_v16, 0.0 }
 0x542   : > { %v6337_v1 = vpack.c.bf16 %v6336_v8, %v6335_v40 }
 0x544   : > { %8568 = vmatmul.mubr.bf16.vlgmr.msra.gmra.mxu1 %v6337_v1 }
 0x604   : > { %v6443_v59 = vpop.f32.mrf.mxu1 }
 0x605   : > { %v6444_v30 = vadd.f32 %v7188_v27, %v6443_v59 }
 0x606   : > { %v8569_v35 = vpop.f32.mrf.mxu1 }
 0x607   : > { %v6450_v63 = vmax.f32 %v6444_v30, 0.0 }
 0x608   : > { %v6446_v4 = vpop.f32.mrf.mxu1 }
 0x609   : > { %v6447_v61 = vadd.f32 %v7188_v27, %v6446_v4 }
 0x60a   : > { %v8570_v11 = vpop.f32.mrf.mxu1 }
 0x60b   : > { %v6451_v28 = vmax.f32 %v6447_v61, 0.0 }
 0x60d   : > { %v6452_v53 = vpack.c.bf16 %v6451_v28, %v6450_v63 }
 0x60f   : > { %8588 = vmatmul.mubr.bf16.vlgmr.msra.gmra.mxu0 %v6452_v53 }
 0x6cf   : > { %v6558_v39 = vpop.f32.mrf.mxu0 }
 0x6d0   : > { %v6559_v24 = vadd.f32 %v7197_v26, %v6558_v39 }
 0x6d1   : > { %v8589_v19 = vpop.f32.mrf.mxu0 }
 0x6d3   : > { %v6561_v60 = vpop.f32.mrf.mxu0 }
 0x6d4   : > { %v6562_v32 = vadd.f32 %v7197_v26, %v6561_v60 }
 0x6d5   : > { %v8590_v47 = vpop.f32.mrf.mxu0 }
 0x6d6   : > { %v7607_v41 = vpack.c.bf16 %v6562_v32, %v6559_v24 }
 0x6d8   : > { %7608 = vst [vmem:[%s442_s19] sm:$0xff] %v7607_v41  }
 0x6d9 PF: > { %s23_s25 = sadd.s32 1, %s9104_s25  }
 0x6da   : > { %p20_p5 = scmp.ge.s32.totalorder %s23_s25, 5  }
 0x6dc   :  { %22 = sbr.rel (!%p20_p5) target bundleno = 1 (0x1), region = 102 }

</bundles_post_ra>
